<compile_context>
chip_gen: v7x
topology: tpu7x:2x2x1
jax: 0.10.0
libtpu: 0.0.40
codegen_flags: <defaults>
</compile_context>

<pallas_src>
import math
import jax
import jax.numpy as jnp
from jax.experimental import pallas as pl
from jax.experimental.pallas import tpu as pltpu


_LANE = 128   # TPU lane width; final outputs are padded to this for dense stores


# ----------------------------------------------------------------------------
# FusionLayer architecture (matches the PyTorch module)
# ----------------------------------------------------------------------------

_FUSION_SPECS = [
    # (cin, cout, k, stride, pad, outpad, is_transpose, relu)
    (3, 16, 5, 2, 3, 0, False, True),
    (16, 8, 3, 2, 2, 0, False, True),
    (8, 8, 3, 2, 2, 1, True, True),
    (8, 16, 5, 2, 3, 1, True, True),
    (16, 1, 2, 1, 0, 0, False, False),
]


def init_fusion_params(key):
    """PyTorch-equivalent init: xavier_uniform_ weights, default-uniform bias."""
    params = []
    for (cin, cout, k, _, _, _, tr, _) in _FUSION_SPECS:
        key, wk, bk = jax.random.split(key, 3)
        rf = k * k
        if tr:
            shape = (cin, cout, k, k)          # PyTorch ConvTranspose2d layout
            fan_in, fan_out = cout * rf, cin * rf
        else:
            shape = (cout, cin, k, k)          # PyTorch Conv2d layout
            fan_in, fan_out = cin * rf, cout * rf
        bound = math.sqrt(6.0 / (fan_in + fan_out))       # xavier_uniform_, gain=1
        w = jax.random.uniform(wk, shape, jnp.float32, -bound, bound)
        bb = 1.0 / math.sqrt(fan_in)
        b = jax.random.uniform(bk, (cout,), jnp.float32, -bb, bb)
        params.append((w, b))
    return params


def _layer_geometry(size_in, spec):
    """Effective-input coordinate map eff(i) = a*i + b_off, equivalent stride
    (1 for transposed convs after zero-dilation) and output size."""
    _, _, k, s, p, op, tr, _ = spec
    if tr:
        a, b_off, s_eff = s, k - 1 - p, 1
        size_eff = (size_in - 1) * s + 1 + (k - 1 - p) + (k - 1 - p + op)
    else:
        a, b_off, s_eff = 1, p, s
        size_eff = size_in + 2 * p
    size_out = (size_eff - k) // s_eff + 1
    return a, b_off, s_eff, size_out


def fusion_output_size(size_in):
    size = size_in
    for spec in _FUSION_SPECS:
        _, _, _, size = _layer_geometry(size, spec)
    return size


# ----------------------------------------------------------------------------
# One-time weight / interp-matrix preprocessing (plain JAX, outside kernel)
# ----------------------------------------------------------------------------

def _interp_matrix(out_size, in_size):
    """Bilinear (align_corners=True) 1-D interpolation matrix (out, in)."""
    if in_size == 1:
        return jnp.ones((out_size, 1), jnp.float32)
    if out_size == 1:
        return jnp.zeros((1, in_size), jnp.float32).at[0, 0].set(1.0)
    src = jnp.arange(out_size, dtype=jnp.float32) * (in_size - 1) / (out_size - 1)
    i0 = jnp.clip(jnp.floor(src).astype(jnp.int32), 0, in_size - 2)
    frac = src - i0.astype(jnp.float32)
    rows = jnp.arange(out_size)
    m = jnp.zeros((out_size, in_size), jnp.float32)
    m = m.at[rows, i0].add(1.0 - frac)
    m = m.at[rows, i0 + 1].add(frac)
    return m


def build_prep_operands(batch, h_in, w_in, tgt):
    """Interp matrices with batch folded into rows (block-diag left matrix) and
    the [main|aux] lane groups folded into the right matrices.  The aux right
    matrix is padded to 128 lanes so the cos/sin store is unmasked."""
    ah = _interp_matrix(tgt, h_in)                                    # (tgt, Hin)
    ah_bd = jnp.kron(jnp.eye(batch, dtype=jnp.float32), ah)           # (B*tgt, B*Hin)
    awt = _interp_matrix(tgt, w_in).T                                 # (Win, tgt)
    awt_main = jnp.zeros((2 * w_in, tgt), jnp.float32).at[:w_in].set(awt)
    awt_aux = jnp.zeros((2 * w_in, _LANE), jnp.float32).at[w_in:, :tgt].set(awt)
    return ah_bd, awt_main, awt_aux


def preprocess_fusion_params(branch_params, size_in, batch):
    """Fold each Conv2d / ConvTranspose2d into per-H-tap matmul operands with
    the batch collapsed into rows (block-diagonal S matrices).

    Per layer returns:
      S    (k, B*Ho[, padded], B*Hi)   bf16  -- shared by both branches
      M    (2, k, Cin*Wi, N[, padded]) bf16  -- per-branch W taps + channel mix
      bias (2, 1, N[, padded])         f32
    The last layer is padded to rows%8==0 and 128 lanes for a dense store.
    """
    layers = []
    size = size_in
    n_layers = len(_FUSION_SPECS)
    eye_b = jnp.eye(batch, dtype=jnp.float32)
    for li, spec in enumerate(_FUSION_SPECS):
        cin, cout, k, s, p, op, tr, relu = spec
        a, b_off, s_eff, size_out = _layer_geometry(size, spec)
        last = li == n_layers - 1

        # H-tap row-selection matrices, block-diagonal over batch.
        h_raw = jnp.arange(size)
        ho = jnp.arange(size_out)
        s_taps = []
        for ki in range(k):
            s_single = ((a * h_raw[None, :] + b_off)
                        == (s_eff * ho[:, None] + ki)).astype(jnp.float32)
            s_taps.append(jnp.kron(eye_b, s_single))          # (B*Ho, B*Hi)
        s_stack = jnp.stack(s_taps)                           # (k, B*Ho, B*Hi)
        if last:
            rows = batch * size_out
            rows_pad = -(-rows // 8) * 8
            s_stack = jnp.pad(s_stack, ((0, 0), (0, rows_pad - rows), (0, 0)))

        # W-direction tap index per (raw input col, output col).
        w_raw = jnp.arange(size)
        wo = jnp.arange(size_out)
        kj = (a * w_raw[:, None] + b_off) - s_eff * wo[None, :]    # (Wi, Wo)
        valid = ((kj >= 0) & (kj < k)).astype(jnp.float32)
        kj_c = jnp.clip(kj, 0, k - 1)

        m_branches, b_branches = [], []
        for bp in branch_params:
            w, bias = bp[li]
            if tr:
                # ConvTranspose2d == zero-dilate + pad + stride-1 conv with the
                # spatially flipped, channel-swapped kernel.
                w_conv = jnp.transpose(w[:, :, ::-1, ::-1], (1, 0, 2, 3))
            else:
                w_conv = w                                          # (cout,cin,k,k)
            m_taps = []
            for ki in range(k):
                wk = w_conv[:, :, ki, :]                            # (cout,cin,k)
                g = wk[:, :, kj_c] * valid[None, None, :, :]        # (cout,cin,Wi,Wo)
                m_taps.append(
                    jnp.transpose(g, (1, 2, 0, 3)).reshape(cin * size,
                                                           cout * size_out))
            m = jnp.stack(m_taps)                                   # (k, Cin*Wi, Cout*Wo)
            b_row = jnp.repeat(bias, size_out)[None, :]             # (1, Cout*Wo)
            if last:
                n = cout * size_out
                n_pad = -(-n // _LANE) * _LANE
                m = jnp.pad(m, ((0, 0), (0, 0), (0, n_pad - n)))
                b_row = jnp.pad(b_row, ((0, 0), (0, n_pad - n)))
            m_branches.append(m)
            b_branches.append(b_row)

        layers.append((s_stack.astype(jnp.bfloat16),
                       jnp.stack(m_branches).astype(jnp.bfloat16),
                       jnp.stack(b_branches).astype(jnp.float32)))
        size = size_out
    return layers


# ----------------------------------------------------------------------------
# Single fused kernel: resize + fs softmax + both FusionLayer branches
# ----------------------------------------------------------------------------

def ggcnn_asgnet_fused(maps_cat, fs_cat, prep_ops, fusion_mats):
    """maps_cat: (2, B*Hin, 2*Win) f32, branch 0 = [pos|cos], branch 1 = [width|sin]
       fs_cat:   (2, B*Hf, Wf)     f32, leading axis = fs channel
    Returns (o_fuse (2, rows_pad, 128) f32, o_aux (2, B*tgt, 128) f32)."""
    ah_bd, awt_main, awt_aux = prep_ops
    n_layers = len(fusion_mats)
    ks = tuple(spec[2] for spec in _FUSION_SPECS)
    relus = tuple(spec[7] for spec in _FUSION_SPECS)

    rows_in, lanes_in = int(maps_cat.shape[1]), int(maps_cat.shape[2])
    rows_out = int(ah_bd.shape[0])                       # B * tgt
    rows_fuse = int(fusion_mats[-1][0].shape[1])         # padded B*17
    n_fuse = int(fusion_mats[-1][2].shape[2])            # 128

    inputs = [maps_cat, fs_cat, ah_bd, awt_main, awt_aux]
    in_specs = [
        pl.BlockSpec((None, rows_in, lanes_in), lambda br: (br, 0, 0)),
        pl.BlockSpec(tuple(fs_cat.shape), lambda br: (0, 0, 0)),
        pl.BlockSpec(tuple(ah_bd.shape), lambda br: (0, 0)),
        pl.BlockSpec(tuple(awt_main.shape), lambda br: (0, 0)),
        pl.BlockSpec(tuple(awt_aux.shape), lambda br: (0, 0)),
    ]
    for (s_mat, m_mat, b_row) in fusion_mats:
        inputs.extend([s_mat, m_mat, b_row])
        in_specs.extend([
            pl.BlockSpec(tuple(s_mat.shape), lambda br: (0, 0, 0)),
            pl.BlockSpec((None,) + tuple(m_mat.shape[1:]),
                         lambda br: (br, 0, 0, 0)),
            pl.BlockSpec((None,) + tuple(b_row.shape[1:]),
                         lambda br: (br, 0, 0)),
        ])

    def kernel(*refs):
        maps_ref, fs_ref, ah_ref, awm_ref, awa_ref = refs[:5]
        o_fuse, o_aux = refs[-2], refs[-1]

        # --- bilinear resize (align_corners=True) of [main|aux] heatmaps -----
        xh = jnp.dot(ah_ref[...], maps_ref[...],
                     preferred_element_type=jnp.float32)            # (B*tgt, 2*Win)
        main_r = jnp.dot(xh, awm_ref[...],
                         preferred_element_type=jnp.float32)        # (B*tgt, tgt)
        # cos (branch 0) / sin (branch 1), already padded to 128 lanes -> dense store.
        o_aux[...] = jnp.dot(xh, awa_ref[...],
                             preferred_element_type=jnp.float32)

        # --- normalize_fs_out: 2-channel softmax via stable sigmoid ----------
        # TODO(synk): normalize_fs_out was not provided; assuming channel softmax.
        d = fs_ref[0] - fs_ref[1]
        e = jnp.exp(-jnp.abs(d))
        inv = 1.0 / (1.0 + e)
        p0 = jnp.where(d >= 0.0, inv, e * inv)
        p1 = 1.0 - p0

        # --- FusionLayer (5 conv layers), all activations in vregs -----------
        x = jnp.concatenate([main_r, p0, p1], axis=-1).astype(jnp.bfloat16)
        r = 5
        for li in range(n_layers):
            s_ref, m_ref, b_ref = refs[r], refs[r + 1], refs[r + 2]
            r += 3
            acc = None
            for ki in range(ks[li]):
                t = jnp.dot(s_ref[ki], x, preferred_element_type=jnp.float32)
                t = jnp.dot(t.astype(jnp.bfloat16), m_ref[ki],
                            preferred_element_type=jnp.float32)
                acc = t if acc is None else acc + t
            acc = acc + b_ref[...]
            if li + 1 < n_layers:
                x = (jnp.maximum(acc, 0.0) if relus[li] else acc
                     ).astype(jnp.bfloat16)
            else:
                o_fuse[...] = acc          # (rows_pad, 128) dense f32 store

    out_shapes = (
        jax.ShapeDtypeStruct((2, rows_fuse, n_fuse), jnp.float32),   # fusion out
        jax.ShapeDtypeStruct((2, rows_out, _LANE), jnp.float32),     # cos / sin
    )
    out_specs = (
        pl.BlockSpec((None, rows_fuse, n_fuse), lambda br: (br, 0, 0)),
        pl.BlockSpec((None, rows_out, _LANE), lambda br: (br, 0, 0)),
    )
    return pl.pallas_call(
        kernel,
        out_shape=out_shapes,
        grid=(2,),                        # branch axis; one per TC on v7x
        in_specs=in_specs,
        out_specs=out_specs,
        compiler_params=pltpu.CompilerParams(dimension_semantics=("parallel",)),
    )(*inputs)


# ----------------------------------------------------------------------------
# Frozen-submodule surrogates (weights not provided)
# ----------------------------------------------------------------------------

def ggcnn_stub(depth_x):
    # TODO(synk): real GGCNN backbone weights/definition not provided; frozen
    # surrogate producing same-shape pos/cos/sin/width heatmaps.
    pos = jax.nn.sigmoid(depth_x)
    cos = jnp.cos(depth_x * jnp.pi)
    sin = jnp.sin(depth_x * jnp.pi)
    width = jax.nn.relu(depth_x)
    return pos, cos, sin, width


def asgnet_stub(rgb_x, support_x, support_y, s_seed):
    # TODO(synk): AsgnetModel not provided; frozen surrogate producing a
    # 2-channel segmentation logit map at rgb resolution.
    m = jnp.mean(rgb_x, axis=1, keepdims=True)
    bias = jnp.mean(support_y) + jnp.mean(support_x) * 0.0 + jnp.sum(s_seed) * 0.0
    fs_out = jnp.concatenate([m + bias, -m], axis=1)
    return fs_out


# ----------------------------------------------------------------------------
# GGCNN_ASGNET forward
# ----------------------------------------------------------------------------

def ggcnn_asgnet_forward(prep_ops, fusion_mats, depth_x, rgb_x,
                         support_x, support_y, s_seed):
    pos, cos, sin, width = ggcnn_stub(depth_x)
    fs_out = asgnet_stub(rgb_x, support_x, support_y, s_seed)

    B = int(depth_x.shape[0])
    h_in, w_in = int(pos.shape[2]), int(pos.shape[3])
    hf, wf = int(fs_out.shape[2]), int(fs_out.shape[3])
    # Literal reproduction of the reference's resize target:
    # size = (fs_out[0].shape[2], fs_out.shape[3]) == (Wf, Wf).
    tgt = wf
    assert hf == wf, "reference model concatenates fs_out with a (Wf,Wf) resize"

    # Lane-concatenate the per-branch heatmap pairs (rows = batch-major H):
    # branch 0 = [pos|cos], branch 1 = [width|sin].
    br0 = jnp.concatenate([pos[:, 0], cos[:, 0]], axis=-1).reshape(B * h_in, 2 * w_in)
    br1 = jnp.concatenate([width[:, 0], sin[:, 0]], axis=-1).reshape(B * h_in, 2 * w_in)
    maps_cat = jnp.stack([br0, br1])                              # (2, B*Hin, 2*Win)

    # fs channels as two (B*Hf, Wf) slabs, channel on the leading axis.
    fs_cat = jnp.transpose(fs_out, (1, 0, 2, 3)).reshape(2, B * hf, wf)

    o_fuse, o_aux = ggcnn_asgnet_fused(maps_cat, fs_cat, prep_ops, fusion_mats)

    h_last = fusion_output_size(tgt)                              # 17
    fused = o_fuse[:, :B * h_last, :h_last].reshape(2, B, h_last, h_last)
    pos_out = fused[0][:, None]
    width_out = fused[1][:, None]
    aux = o_aux[:, :, :tgt].reshape(2, B, tgt, tgt)
    cos_out = aux[0][:, None]
    sin_out = aux[1][:, None]
    return pos_out, cos_out, sin_out, width_out


# ----------------------------------------------------------------------------
# main
# ----------------------------------------------------------------------------

if __name__ == "__main__":
    key = jax.random.PRNGKey(0)
    k_pos, k_wid, k_d, k_r, k_sx, k_sy, k_ss = jax.random.split(key, 7)

    params = {
        "pos_fusion": init_fusion_params(k_pos),
        "width_fusion": init_fusion_params(k_wid),
    }

    B = 2
    depth_x = jax.random.normal(k_d, (B, 1, 24, 24), jnp.float32)
    rgb_x = jax.random.normal(k_r, (B, 3, 16, 16), jnp.float32)
    support_x = jax.random.normal(k_sx, (B, 1, 3, 16, 16), jnp.float32)
    support_y = (jax.random.uniform(k_sy, (B, 1, 16, 16)) > 0.5).astype(jnp.float32)
    s_seed = jax.random.randint(k_ss, (B, 2), 0, 16).astype(jnp.float32)

    # One-time preprocessing of interp matrices and folded FusionLayer weights.
    tgt = int(rgb_x.shape[3])                 # few-shot output spatial size (== 16)
    prep_ops = build_prep_operands(B, int(depth_x.shape[2]), int(depth_x.shape[3]), tgt)
    fusion_mats = preprocess_fusion_params(
        [params["pos_fusion"], params["width_fusion"]], size_in=tgt, batch=B)

    fwd = jax.jit(ggcnn_asgnet_forward)
    pos_out, cos_out, sin_out, width_out = fwd(
        prep_ops, fusion_mats, depth_x, rgb_x, support_x, support_y, s_seed)
    jax.block_until_ready((pos_out, cos_out, sin_out, width_out))

    assert pos_out.shape == (B, 1, 17, 17), pos_out.shape
    assert width_out.shape == (B, 1, 17, 17), width_out.shape
    assert cos_out.shape == (B, 1, 16, 16), cos_out.shape
    assert sin_out.shape == (B, 1, 16, 16), sin_out.shape
    assert bool(jnp.all(jnp.isfinite(pos_out)))
    assert bool(jnp.all(jnp.isfinite(width_out)))
    assert bool(jnp.all(jnp.isfinite(cos_out)))
    assert bool(jnp.all(jnp.isfinite(sin_out)))

    print("KERNEL_OK")
</pallas_src>

<mosaic_0001>
module attributes {stable_mosaic.version = 11 : i64} {
  func.func @kernel(%arg0: i32, %arg1: memref<1x48x48xf32, #tpu.memory_space<vmem>>, %arg2: memref<2x32x16xf32, #tpu.memory_space<vmem>>, %arg3: memref<32x48xf32, #tpu.memory_space<vmem>>, %arg4: memref<48x16xf32, #tpu.memory_space<vmem>>, %arg5: memref<48x128xf32, #tpu.memory_space<vmem>>, %arg6: memref<5x18x32xbf16, #tpu.memory_space<vmem>>, %arg7: memref<1x5x48x144xbf16, #tpu.memory_space<vmem>>, %arg8: memref<1x1x144xf32, #tpu.memory_space<vmem>>, %arg9: memref<3x12x18xbf16, #tpu.memory_space<vmem>>, %arg10: memref<1x3x144x48xbf16, #tpu.memory_space<vmem>>, %arg11: memref<1x1x48xf32, #tpu.memory_space<vmem>>, %arg12: memref<3x20x12xbf16, #tpu.memory_space<vmem>>, %arg13: memref<1x3x48x80xbf16, #tpu.memory_space<vmem>>, %arg14: memref<1x1x80xf32, #tpu.memory_space<vmem>>, %arg15: memref<5x36x20xbf16, #tpu.memory_space<vmem>>, %arg16: memref<1x5x80x288xbf16, #tpu.memory_space<vmem>>, %arg17: memref<1x1x288xf32, #tpu.memory_space<vmem>>, %arg18: memref<2x40x36xbf16, #tpu.memory_space<vmem>>, %arg19: memref<1x2x288x128xbf16, #tpu.memory_space<vmem>>, %arg20: memref<1x1x128xf32, #tpu.memory_space<vmem>>, %arg21: memref<1x40x128xf32, #tpu.memory_space<vmem>>, %arg22: memref<1x32x128xf32, #tpu.memory_space<vmem>>) attributes {dimension_semantics = [#tpu.dimension_semantics<parallel>], iteration_bounds = array<i64: 2>, scalar_prefetch = 0 : i64, scratch_operands = 0 : i64, tpu.core_type = #tpu.core_type<tc>, window_params = [{transform_indices = @transform_0, window_bounds = array<i64: 1, 48, 48>}, {pipeline_mode = #tpu.pipeline_mode<synchronous>, transform_indices = @transform_1, window_bounds = array<i64: 2, 32, 16>}, {pipeline_mode = #tpu.pipeline_mode<synchronous>, transform_indices = @transform_2, window_bounds = array<i64: 32, 48>}, {pipeline_mode = #tpu.pipeline_mode<synchronous>, transform_indices = @transform_3, window_bounds = array<i64: 48, 16>}, {pipeline_mode = #tpu.pipeline_mode<synchronous>, transform_indices = @transform_4, window_bounds = array<i64: 48, 128>}, {pipeline_mode = #tpu.pipeline_mode<synchronous>, transform_indices = @transform_5, window_bounds = array<i64: 5, 18, 32>}, {transform_indices = @transform_6, window_bounds = array<i64: 1, 5, 48, 144>}, {transform_indices = @transform_7, window_bounds = array<i64: 1, 1, 144>}, {pipeline_mode = #tpu.pipeline_mode<synchronous>, transform_indices = @transform_8, window_bounds = array<i64: 3, 12, 18>}, {transform_indices = @transform_9, window_bounds = array<i64: 1, 3, 144, 48>}, {transform_indices = @transform_10, window_bounds = array<i64: 1, 1, 48>}, {pipeline_mode = #tpu.pipeline_mode<synchronous>, transform_indices = @transform_11, window_bounds = array<i64: 3, 20, 12>}, {transform_indices = @transform_12, window_bounds = array<i64: 1, 3, 48, 80>}, {transform_indices = @transform_13, window_bounds = array<i64: 1, 1, 80>}, {pipeline_mode = #tpu.pipeline_mode<synchronous>, transform_indices = @transform_14, window_bounds = array<i64: 5, 36, 20>}, {transform_indices = @transform_15, window_bounds = array<i64: 1, 5, 80, 288>}, {transform_indices = @transform_16, window_bounds = array<i64: 1, 1, 288>}, {pipeline_mode = #tpu.pipeline_mode<synchronous>, transform_indices = @transform_17, window_bounds = array<i64: 2, 40, 36>}, {transform_indices = @transform_18, window_bounds = array<i64: 1, 2, 288, 128>}, {transform_indices = @transform_19, window_bounds = array<i64: 1, 1, 128>}, {transform_indices = @transform_20, window_bounds = array<i64: 1, 40, 128>}, {transform_indices = @transform_21, window_bounds = array<i64: 1, 32, 128>}]} {
    %c0 = arith.constant 0 : index
    %c0_0 = arith.constant 0 : index
    %0 = vector.load %arg3[%c0, %c0_0] : memref<32x48xf32, #tpu.memory_space<vmem>>, vector<32x48xf32>
    %c0_1 = arith.constant 0 : index
    %c0_2 = arith.constant 0 : index
    %c0_3 = arith.constant 0 : index
    %1 = vector.load %arg1[%c0_1, %c0_2, %c0_3] : memref<1x48x48xf32, #tpu.memory_space<vmem>>, vector<1x48x48xf32>
    %2 = vector.shape_cast %1 : vector<1x48x48xf32> to vector<48x48xf32>
    %cst = arith.constant dense<0.000000e+00> : vector<32x48xf32>
    %3 = tpu.matmul %0, %2, %cst {dimension_numbers = #tpu.dot_dimension_numbers<[1], [0], [0], [1], [0, 0, 1, 1], [], []>} : vector<32x48xf32>, vector<48x48xf32>, vector<32x48xf32> -> vector<32x48xf32>
    %c0_4 = arith.constant 0 : index
    %c0_5 = arith.constant 0 : index
    %4 = vector.load %arg4[%c0_4, %c0_5] : memref<48x16xf32, #tpu.memory_space<vmem>>, vector<48x16xf32>
    %cst_6 = arith.constant dense<0.000000e+00> : vector<32x16xf32>
    %5 = tpu.matmul %3, %4, %cst_6 {dimension_numbers = #tpu.dot_dimension_numbers<[1], [0], [0], [1], [0, 0, 1, 1], [], []>} : vector<32x48xf32>, vector<48x16xf32>, vector<32x16xf32> -> vector<32x16xf32>
    %c0_7 = arith.constant 0 : index
    %c0_8 = arith.constant 0 : index
    %6 = vector.load %arg5[%c0_7, %c0_8] : memref<48x128xf32, #tpu.memory_space<vmem>>, vector<48x128xf32>
    %cst_9 = arith.constant dense<0.000000e+00> : vector<32x128xf32>
    %7 = tpu.matmul %3, %6, %cst_9 {dimension_numbers = #tpu.dot_dimension_numbers<[1], [0], [0], [1], [0, 0, 1, 1], [], []>} : vector<32x48xf32>, vector<48x128xf32>, vector<32x128xf32> -> vector<32x128xf32>
    %c0_10 = arith.constant 0 : index
    %c0_11 = arith.constant 0 : index
    %c0_12 = arith.constant 0 : index
    %8 = vector.load %arg22[%c0_10, %c0_11, %c0_12] : memref<1x32x128xf32, #tpu.memory_space<vmem>>, vector<1x32x128xf32>
    %9 = vector.shape_cast %8 : vector<1x32x128xf32> to vector<32x128xf32>
    %10 = vector.shape_cast %7 : vector<32x128xf32> to vector<1x32x128xf32>
    tpu.vector_store %arg22[%c0_10, %c0_11, %c0_12], %10 {strides = array<i32>} : memref<1x32x128xf32, #tpu.memory_space<vmem>>, vector<1x32x128xf32>,
    %c0_13 = arith.constant 0 : index
    %c0_14 = arith.constant 0 : index
    %c0_15 = arith.constant 0 : index
    %11 = vector.load %arg2[%c0_13, %c0_14, %c0_15] : memref<2x32x16xf32, #tpu.memory_space<vmem>>, vector<1x32x16xf32>
    %12 = vector.shape_cast %11 : vector<1x32x16xf32> to vector<32x16xf32>
    %c1 = arith.constant 1 : index
    %c0_16 = arith.constant 0 : index
    %c0_17 = arith.constant 0 : index
    %13 = vector.load %arg2[%c1, %c0_16, %c0_17] : memref<2x32x16xf32, #tpu.memory_space<vmem>>, vector<1x32x16xf32>
    %14 = vector.shape_cast %13 : vector<1x32x16xf32> to vector<32x16xf32>
    %15 = arith.subf %12, %14 : vector<32x16xf32>
    %16 = math.absf %15 : vector<32x16xf32>
    %cst_18 = arith.constant 0.000000e+00 : f32
    %17 = vector.broadcast %cst_18 : f32 to vector<32x16xf32>
    %18 = arith.subf %17, %16 : vector<32x16xf32>
    %19 = math.exp %18 : vector<32x16xf32>
    %cst_19 = arith.constant 1.000000e+00 : f32
    %20 = vector.broadcast %cst_19 : f32 to vector<32x16xf32>
    %21 = arith.addf %20, %19 : vector<32x16xf32>
    %cst_20 = arith.constant 1.000000e+00 : f32
    %22 = vector.broadcast %cst_20 : f32 to vector<32x16xf32>
    %23 = arith.divf %22, %21 : vector<32x16xf32>
    %cst_21 = arith.constant 0.000000e+00 : f32
    %24 = vector.broadcast %cst_21 : f32 to vector<32x16xf32>
    %25 = arith.cmpf oge, %15, %24 : vector<32x16xf32>
    %26 = arith.mulf %19, %23 : vector<32x16xf32>
    %27 = arith.select %25, %23, %26 : vector<32x16xi1>, vector<32x16xf32>
    %cst_22 = arith.constant 1.000000e+00 : f32
    %28 = vector.broadcast %cst_22 : f32 to vector<32x16xf32>
    %29 = arith.subf %28, %27 : vector<32x16xf32>
    %30 = tpu.concatenate %5, %27, %29 in 1 : vector<32x16xf32>, vector<32x16xf32>, vector<32x16xf32> -> vector<32x48xf32>
    %31 = arith.truncf %30 : vector<32x48xf32> to vector<32x48xbf16>
    %c0_23 = arith.constant 0 : index
    %c0_24 = arith.constant 0 : index
    %c0_25 = arith.constant 0 : index
    %32 = vector.load %arg6[%c0_23, %c0_24, %c0_25] : memref<5x18x32xbf16, #tpu.memory_space<vmem>>, vector<1x18x32xbf16>
    %33 = vector.shape_cast %32 : vector<1x18x32xbf16> to vector<18x32xbf16>
    %cst_26 = arith.constant dense<0.000000e+00> : vector<18x48xf32>
    %34 = tpu.matmul %33, %31, %cst_26 {dimension_numbers = #tpu.dot_dimension_numbers<[1], [0], [0], [1], [0, 0, 1, 1], [], []>} : vector<18x32xbf16>, vector<32x48xbf16>, vector<18x48xf32> -> vector<18x48xf32>
    %35 = arith.truncf %34 : vector<18x48xf32> to vector<18x48xbf16>
    %c0_27 = arith.constant 0 : index
    %c0_28 = arith.constant 0 : index
    %c0_29 = arith.constant 0 : index
    %c0_30 = arith.constant 0 : index
    %36 = vector.load %arg7[%c0_27, %c0_28, %c0_29, %c0_30] : memref<1x5x48x144xbf16, #tpu.memory_space<vmem>>, vector<1x1x48x144xbf16>
    %37 = vector.shape_cast %36 : vector<1x1x48x144xbf16> to vector<48x144xbf16>
    %cst_31 = arith.constant dense<0.000000e+00> : vector<18x144xf32>
    %38 = tpu.matmul %35, %37, %cst_31 {dimension_numbers = #tpu.dot_dimension_numbers<[1], [0], [0], [1], [0, 0, 1, 1], [], []>} : vector<18x48xbf16>, vector<48x144xbf16>, vector<18x144xf32> -> vector<18x144xf32>
    %c1_32 = arith.constant 1 : index
    %c0_33 = arith.constant 0 : index
    %c0_34 = arith.constant 0 : index
    %39 = vector.load %arg6[%c1_32, %c0_33, %c0_34] : memref<5x18x32xbf16, #tpu.memory_space<vmem>>, vector<1x18x32xbf16>
    %40 = vector.shape_cast %39 : vector<1x18x32xbf16> to vector<18x32xbf16>
    %cst_35 = arith.constant dense<0.000000e+00> : vector<18x48xf32>
    %41 = tpu.matmul %40, %31, %cst_35 {dimension_numbers = #tpu.dot_dimension_numbers<[1], [0], [0], [1], [0, 0, 1, 1], [], []>} : vector<18x32xbf16>, vector<32x48xbf16>, vector<18x48xf32> -> vector<18x48xf32>
    %42 = arith.truncf %41 : vector<18x48xf32> to vector<18x48xbf16>
    %c0_36 = arith.constant 0 : index
    %c1_37 = arith.constant 1 : index
    %c0_38 = arith.constant 0 : index
    %c0_39 = arith.constant 0 : index
    %43 = vector.load %arg7[%c0_36, %c1_37, %c0_38, %c0_39] : memref<1x5x48x144xbf16, #tpu.memory_space<vmem>>, vector<1x1x48x144xbf16>
    %44 = vector.shape_cast %43 : vector<1x1x48x144xbf16> to vector<48x144xbf16>
    %cst_40 = arith.constant dense<0.000000e+00> : vector<18x144xf32>
    %45 = tpu.matmul %42, %44, %cst_40 {dimension_numbers = #tpu.dot_dimension_numbers<[1], [0], [0], [1], [0, 0, 1, 1], [], []>} : vector<18x48xbf16>, vector<48x144xbf16>, vector<18x144xf32> -> vector<18x144xf32>
    %46 = arith.addf %38, %45 : vector<18x144xf32>
    %c2 = arith.constant 2 : index
    %c0_41 = arith.constant 0 : index
    %c0_42 = arith.constant 0 : index
    %47 = vector.load %arg6[%c2, %c0_41, %c0_42] : memref<5x18x32xbf16, #tpu.memory_space<vmem>>, vector<1x18x32xbf16>
    %48 = vector.shape_cast %47 : vector<1x18x32xbf16> to vector<18x32xbf16>
    %cst_43 = arith.constant dense<0.000000e+00> : vector<18x48xf32>
    %49 = tpu.matmul %48, %31, %cst_43 {dimension_numbers = #tpu.dot_dimension_numbers<[1], [0], [0], [1], [0, 0, 1, 1], [], []>} : vector<18x32xbf16>, vector<32x48xbf16>, vector<18x48xf32> -> vector<18x48xf32>
    %50 = arith.truncf %49 : vector<18x48xf32> to vector<18x48xbf16>
    %c0_44 = arith.constant 0 : index
    %c2_45 = arith.constant 2 : index
    %c0_46 = arith.constant 0 : index
    %c0_47 = arith.constant 0 : index
    %51 = vector.load %arg7[%c0_44, %c2_45, %c0_46, %c0_47] : memref<1x5x48x144xbf16, #tpu.memory_space<vmem>>, vector<1x1x48x144xbf16>
    %52 = vector.shape_cast %51 : vector<1x1x48x144xbf16> to vector<48x144xbf16>
    %cst_48 = arith.constant dense<0.000000e+00> : vector<18x144xf32>
    %53 = tpu.matmul %50, %52, %cst_48 {dimension_numbers = #tpu.dot_dimension_numbers<[1], [0], [0], [1], [0, 0, 1, 1], [], []>} : vector<18x48xbf16>, vector<48x144xbf16>, vector<18x144xf32> -> vector<18x144xf32>
    %54 = arith.addf %46, %53 : vector<18x144xf32>
    %c3 = arith.constant 3 : index
    %c0_49 = arith.constant 0 : index
    %c0_50 = arith.constant 0 : index
    %55 = vector.load %arg6[%c3, %c0_49, %c0_50] : memref<5x18x32xbf16, #tpu.memory_space<vmem>>, vector<1x18x32xbf16>
    %56 = vector.shape_cast %55 : vector<1x18x32xbf16> to vector<18x32xbf16>
    %cst_51 = arith.constant dense<0.000000e+00> : vector<18x48xf32>
    %57 = tpu.matmul %56, %31, %cst_51 {dimension_numbers = #tpu.dot_dimension_numbers<[1], [0], [0], [1], [0, 0, 1, 1], [], []>} : vector<18x32xbf16>, vector<32x48xbf16>, vector<18x48xf32> -> vector<18x48xf32>
    %58 = arith.truncf %57 : vector<18x48xf32> to vector<18x48xbf16>
    %c0_52 = arith.constant 0 : index
    %c3_53 = arith.constant 3 : index
    %c0_54 = arith.constant 0 : index
    %c0_55 = arith.constant 0 : index
    %59 = vector.load %arg7[%c0_52, %c3_53, %c0_54, %c0_55] : memref<1x5x48x144xbf16, #tpu.memory_space<vmem>>, vector<1x1x48x144xbf16>
    %60 = vector.shape_cast %59 : vector<1x1x48x144xbf16> to vector<48x144xbf16>
    %cst_56 = arith.constant dense<0.000000e+00> : vector<18x144xf32>
    %61 = tpu.matmul %58, %60, %cst_56 {dimension_numbers = #tpu.dot_dimension_numbers<[1], [0], [0], [1], [0, 0, 1, 1], [], []>} : vector<18x48xbf16>, vector<48x144xbf16>, vector<18x144xf32> -> vector<18x144xf32>
    %62 = arith.addf %54, %61 : vector<18x144xf32>
    %c4 = arith.constant 4 : index
    %c0_57 = arith.constant 0 : index
    %c0_58 = arith.constant 0 : index
    %63 = vector.load %arg6[%c4, %c0_57, %c0_58] : memref<5x18x32xbf16, #tpu.memory_space<vmem>>, vector<1x18x32xbf16>
    %64 = vector.shape_cast %63 : vector<1x18x32xbf16> to vector<18x32xbf16>
    %cst_59 = arith.constant dense<0.000000e+00> : vector<18x48xf32>
    %65 = tpu.matmul %64, %31, %cst_59 {dimension_numbers = #tpu.dot_dimension_numbers<[1], [0], [0], [1], [0, 0, 1, 1], [], []>} : vector<18x32xbf16>, vector<32x48xbf16>, vector<18x48xf32> -> vector<18x48xf32>
    %66 = arith.truncf %65 : vector<18x48xf32> to vector<18x48xbf16>
    %c0_60 = arith.constant 0 : index
    %c4_61 = arith.constant 4 : index
    %c0_62 = arith.constant 0 : index
    %c0_63 = arith.constant 0 : index
    %67 = vector.load %arg7[%c0_60, %c4_61, %c0_62, %c0_63] : memref<1x5x48x144xbf16, #tpu.memory_space<vmem>>, vector<1x1x48x144xbf16>
    %68 = vector.shape_cast %67 : vector<1x1x48x144xbf16> to vector<48x144xbf16>
    %cst_64 = arith.constant dense<0.000000e+00> : vector<18x144xf32>
    %69 = tpu.matmul %66, %68, %cst_64 {dimension_numbers = #tpu.dot_dimension_numbers<[1], [0], [0], [1], [0, 0, 1, 1], [], []>} : vector<18x48xbf16>, vector<48x144xbf16>, vector<18x144xf32> -> vector<18x144xf32>
    %70 = arith.addf %62, %69 : vector<18x144xf32>
    %c0_65 = arith.constant 0 : index
    %c0_66 = arith.constant 0 : index
    %c0_67 = arith.constant 0 : index
    %71 = vector.load %arg8[%c0_65, %c0_66, %c0_67] : memref<1x1x144xf32, #tpu.memory_space<vmem>>, vector<1x1x144xf32>
    %72 = vector.shape_cast %71 : vector<1x1x144xf32> to vector<1x144xf32>
    %73 = vector.broadcast %72 : vector<1x144xf32> to vector<18x144xf32>
    %74 = arith.addf %70, %73 : vector<18x144xf32>
    %cst_68 = arith.constant 0.000000e+00 : f32
    %75 = vector.broadcast %cst_68 : f32 to vector<18x144xf32>
    %76 = arith.maximumf %74, %75 : vector<18x144xf32>
    %77 = arith.truncf %76 : vector<18x144xf32> to vector<18x144xbf16>
    %c0_69 = arith.constant 0 : index
    %c0_70 = arith.constant 0 : index
    %c0_71 = arith.constant 0 : index
    %78 = vector.load %arg9[%c0_69, %c0_70, %c0_71] : memref<3x12x18xbf16, #tpu.memory_space<vmem>>, vector<1x12x18xbf16>
    %79 = vector.shape_cast %78 : vector<1x12x18xbf16> to vector<12x18xbf16>
    %cst_72 = arith.constant dense<0.000000e+00> : vector<12x144xf32>
    %80 = tpu.matmul %79, %77, %cst_72 {dimension_numbers = #tpu.dot_dimension_numbers<[1], [0], [0], [1], [0, 0, 1, 1], [], []>} : vector<12x18xbf16>, vector<18x144xbf16>, vector<12x144xf32> -> vector<12x144xf32>
    %81 = arith.truncf %80 : vector<12x144xf32> to vector<12x144xbf16>
    %c0_73 = arith.constant 0 : index
    %c0_74 = arith.constant 0 : index
    %c0_75 = arith.constant 0 : index
    %c0_76 = arith.constant 0 : index
    %82 = vector.load %arg10[%c0_73, %c0_74, %c0_75, %c0_76] : memref<1x3x144x48xbf16, #tpu.memory_space<vmem>>, vector<1x1x144x48xbf16>
    %83 = vector.shape_cast %82 : vector<1x1x144x48xbf16> to vector<144x48xbf16>
    %cst_77 = arith.constant dense<0.000000e+00> : vector<12x48xf32>
    %84 = tpu.matmul %81, %83, %cst_77 {dimension_numbers = #tpu.dot_dimension_numbers<[1], [0], [0], [1], [0, 0, 1, 1], [], []>} : vector<12x144xbf16>, vector<144x48xbf16>, vector<12x48xf32> -> vector<12x48xf32>
    %c1_78 = arith.constant 1 : index
    %c0_79 = arith.constant 0 : index
    %c0_80 = arith.constant 0 : index
    %85 = vector.load %arg9[%c1_78, %c0_79, %c0_80] : memref<3x12x18xbf16, #tpu.memory_space<vmem>>, vector<1x12x18xbf16>
    %86 = vector.shape_cast %85 : vector<1x12x18xbf16> to vector<12x18xbf16>
    %cst_81 = arith.constant dense<0.000000e+00> : vector<12x144xf32>
    %87 = tpu.matmul %86, %77, %cst_81 {dimension_numbers = #tpu.dot_dimension_numbers<[1], [0], [0], [1], [0, 0, 1, 1], [], []>} : vector<12x18xbf16>, vector<18x144xbf16>, vector<12x144xf32> -> vector<12x144xf32>
    %88 = arith.truncf %87 : vector<12x144xf32> to vector<12x144xbf16>
    %c0_82 = arith.constant 0 : index
    %c1_83 = arith.constant 1 : index
    %c0_84 = arith.constant 0 : index
    %c0_85 = arith.constant 0 : index
    %89 = vector.load %arg10[%c0_82, %c1_83, %c0_84, %c0_85] : memref<1x3x144x48xbf16, #tpu.memory_space<vmem>>, vector<1x1x144x48xbf16>
    %90 = vector.shape_cast %89 : vector<1x1x144x48xbf16> to vector<144x48xbf16>
    %cst_86 = arith.constant dense<0.000000e+00> : vector<12x48xf32>
    %91 = tpu.matmul %88, %90, %cst_86 {dimension_numbers = #tpu.dot_dimension_numbers<[1], [0], [0], [1], [0, 0, 1, 1], [], []>} : vector<12x144xbf16>, vector<144x48xbf16>, vector<12x48xf32> -> vector<12x48xf32>
    %92 = arith.addf %84, %91 : vector<12x48xf32>
    %c2_87 = arith.constant 2 : index
    %c0_88 = arith.constant 0 : index
    %c0_89 = arith.constant 0 : index
    %93 = vector.load %arg9[%c2_87, %c0_88, %c0_89] : memref<3x12x18xbf16, #tpu.memory_space<vmem>>, vector<1x12x18xbf16>
    %94 = vector.shape_cast %93 : vector<1x12x18xbf16> to vector<12x18xbf16>
    %cst_90 = arith.constant dense<0.000000e+00> : vector<12x144xf32>
    %95 = tpu.matmul %94, %77, %cst_90 {dimension_numbers = #tpu.dot_dimension_numbers<[1], [0], [0], [1], [0, 0, 1, 1], [], []>} : vector<12x18xbf16>, vector<18x144xbf16>, vector<12x144xf32> -> vector<12x144xf32>
    %96 = arith.truncf %95 : vector<12x144xf32> to vector<12x144xbf16>
    %c0_91 = arith.constant 0 : index
    %c2_92 = arith.constant 2 : index
    %c0_93 = arith.constant 0 : index
    %c0_94 = arith.constant 0 : index
    %97 = vector.load %arg10[%c0_91, %c2_92, %c0_93, %c0_94] : memref<1x3x144x48xbf16, #tpu.memory_space<vmem>>, vector<1x1x144x48xbf16>
    %98 = vector.shape_cast %97 : vector<1x1x144x48xbf16> to vector<144x48xbf16>
    %cst_95 = arith.constant dense<0.000000e+00> : vector<12x48xf32>
    %99 = tpu.matmul %96, %98, %cst_95 {dimension_numbers = #tpu.dot_dimension_numbers<[1], [0], [0], [1], [0, 0, 1, 1], [], []>} : vector<12x144xbf16>, vector<144x48xbf16>, vector<12x48xf32> -> vector<12x48xf32>
    %100 = arith.addf %92, %99 : vector<12x48xf32>
    %c0_96 = arith.constant 0 : index
    %c0_97 = arith.constant 0 : index
    %c0_98 = arith.constant 0 : index
    %101 = vector.load %arg11[%c0_96, %c0_97, %c0_98] : memref<1x1x48xf32, #tpu.memory_space<vmem>>, vector<1x1x48xf32>
    %102 = vector.shape_cast %101 : vector<1x1x48xf32> to vector<1x48xf32>
    %103 = vector.broadcast %102 : vector<1x48xf32> to vector<12x48xf32>
    %104 = arith.addf %100, %103 : vector<12x48xf32>
    %cst_99 = arith.constant 0.000000e+00 : f32
    %105 = vector.broadcast %cst_99 : f32 to vector<12x48xf32>
    %106 = arith.maximumf %104, %105 : vector<12x48xf32>
    %107 = arith.truncf %106 : vector<12x48xf32> to vector<12x48xbf16>
    %c0_100 = arith.constant 0 : index
    %c0_101 = arith.constant 0 : index
    %c0_102 = arith.constant 0 : index
    %108 = vector.load %arg12[%c0_100, %c0_101, %c0_102] : memref<3x20x12xbf16, #tpu.memory_space<vmem>>, vector<1x20x12xbf16>
    %109 = vector.shape_cast %108 : vector<1x20x12xbf16> to vector<20x12xbf16>
    %cst_103 = arith.constant dense<0.000000e+00> : vector<20x48xf32>
    %110 = tpu.matmul %109, %107, %cst_103 {dimension_numbers = #tpu.dot_dimension_numbers<[1], [0], [0], [1], [0, 0, 1, 1], [], []>} : vector<20x12xbf16>, vector<12x48xbf16>, vector<20x48xf32> -> vector<20x48xf32>
    %111 = arith.truncf %110 : vector<20x48xf32> to vector<20x48xbf16>
    %c0_104 = arith.constant 0 : index
    %c0_105 = arith.constant 0 : index
    %c0_106 = arith.constant 0 : index
    %c0_107 = arith.constant 0 : index
    %112 = vector.load %arg13[%c0_104, %c0_105, %c0_106, %c0_107] : memref<1x3x48x80xbf16, #tpu.memory_space<vmem>>, vector<1x1x48x80xbf16>
    %113 = vector.shape_cast %112 : vector<1x1x48x80xbf16> to vector<48x80xbf16>
    %cst_108 = arith.constant dense<0.000000e+00> : vector<20x80xf32>
    %114 = tpu.matmul %111, %113, %cst_108 {dimension_numbers = #tpu.dot_dimension_numbers<[1], [0], [0], [1], [0, 0, 1, 1], [], []>} : vector<20x48xbf16>, vector<48x80xbf16>, vector<20x80xf32> -> vector<20x80xf32>
    %c1_109 = arith.constant 1 : index
    %c0_110 = arith.constant 0 : index
    %c0_111 = arith.constant 0 : index
    %115 = vector.load %arg12[%c1_109, %c0_110, %c0_111] : memref<3x20x12xbf16, #tpu.memory_space<vmem>>, vector<1x20x12xbf16>
    %116 = vector.shape_cast %115 : vector<1x20x12xbf16> to vector<20x12xbf16>
    %cst_112 = arith.constant dense<0.000000e+00> : vector<20x48xf32>
    %117 = tpu.matmul %116, %107, %cst_112 {dimension_numbers = #tpu.dot_dimension_numbers<[1], [0], [0], [1], [0, 0, 1, 1], [], []>} : vector<20x12xbf16>, vector<12x48xbf16>, vector<20x48xf32> -> vector<20x48xf32>
    %118 = arith.truncf %117 : vector<20x48xf32> to vector<20x48xbf16>
    %c0_113 = arith.constant 0 : index
    %c1_114 = arith.constant 1 : index
    %c0_115 = arith.constant 0 : index
    %c0_116 = arith.constant 0 : index
    %119 = vector.load %arg13[%c0_113, %c1_114, %c0_115, %c0_116] : memref<1x3x48x80xbf16, #tpu.memory_space<vmem>>, vector<1x1x48x80xbf16>
    %120 = vector.shape_cast %119 : vector<1x1x48x80xbf16> to vector<48x80xbf16>
    %cst_117 = arith.constant dense<0.000000e+00> : vector<20x80xf32>
    %121 = tpu.matmul %118, %120, %cst_117 {dimension_numbers = #tpu.dot_dimension_numbers<[1], [0], [0], [1], [0, 0, 1, 1], [], []>} : vector<20x48xbf16>, vector<48x80xbf16>, vector<20x80xf32> -> vector<20x80xf32>
    %122 = arith.addf %114, %121 : vector<20x80xf32>
    %c2_118 = arith.constant 2 : index
    %c0_119 = arith.constant 0 : index
    %c0_120 = arith.constant 0 : index
    %123 = vector.load %arg12[%c2_118, %c0_119, %c0_120] : memref<3x20x12xbf16, #tpu.memory_space<vmem>>, vector<1x20x12xbf16>
    %124 = vector.shape_cast %123 : vector<1x20x12xbf16> to vector<20x12xbf16>
    %cst_121 = arith.constant dense<0.000000e+00> : vector<20x48xf32>
    %125 = tpu.matmul %124, %107, %cst_121 {dimension_numbers = #tpu.dot_dimension_numbers<[1], [0], [0], [1], [0, 0, 1, 1], [], []>} : vector<20x12xbf16>, vector<12x48xbf16>, vector<20x48xf32> -> vector<20x48xf32>
    %126 = arith.truncf %125 : vector<20x48xf32> to vector<20x48xbf16>
    %c0_122 = arith.constant 0 : index
    %c2_123 = arith.constant 2 : index
    %c0_124 = arith.constant 0 : index
    %c0_125 = arith.constant 0 : index
    %127 = vector.load %arg13[%c0_122, %c2_123, %c0_124, %c0_125] : memref<1x3x48x80xbf16, #tpu.memory_space<vmem>>, vector<1x1x48x80xbf16>
    %128 = vector.shape_cast %127 : vector<1x1x48x80xbf16> to vector<48x80xbf16>
    %cst_126 = arith.constant dense<0.000000e+00> : vector<20x80xf32>
    %129 = tpu.matmul %126, %128, %cst_126 {dimension_numbers = #tpu.dot_dimension_numbers<[1], [0], [0], [1], [0, 0, 1, 1], [], []>} : vector<20x48xbf16>, vector<48x80xbf16>, vector<20x80xf32> -> vector<20x80xf32>
    %130 = arith.addf %122, %129 : vector<20x80xf32>
    %c0_127 = arith.constant 0 : index
    %c0_128 = arith.constant 0 : index
    %c0_129 = arith.constant 0 : index
    %131 = vector.load %arg14[%c0_127, %c0_128, %c0_129] : memref<1x1x80xf32, #tpu.memory_space<vmem>>, vector<1x1x80xf32>
    %132 = vector.shape_cast %131 : vector<1x1x80xf32> to vector<1x80xf32>
    %133 = vector.broadcast %132 : vector<1x80xf32> to vector<20x80xf32>
    %134 = arith.addf %130, %133 : vector<20x80xf32>
    %cst_130 = arith.constant 0.000000e+00 : f32
    %135 = vector.broadcast %cst_130 : f32 to vector<20x80xf32>
    %136 = arith.maximumf %134, %135 : vector<20x80xf32>
    %137 = arith.truncf %136 : vector<20x80xf32> to vector<20x80xbf16>
    %c0_131 = arith.constant 0 : index
    %c0_132 = arith.constant 0 : index
    %c0_133 = arith.constant 0 : index
    %138 = vector.load %arg15[%c0_131, %c0_132, %c0_133] : memref<5x36x20xbf16, #tpu.memory_space<vmem>>, vector<1x36x20xbf16>
    %139 = vector.shape_cast %138 : vector<1x36x20xbf16> to vector<36x20xbf16>
    %cst_134 = arith.constant dense<0.000000e+00> : vector<36x80xf32>
    %140 = tpu.matmul %139, %137, %cst_134 {dimension_numbers = #tpu.dot_dimension_numbers<[1], [0], [0], [1], [0, 0, 1, 1], [], []>} : vector<36x20xbf16>, vector<20x80xbf16>, vector<36x80xf32> -> vector<36x80xf32>
    %141 = arith.truncf %140 : vector<36x80xf32> to vector<36x80xbf16>
    %c0_135 = arith.constant 0 : index
    %c0_136 = arith.constant 0 : index
    %c0_137 = arith.constant 0 : index
    %c0_138 = arith.constant 0 : index
    %142 = vector.load %arg16[%c0_135, %c0_136, %c0_137, %c0_138] : memref<1x5x80x288xbf16, #tpu.memory_space<vmem>>, vector<1x1x80x288xbf16>
    %143 = vector.shape_cast %142 : vector<1x1x80x288xbf16> to vector<80x288xbf16>
    %cst_139 = arith.constant dense<0.000000e+00> : vector<36x288xf32>
    %144 = tpu.matmul %141, %143, %cst_139 {dimension_numbers = #tpu.dot_dimension_numbers<[1], [0], [0], [1], [0, 0, 1, 1], [], []>} : vector<36x80xbf16>, vector<80x288xbf16>, vector<36x288xf32> -> vector<36x288xf32>
    %c1_140 = arith.constant 1 : index
    %c0_141 = arith.constant 0 : index
    %c0_142 = arith.constant 0 : index
    %145 = vector.load %arg15[%c1_140, %c0_141, %c0_142] : memref<5x36x20xbf16, #tpu.memory_space<vmem>>, vector<1x36x20xbf16>
    %146 = vector.shape_cast %145 : vector<1x36x20xbf16> to vector<36x20xbf16>
    %cst_143 = arith.constant dense<0.000000e+00> : vector<36x80xf32>
    %147 = tpu.matmul %146, %137, %cst_143 {dimension_numbers = #tpu.dot_dimension_numbers<[1], [0], [0], [1], [0, 0, 1, 1], [], []>} : vector<36x20xbf16>, vector<20x80xbf16>, vector<36x80xf32> -> vector<36x80xf32>
    %148 = arith.truncf %147 : vector<36x80xf32> to vector<36x80xbf16>
    %c0_144 = arith.constant 0 : index
    %c1_145 = arith.constant 1 : index
    %c0_146 = arith.constant 0 : index
    %c0_147 = arith.constant 0 : index
    %149 = vector.load %arg16[%c0_144, %c1_145, %c0_146, %c0_147] : memref<1x5x80x288xbf16, #tpu.memory_space<vmem>>, vector<1x1x80x288xbf16>
    %150 = vector.shape_cast %149 : vector<1x1x80x288xbf16> to vector<80x288xbf16>
    %cst_148 = arith.constant dense<0.000000e+00> : vector<36x288xf32>
    %151 = tpu.matmul %148, %150, %cst_148 {dimension_numbers = #tpu.dot_dimension_numbers<[1], [0], [0], [1], [0, 0, 1, 1], [], []>} : vector<36x80xbf16>, vector<80x288xbf16>, vector<36x288xf32> -> vector<36x288xf32>
    %152 = arith.addf %144, %151 : vector<36x288xf32>
    %c2_149 = arith.constant 2 : index
    %c0_150 = arith.constant 0 : index
    %c0_151 = arith.constant 0 : index
    %153 = vector.load %arg15[%c2_149, %c0_150, %c0_151] : memref<5x36x20xbf16, #tpu.memory_space<vmem>>, vector<1x36x20xbf16>
    %154 = vector.shape_cast %153 : vector<1x36x20xbf16> to vector<36x20xbf16>
    %cst_152 = arith.constant dense<0.000000e+00> : vector<36x80xf32>
    %155 = tpu.matmul %154, %137, %cst_152 {dimension_numbers = #tpu.dot_dimension_numbers<[1], [0], [0], [1], [0, 0, 1, 1], [], []>} : vector<36x20xbf16>, vector<20x80xbf16>, vector<36x80xf32> -> vector<36x80xf32>
    %156 = arith.truncf %155 : vector<36x80xf32> to vector<36x80xbf16>
    %c0_153 = arith.constant 0 : index
    %c2_154 = arith.constant 2 : index
    %c0_155 = arith.constant 0 : index
    %c0_156 = arith.constant 0 : index
    %157 = vector.load %arg16[%c0_153, %c2_154, %c0_155, %c0_156] : memref<1x5x80x288xbf16, #tpu.memory_space<vmem>>, vector<1x1x80x288xbf16>
    %158 = vector.shape_cast %157 : vector<1x1x80x288xbf16> to vector<80x288xbf16>
    %cst_157 = arith.constant dense<0.000000e+00> : vector<36x288xf32>
    %159 = tpu.matmul %156, %158, %cst_157 {dimension_numbers = #tpu.dot_dimension_numbers<[1], [0], [0], [1], [0, 0, 1, 1], [], []>} : vector<36x80xbf16>, vector<80x288xbf16>, vector<36x288xf32> -> vector<36x288xf32>
    %160 = arith.addf %152, %159 : vector<36x288xf32>
    %c3_158 = arith.constant 3 : index
    %c0_159 = arith.constant 0 : index
    %c0_160 = arith.constant 0 : index
    %161 = vector.load %arg15[%c3_158, %c0_159, %c0_160] : memref<5x36x20xbf16, #tpu.memory_space<vmem>>, vector<1x36x20xbf16>
    %162 = vector.shape_cast %161 : vector<1x36x20xbf16> to vector<36x20xbf16>
    %cst_161 = arith.constant dense<0.000000e+00> : vector<36x80xf32>
    %163 = tpu.matmul %162, %137, %cst_161 {dimension_numbers = #tpu.dot_dimension_numbers<[1], [0], [0], [1], [0, 0, 1, 1], [], []>} : vector<36x20xbf16>, vector<20x80xbf16>, vector<36x80xf32> -> vector<36x80xf32>
    %164 = arith.truncf %163 : vector<36x80xf32> to vector<36x80xbf16>
    %c0_162 = arith.constant 0 : index
    %c3_163 = arith.constant 3 : index
    %c0_164 = arith.constant 0 : index
    %c0_165 = arith.constant 0 : index
    %165 = vector.load %arg16[%c0_162, %c3_163, %c0_164, %c0_165] : memref<1x5x80x288xbf16, #tpu.memory_space<vmem>>, vector<1x1x80x288xbf16>
    %166 = vector.shape_cast %165 : vector<1x1x80x288xbf16> to vector<80x288xbf16>
    %cst_166 = arith.constant dense<0.000000e+00> : vector<36x288xf32>
    %167 = tpu.matmul %164, %166, %cst_166 {dimension_numbers = #tpu.dot_dimension_numbers<[1], [0], [0], [1], [0, 0, 1, 1], [], []>} : vector<36x80xbf16>, vector<80x288xbf16>, vector<36x288xf32> -> vector<36x288xf32>
    %168 = arith.addf %160, %167 : vector<36x288xf32>
    %c4_167 = arith.constant 4 : index
    %c0_168 = arith.constant 0 : index
    %c0_169 = arith.constant 0 : index
    %169 = vector.load %arg15[%c4_167, %c0_168, %c0_169] : memref<5x36x20xbf16, #tpu.memory_space<vmem>>, vector<1x36x20xbf16>
    %170 = vector.shape_cast %169 : vector<1x36x20xbf16> to vector<36x20xbf16>
    %cst_170 = arith.constant dense<0.000000e+00> : vector<36x80xf32>
    %171 = tpu.matmul %170, %137, %cst_170 {dimension_numbers = #tpu.dot_dimension_numbers<[1], [0], [0], [1], [0, 0, 1, 1], [], []>} : vector<36x20xbf16>, vector<20x80xbf16>, vector<36x80xf32> -> vector<36x80xf32>
    %172 = arith.truncf %171 : vector<36x80xf32> to vector<36x80xbf16>
    %c0_171 = arith.constant 0 : index
    %c4_172 = arith.constant 4 : index
    %c0_173 = arith.constant 0 : index
    %c0_174 = arith.constant 0 : index
    %173 = vector.load %arg16[%c0_171, %c4_172, %c0_173, %c0_174] : memref<1x5x80x288xbf16, #tpu.memory_space<vmem>>, vector<1x1x80x288xbf16>
    %174 = vector.shape_cast %173 : vector<1x1x80x288xbf16> to vector<80x288xbf16>
    %cst_175 = arith.constant dense<0.000000e+00> : vector<36x288xf32>
    %175 = tpu.matmul %172, %174, %cst_175 {dimension_numbers = #tpu.dot_dimension_numbers<[1], [0], [0], [1], [0, 0, 1, 1], [], []>} : vector<36x80xbf16>, vector<80x288xbf16>, vector<36x288xf32> -> vector<36x288xf32>
    %176 = arith.addf %168, %175 : vector<36x288xf32>
    %c0_176 = arith.constant 0 : index
    %c0_177 = arith.constant 0 : index
    %c0_178 = arith.constant 0 : index
    %177 = vector.load %arg17[%c0_176, %c0_177, %c0_178] : memref<1x1x288xf32, #tpu.memory_space<vmem>>, vector<1x1x288xf32>
    %178 = vector.shape_cast %177 : vector<1x1x288xf32> to vector<1x288xf32>
    %179 = vector.broadcast %178 : vector<1x288xf32> to vector<36x288xf32>
    %180 = arith.addf %176, %179 : vector<36x288xf32>
    %cst_179 = arith.constant 0.000000e+00 : f32
    %181 = vector.broadcast %cst_179 : f32 to vector<36x288xf32>
    %182 = arith.maximumf %180, %181 : vector<36x288xf32>
    %183 = arith.truncf %182 : vector<36x288xf32> to vector<36x288xbf16>
    %c0_180 = arith.constant 0 : index
    %c0_181 = arith.constant 0 : index
    %c0_182 = arith.constant 0 : index
    %184 = vector.load %arg18[%c0_180, %c0_181, %c0_182] : memref<2x40x36xbf16, #tpu.memory_space<vmem>>, vector<1x40x36xbf16>
    %185 = vector.shape_cast %184 : vector<1x40x36xbf16> to vector<40x36xbf16>
    %cst_183 = arith.constant dense<0.000000e+00> : vector<40x288xf32>
    %186 = tpu.matmul %185, %183, %cst_183 {dimension_numbers = #tpu.dot_dimension_numbers<[1], [0], [0], [1], [0, 0, 1, 1], [], []>} : vector<40x36xbf16>, vector<36x288xbf16>, vector<40x288xf32> -> vector<40x288xf32>
    %187 = arith.truncf %186 : vector<40x288xf32> to vector<40x288xbf16>
    %c0_184 = arith.constant 0 : index
    %c0_185 = arith.constant 0 : index
    %c0_186 = arith.constant 0 : index
    %c0_187 = arith.constant 0 : index
    %188 = vector.load %arg19[%c0_184, %c0_185, %c0_186, %c0_187] : memref<1x2x288x128xbf16, #tpu.memory_space<vmem>>, vector<1x1x288x128xbf16>
    %189 = vector.shape_cast %188 : vector<1x1x288x128xbf16> to vector<288x128xbf16>
    %cst_188 = arith.constant dense<0.000000e+00> : vector<40x128xf32>
    %190 = tpu.matmul %187, %189, %cst_188 {dimension_numbers = #tpu.dot_dimension_numbers<[1], [0], [0], [1], [0, 0, 1, 1], [], []>} : vector<40x288xbf16>, vector<288x128xbf16>, vector<40x128xf32> -> vector<40x128xf32>
    %c1_189 = arith.constant 1 : index
    %c0_190 = arith.constant 0 : index
    %c0_191 = arith.constant 0 : index
    %191 = vector.load %arg18[%c1_189, %c0_190, %c0_191] : memref<2x40x36xbf16, #tpu.memory_space<vmem>>, vector<1x40x36xbf16>
    %192 = vector.shape_cast %191 : vector<1x40x36xbf16> to vector<40x36xbf16>
    %cst_192 = arith.constant dense<0.000000e+00> : vector<40x288xf32>
    %193 = tpu.matmul %192, %183, %cst_192 {dimension_numbers = #tpu.dot_dimension_numbers<[1], [0], [0], [1], [0, 0, 1, 1], [], []>} : vector<40x36xbf16>, vector<36x288xbf16>, vector<40x288xf32> -> vector<40x288xf32>
    %194 = arith.truncf %193 : vector<40x288xf32> to vector<40x288xbf16>
    %c0_193 = arith.constant 0 : index
    %c1_194 = arith.constant 1 : index
    %c0_195 = arith.constant 0 : index
    %c0_196 = arith.constant 0 : index
    %195 = vector.load %arg19[%c0_193, %c1_194, %c0_195, %c0_196] : memref<1x2x288x128xbf16, #tpu.memory_space<vmem>>, vector<1x1x288x128xbf16>
    %196 = vector.shape_cast %195 : vector<1x1x288x128xbf16> to vector<288x128xbf16>
    %cst_197 = arith.constant dense<0.000000e+00> : vector<40x128xf32>
    %197 = tpu.matmul %194, %196, %cst_197 {dimension_numbers = #tpu.dot_dimension_numbers<[1], [0], [0], [1], [0, 0, 1, 1], [], []>} : vector<40x288xbf16>, vector<288x128xbf16>, vector<40x128xf32> -> vector<40x128xf32>
    %198 = arith.addf %190, %197 : vector<40x128xf32>
    %c0_198 = arith.constant 0 : index
    %c0_199 = arith.constant 0 : index
    %c0_200 = arith.constant 0 : index
    %199 = vector.load %arg20[%c0_198, %c0_199, %c0_200] : memref<1x1x128xf32, #tpu.memory_space<vmem>>, vector<1x1x128xf32>
    %200 = vector.shape_cast %199 : vector<1x1x128xf32> to vector<1x128xf32>
    %201 = vector.broadcast %200 : vector<1x128xf32> to vector<40x128xf32>
    %202 = arith.addf %198, %201 : vector<40x128xf32>
    %c0_201 = arith.constant 0 : index
    %c0_202 = arith.constant 0 : index
    %c0_203 = arith.constant 0 : index
    %203 = vector.load %arg21[%c0_201, %c0_202, %c0_203] : memref<1x40x128xf32, #tpu.memory_space<vmem>>, vector<1x40x128xf32>
    %204 = vector.shape_cast %203 : vector<1x40x128xf32> to vector<40x128xf32>
    %205 = vector.shape_cast %202 : vector<40x128xf32> to vector<1x40x128xf32>
    tpu.vector_store %arg21[%c0_201, %c0_202, %c0_203], %205 {strides = array<i32>} : memref<1x40x128xf32, #tpu.memory_space<vmem>>, vector<1x40x128xf32>,
    return
  }
  func.func @transform_0(%arg0: i32) -> (i32, i32, i32) {
    %c0_i32 = arith.constant 0 : i32
    %c0_i32_0 = arith.constant 0 : i32
    %c0_i32_1 = arith.constant 0 : i32
    return %arg0, %c0_i32, %c0_i32_0 : i32, i32, i32
  }
  func.func @transform_1(%arg0: i32) -> (i32, i32, i32) {
    %c0_i32 = arith.constant 0 : i32
    %c0_i32_0 = arith.constant 0 : i32
    %c0_i32_1 = arith.constant 0 : i32
    %c0_i32_2 = arith.constant 0 : i32
    return %c0_i32, %c0_i32_0, %c0_i32_1 : i32, i32, i32
  }
  func.func @transform_2(%arg0: i32) -> (i32, i32) {
    %c0_i32 = arith.constant 0 : i32
    %c0_i32_0 = arith.constant 0 : i32
    %c0_i32_1 = arith.constant 0 : i32
    return %c0_i32, %c0_i32_0 : i32, i32
  }
  func.func @transform_3(%arg0: i32) -> (i32, i32) {
    %c0_i32 = arith.constant 0 : i32
    %c0_i32_0 = arith.constant 0 : i32
    %c0_i32_1 = arith.constant 0 : i32
    return %c0_i32, %c0_i32_0 : i32, i32
  }
  func.func @transform_4(%arg0: i32) -> (i32, i32) {
    %c0_i32 = arith.constant 0 : i32
    %c0_i32_0 = arith.constant 0 : i32
    %c0_i32_1 = arith.constant 0 : i32
    return %c0_i32, %c0_i32_0 : i32, i32
  }
  func.func @transform_5(%arg0: i32) -> (i32, i32, i32) {
    %c0_i32 = arith.constant 0 : i32
    %c0_i32_0 = arith.constant 0 : i32
    %c0_i32_1 = arith.constant 0 : i32
    %c0_i32_2 = arith.constant 0 : i32
    return %c0_i32, %c0_i32_0, %c0_i32_1 : i32, i32, i32
  }
  func.func @transform_6(%arg0: i32) -> (i32, i32, i32, i32) {
    %c0_i32 = arith.constant 0 : i32
    %c0_i32_0 = arith.constant 0 : i32
    %c0_i32_1 = arith.constant 0 : i32
    %c0_i32_2 = arith.constant 0 : i32
    return %arg0, %c0_i32, %c0_i32_0, %c0_i32_1 : i32, i32, i32, i32
  }
  func.func @transform_7(%arg0: i32) -> (i32, i32, i32) {
    %c0_i32 = arith.constant 0 : i32
    %c0_i32_0 = arith.constant 0 : i32
    %c0_i32_1 = arith.constant 0 : i32
    return %arg0, %c0_i32, %c0_i32_0 : i32, i32, i32
  }
  func.func @transform_8(%arg0: i32) -> (i32, i32, i32) {
    %c0_i32 = arith.constant 0 : i32
    %c0_i32_0 = arith.constant 0 : i32
    %c0_i32_1 = arith.constant 0 : i32
    %c0_i32_2 = arith.constant 0 : i32
    return %c0_i32, %c0_i32_0, %c0_i32_1 : i32, i32, i32
  }
  func.func @transform_9(%arg0: i32) -> (i32, i32, i32, i32) {
    %c0_i32 = arith.constant 0 : i32
    %c0_i32_0 = arith.constant 0 : i32
    %c0_i32_1 = arith.constant 0 : i32
    %c0_i32_2 = arith.constant 0 : i32
    return %arg0, %c0_i32, %c0_i32_0, %c0_i32_1 : i32, i32, i32, i32
  }
  func.func @transform_10(%arg0: i32) -> (i32, i32, i32) {
    %c0_i32 = arith.constant 0 : i32
    %c0_i32_0 = arith.constant 0 : i32
    %c0_i32_1 = arith.constant 0 : i32
    return %arg0, %c0_i32, %c0_i32_0 : i32, i32, i32
  }
  func.func @transform_11(%arg0: i32) -> (i32, i32, i32) {
    %c0_i32 = arith.constant 0 : i32
    %c0_i32_0 = arith.constant 0 : i32
    %c0_i32_1 = arith.constant 0 : i32
    %c0_i32_2 = arith.constant 0 : i32
    return %c0_i32, %c0_i32_0, %c0_i32_1 : i32, i32, i32
  }
  func.func @transform_12(%arg0: i32) -> (i32, i32, i32, i32) {
    %c0_i32 = arith.constant 0 : i32
    %c0_i32_0 = arith.constant 0 : i32
    %c0_i32_1 = arith.constant 0 : i32
    %c0_i32_2 = arith.constant 0 : i32
    return %arg0, %c0_i32, %c0_i32_0, %c0_i32_1 : i32, i32, i32, i32
  }
  func.func @transform_13(%arg0: i32) -> (i32, i32, i32) {
    %c0_i32 = arith.constant 0 : i32
    %c0_i32_0 = arith.constant 0 : i32
    %c0_i32_1 = arith.constant 0 : i32
    return %arg0, %c0_i32, %c0_i32_0 : i32, i32, i32
  }
  func.func @transform_14(%arg0: i32) -> (i32, i32, i32) {
    %c0_i32 = arith.constant 0 : i32
    %c0_i32_0 = arith.constant 0 : i32
    %c0_i32_1 = arith.constant 0 : i32
    %c0_i32_2 = arith.constant 0 : i32
    return %c0_i32, %c0_i32_0, %c0_i32_1 : i32, i32, i32
  }
  func.func @transform_15(%arg0: i32) -> (i32, i32, i32, i32) {
    %c0_i32 = arith.constant 0 : i32
    %c0_i32_0 = arith.constant 0 : i32
    %c0_i32_1 = arith.constant 0 : i32
    %c0_i32_2 = arith.constant 0 : i32
    return %arg0, %c0_i32, %c0_i32_0, %c0_i32_1 : i32, i32, i32, i32
  }
  func.func @transform_16(%arg0: i32) -> (i32, i32, i32) {
    %c0_i32 = arith.constant 0 : i32
    %c0_i32_0 = arith.constant 0 : i32
    %c0_i32_1 = arith.constant 0 : i32
    return %arg0, %c0_i32, %c0_i32_0 : i32, i32, i32
  }
  func.func @transform_17(%arg0: i32) -> (i32, i32, i32) {
    %c0_i32 = arith.constant 0 : i32
    %c0_i32_0 = arith.constant 0 : i32
    %c0_i32_1 = arith.constant 0 : i32
    %c0_i32_2 = arith.constant 0 : i32
    return %c0_i32, %c0_i32_0, %c0_i32_1 : i32, i32, i32
  }
  func.func @transform_18(%arg0: i32) -> (i32, i32, i32, i32) {
    %c0_i32 = arith.constant 0 : i32
    %c0_i32_0 = arith.constant 0 : i32
    %c0_i32_1 = arith.constant 0 : i32
    %c0_i32_2 = arith.constant 0 : i32
    return %arg0, %c0_i32, %c0_i32_0, %c0_i32_1 : i32, i32, i32, i32
  }
  func.func @transform_19(%arg0: i32) -> (i32, i32, i32) {
    %c0_i32 = arith.constant 0 : i32
    %c0_i32_0 = arith.constant 0 : i32
    %c0_i32_1 = arith.constant 0 : i32
    return %arg0, %c0_i32, %c0_i32_0 : i32, i32, i32
  }
  func.func @transform_20(%arg0: i32) -> (i32, i32, i32) {
    %c0_i32 = arith.constant 0 : i32
    %c0_i32_0 = arith.constant 0 : i32
    %c0_i32_1 = arith.constant 0 : i32
    return %arg0, %c0_i32, %c0_i32_0 : i32, i32, i32
  }
  func.func @transform_21(%arg0: i32) -> (i32, i32, i32) {
    %c0_i32 = arith.constant 0 : i32
    %c0_i32_0 = arith.constant 0 : i32
    %c0_i32_1 = arith.constant 0 : i32
    return %arg0, %c0_i32, %c0_i32_0 : i32, i32, i32
  }
}

</mosaic_0001>

<bundles_post_ra>
// kernel: ggcnn_asgnet_forward.1
= control target key start
LH: loop header
LB: loop body
LE: loop exit
PB: predicated region body
PF: predicated region fallthrough
CT: control target
= control target key end

     0   :  { %s9081_s0 = inlined_call_operand.vmem [shape: f32[2,48,48], index: 0, kind: input, shape index: {}]   ;;  %s9082_s1 = inlined_call_operand.vmem [shape: f32[2,32,16], index: 1, kind: input, shape index: {}]   ;;  %s9083_s2 = inlined_call_operand.hbm [shape: f32[32,48], index: 2, kind: input, shape index: {}]   ;;  %s9084_s3 = inlined_call_operand.vmem [shape: f32[48,16], index: 3, kind: input, shape index: {}]   ;;  %s9085_s4 = inlined_call_operand.vmem [shape: f32[48,128], index: 4, kind: input, shape index: {}]   ;;  %s9086_s5 = inlined_call_operand.vmem [shape: bf16[5,18,32], index: 5, kind: input, shape index: {}]   ;;  %s9087_s6 = inlined_call_operand.hbm [shape: bf16[2,5,48,144], index: 6, kind: input, shape index: {}]   ;;  %s9088_s7 = inlined_call_operand.vmem [shape: f32[2,1,144], index: 7, kind: input, shape index: {}]   ;;  %s9089_s8 = inlined_call_operand.hbm [shape: bf16[3,12,18], index: 8, kind: input, shape index: {}]   ;;  %s9090_s9 = inlined_call_operand.vmem [shape: bf16[2,3,144,48], index: 9, kind: input, shape index: {}]   ;;  %s9091_s10 = inlined_call_operand.vmem [shape: f32[2,1,48], index: 10, kind: input, shape index: {}]   ;;  %s9092_s11 = inlined_call_operand.vmem [shape: bf16[3,20,12], index: 11, kind: input, shape index: {}]   ;;  %s9093_s12 = inlined_call_operand.vmem [shape: bf16[2,3,48,80], index: 12, kind: input, shape index: {}]   ;;  %s9094_s13 = inlined_call_operand.vmem [shape: f32[2,1,80], index: 13, kind: input, shape index: {}]   ;;  %s9095_s14 = inlined_call_operand.vmem [shape: bf16[5,36,20], index: 14, kind: input, shape index: {}]   ;;  %s9096_s15 = inlined_call_operand.vmem [shape: bf16[2,5,80,288], index: 15, kind: input, shape index: {}]   ;;  %s9097_s16 = inlined_call_operand.vmem [shape: f32[2,1,288], index: 16, kind: input, shape index: {}]   ;;  %s9098_s17 = inlined_call_operand.vmem [shape: bf16[2,40,36], index: 17, kind: input, shape index: {}]   ;;  %s9099_s18 = inlined_call_operand.vmem [shape: bf16[2,2,288,128], index: 18, kind: input, shape index: {}]   ;;  %s9100_s19 = inlined_call_operand.hbm [shape: f32[2,1,128], index: 19, kind: input, shape index: {}]   ;;  %s9101_s20 = inlined_call_operand.vmem [shape: f32[2,40,128], index: 20, kind: output, shape index: {0}]   ;;  %s9102_s21 = inlined_call_operand.vmem [shape: f32[2,32,128], index: 21, kind: output, shape index: {1}]  }
   0x1   :  { %9116 = sst [smem:[#allocation15_spill]] %s9081_s0 }
   0x2   :  { %9117 = sst [smem:[#allocation16_spill]] %s9082_s1 }
   0x3   :  { %9118 = sst [smem:[#allocation17_spill]] %s9083_s2 }
   0x4   :  { %9119 = sst [smem:[#allocation18_spill]] %s9084_s3 }
   0x5   :  { %9120 = sst [smem:[#allocation19_spill]] %s9085_s4 }
   0x6   :  { %9121 = sst [smem:[#allocation20_spill]] %s9086_s5 }
   0x7   :  { %9122 = sst [smem:[#allocation21_spill]] %s9091_s10 }
   0x8   :  { %9123 = sst [smem:[#allocation22_spill]] %s9094_s13 }
   0x9   :  { %9124 = sst [smem:[#allocation23_spill]] %s9095_s14 }
   0xa   :  { %9125 = sst [smem:[#allocation24_spill]] %s9096_s15 }
   0xb   :  { %9126 = sst [smem:[#allocation25_spill]] %s9097_s16 }
   0xc   :  { %9127 = sst [smem:[#allocation26_spill]] %s9098_s17 }
   0xd   :  { %9128 = sst [smem:[#allocation27_spill]] %s9099_s18 }
   0xe   :  { %9129 = sst [smem:[#allocation28_spill]] %s9101_s20 }
   0xf   :  { %27 = vsyncpa [#allocation3], 0 }
  0x10   :  { %28 = vsyncpa [#allocation5], 0 }
  0x11   :  { %30 = vsyncpa [#allocation5 + $0x1], 0 }
  0x12   :  { %31 = vsyncpa [#allocation8], 0 }
  0x13   :  { %33 = vsyncpa [#allocation8 + $0x1], 0  ;;  %s7936_s2 = smov 0   ;;  %s7938_s25 = smov 0  }
  0x14   :  { %s7940_s26 = smov 0   ;;  %s7942_s27 = smov 0  }
  0x15 LB: > { %s7955_s3 = sadd.s32 4294967295, %s7811_s27   ;;  %s7958_s28 = sadd.s32 1, %s7811_s27   ;;  %s7811_s27 = sphi %s7942_s27, %s9157_s27   ;;  %s7807_s26 = sphi %s7940_s26, %s9161_s26   ;;  %s7803_s25 = sphi %s7938_s25, %s9160_s25   ;;  %s7799_s2 = sphi %s7936_s2, %s9159_s2  }
  0x16   : > { %9130 = sst [smem:[#allocation13_spill]] %s7958_s28  ;;  %s174_s29 = ssub.s32 %s7811_s27, %s7958_s28 }
  0x17   : > { %s177_s0 = sadd.s32 1, %s7807_s26  ;;  %p175_p0 = scmp.eq.s32.totalorder %s174_s29, 0 }
  0x18   : > { %p184_p1 = scmp.ne.s32.totalorder %s7807_s26, %s7803_s25  ;;  %p185_p2 = scmp.eq.s32.totalorder %s7811_s27, 0 }
  0x19   : > { %p190_p3 = scmp.ne.s32.totalorder %s7803_s25, %s7799_s2  ;;  %p9111_p5 = scmp.eq.s32.totalorder %s7955_s3, 0 }
  0x1a   : > { %s7968_s4 = scalar_select %p175_p0, %s7807_s26, %s177_s0  }
  0x1b   : > { %p186_p4 = por %p185_p2, %p184_p1  ;;  %p5962_p6 = scmp.ge.s32.totalorder %s7811_s27, 1 }
  0x1c   : > { %9131 = sst [smem:[#allocation14_spill]] %s7968_s4  ;;  %p571_p7 = scmp.lt.s32.totalorder %s7811_s27, 3 }
  0x1d   : > { %p7975_p8 = por %p9111_p5, %p190_p3  ;;  %s7813_s22 = smov [#allocation6]  }
  0x1e   : > { %p7979_p9 = pnand %p5962_p6, %p571_p7  ;;  %s608_s23 = sshll.u32 %s7813_s22, 4  ;;  %s609_s23 = int_to_ptr.vmem [resolvable:$true] %s608_s23 }
  0x1f   : > { %s9132_s30 = scalar_select %p7975_p8, 1, 0 }
  0x20   : > { %s9133_s5 = scalar_select %p7979_p9, 1, 0 }
  0x21   : > { %p7294_p10 = pneg %p7979_p9  ;;  %p7310_p12 = scmp.lt.s32.totalorder %s7811_s27, 2 }
  0x22   : > { %s7649_s0 = scalar_lea.hbm %s9089_s8, 384 }
  0x23   : > { %p7987_p11 = pnand %p7294_p10, %p9111_p5  ;;  %p7992_p13 = pnand %p7310_p12, %p186_p4 }
  0x24   : > { %p7650_p0 = scmp.ne.s32.totalorder %s9089_s8, %s7649_s0  ;;  %p7656_p4 = scmp.lt.u32.totalorder %s7649_s0, %s9089_s8 }
  0x25   : > { %s9135_s24 = scalar_select %p7992_p13, 1, 0 }
  0x26   : > { %p7651_p1 = pneg %p7987_p11 }
  0x28   : > { %p7652_p2 = pnand %p7651_p1, %p7650_p0 }
  0x2a   : > { %p7653_p3 = pneg %p7652_p2 }
  0x2c   : > { %p7658_p6 = pnand %p7656_p4, %p7653_p3 }
  0x2e   : > { %7661 = shalt.err (!%p7658_p6)
}
  0x2f   : > { %s7662_s17 = scalar_lea.vmem %s609_s23, 384  ;;  %p7670_p5 = scmp.lt.s32.totalorder %s609_s23, %s609_s23 }
  0x30   : > { %p7663_p7 = scmp.ne.s32.totalorder %s609_s23, %s7662_s17  ;;  %p7671_p8 = scmp.lt.s32.totalorder %s7662_s17, %s7662_s17 }
  0x32   : > { %p7665_p10 = pnand %p7663_p7, %p7651_p1  ;;  %p7672_p9 = por %p7671_p8, %p7670_p5 }
  0x34   : > { %p7666_p12 = pneg %p7665_p10 }
  0x36   : > { %p7673_p13 = pnand %p7672_p9, %p7666_p12 }
  0x38   : > { %7676 = shalt.err (!%p7673_p13)
}
  0x39   : > { %s7814_s4 = smov 64   ;;  %s7815_s2 = smov 4  }
  0x3a   : > { %7300 = dma.hbm_to_vmem [thread:$0]  (!%p7987_p11), %s9089_s8, 384, %s609_s23, [#allocation5], %s7814_s4, %s7814_s4, %s7815_s2  }
  0x3b   : > { %s7816_s29 = smov [#allocation2]   ;;  %s9136_s18 = sld [smem:[#allocation17_spill]] }
  0x3c   : > { %s586_s0 = sshll.u32 %s7816_s29, 4  ;;  %s587_s0 = int_to_ptr.vmem [resolvable:$true] %s586_s0 }
  0x41   : > { %s7677_s14 = scalar_lea.hbm %s9136_s18, 512 }
  0x42   : > { %p7678_p5 = scmp.ne.s32.totalorder %s9136_s18, %s7677_s14  ;;  %p7684_p13 = scmp.lt.u32.totalorder %s7677_s14, %s9136_s18 }
  0x44   : > { %p7680_p8 = pnand %p7678_p5, %p7651_p1 }
  0x46   : > { %p7681_p9 = pneg %p7680_p8 }
  0x48   : > { %p7686_p0 = pnand %p7684_p13, %p7681_p9 }
  0x4a   : > { %7689 = shalt.err (!%p7686_p0)
}
  0x4b   : > { %s7690_s23 = scalar_lea.vmem %s587_s0, 512  ;;  %p7698_p6 = scmp.lt.s32.totalorder %s587_s0, %s587_s0 }
  0x4c   : > { %p7691_p2 = scmp.ne.s32.totalorder %s587_s0, %s7690_s23  ;;  %p7699_p7 = scmp.lt.s32.totalorder %s7690_s23, %s7690_s23 }
  0x4e   : > { %p7693_p3 = pnand %p7691_p2, %p7651_p1  ;;  %p7700_p10 = por %p7699_p7, %p7698_p6 }
  0x50   : > { %p7694_p4 = pneg %p7693_p3 }
  0x52   : > { %p7701_p12 = pnand %p7700_p10, %p7694_p4 }
  0x54   : > { %7704 = shalt.err (!%p7701_p12)
}
  0x55   : > { %s7817_s13 = smov 128   ;;  %s7818_s10 = smov 8  }
  0x56   : > { %7297 = dma.hbm_to_vmem [thread:$0]  (!%p7987_p11), %s9136_s18, 512, %s587_s0, [#allocation3], %s7817_s13, %s7817_s13, %s7818_s10  }
  0x57   : > { %s639_s16 = sand.u32 1, %s7811_s27   ;;  %s8043_s4 = sand.u32 1, %s7807_s26  }
  0x58   : > { %s7272_s2 = smul.u32 240, %s8043_s4  ;;  %s5967_s0 = sshll.u32 %s7811_s27, 4 }
  0x59   : > { %s7273_s20 = smul.u32 3840, %s7811_s27  ;;  %s8055_s23 = scalar_lea.sflag [#allocation5], %s639_s16 }
  0x5a   : > { %s643_s1 = scalar_lea.vmem [#allocation4], %s7272_s2  ;;  %p9137_p1 = scmp.ne.s32.totalorder %s9135_s24, 0 }
  0x5b   : > { %s8050_s22 = scalar_lea.hbm %s9087_s6, %s7273_s20  ;;  %s650_s17 = sshll.u32 %s643_s1, 4  ;;  %s8052_s17 = int_to_ptr.vmem [resolvable:$true] %s650_s17 }
  0x5c   : > { %s7705_s14 = scalar_lea.hbm %s8050_s22, 3840  ;;  %p7707_p5 = pneg %p9137_p1 }
  0x5d   : > { %p7706_p11 = scmp.ne.s32.totalorder %s8050_s22, %s7705_s14  ;;  %s7710_s28 = scalar_lea.hbm %s9087_s6, 7680 }
  0x5e   : > { %p7711_p13 = scmp.lt.u32.totalorder %s8050_s22, %s9087_s6  ;;  %p7712_p0 = scmp.lt.u32.totalorder %s7710_s28, %s7705_s14 }
  0x5f   : > { %p7708_p8 = pnand %p7707_p5, %p7706_p11  ;;  %p7714_p3 = scmp.lt.u32.totalorder %s7705_s14, %s8050_s22 }
  0x60   : > { %p7713_p2 = por %p7712_p0, %p7711_p13 }
  0x61   : > { %p7709_p9 = pneg %p7708_p8 }
  0x62   : > { %p7715_p4 = por %p7714_p3, %p7713_p2 }
  0x64   : > { %p7716_p6 = pnand %p7715_p4, %p7709_p9 }
  0x66   : > { %7719 = shalt.err (!%p7716_p6)
}
  0x67   : > { %s7720_s16 = scalar_lea.vmem %s8052_s17, 3840  ;;  %s7819_s1 = smov [#allocation4]  }
  0x68   : > { %p7721_p7 = scmp.ne.s32.totalorder %s8052_s17, %s7720_s16  ;;  %s7725_s15 = sshll.u32 %s7819_s1, 4  ;;  %s7726_s15 = int_to_ptr.vmem [resolvable:$false] %s7725_s15 }
  0x69   : > { %s7727_s20 = scalar_lea.vmem %s7726_s15, 7680  ;;  %p7728_p11 = scmp.lt.s32.totalorder %s8052_s17, %s7726_s15 }
  0x6a   : > { %p7723_p10 = pnand %p7721_p7, %p7707_p5  ;;  %p7729_p8 = scmp.lt.s32.totalorder %s7727_s20, %s7720_s16 }
  0x6c   : > { %p7724_p12 = pneg %p7723_p10  ;;  %p7730_p13 = por %p7729_p8, %p7728_p11 }
  0x6e   : > { %p7731_p0 = pnand %p7730_p13, %p7724_p12 }
  0x70   : > { %7734 = shalt.err (!%p7731_p0)
}
  0x71   : > { %7304 = dma.hbm_to_vmem [thread:$0]  (!%p9137_p1), %s8050_s22, 3840, %s8052_s17, %s8055_s23, %s7817_s13, %s7817_s13, %s7818_s10  }
  0x72   : > { %s8091_s29 = scalar_lea.hbm %s9100_s19, %s5967_s0  ;;  %s721_s2 = scalar_lea.vmem [#allocation7], %s8043_s4 }
  0x73   : > { %s728_s16 = sshll.u32 %s721_s2, 4  ;;  %s719_s1 = scalar_lea.sflag [#allocation8], %s8043_s4  ;;  %s729_s16 = int_to_ptr.vmem [resolvable:$true] %s728_s16 }
  0x74   : > { %s7735_s15 = scalar_lea.hbm %s8091_s29, 16  ;;  %s7740_s10 = scalar_lea.hbm %s9100_s19, 32 }
  0x75   : > { %p7736_p9 = scmp.ne.s32.totalorder %s8091_s29, %s7735_s15  ;;  %p7741_p4 = scmp.lt.u32.totalorder %s8091_s29, %s9100_s19 }
  0x76   : > { %p7742_p6 = scmp.lt.u32.totalorder %s7740_s10, %s7735_s15  ;;  %p7744_p10 = scmp.lt.u32.totalorder %s7735_s15, %s8091_s29 }
  0x77   : > { %p7738_p2 = pnand %p7736_p9, %p7707_p5 }
  0x78   : > { %p7743_p7 = por %p7742_p6, %p7741_p4 }
  0x79   : > { %p7739_p3 = pneg %p7738_p2 }
  0x7a   : > { %p7745_p12 = por %p7744_p10, %p7743_p7 }
  0x7c   : > { %p7746_p11 = pnand %p7745_p12, %p7739_p3 }
  0x7e   : > { %7749 = shalt.err (!%p7746_p11)
}
  0x7f   : > { %s7750_s4 = scalar_lea.vmem %s729_s16, 16  ;;  %s7820_s0 = smov [#allocation7]  }
  0x80   : > { %p7751_p8 = scmp.ne.s32.totalorder %s729_s16, %s7750_s4  ;;  %s7755_s23 = sshll.u32 %s7820_s0, 4  ;;  %s7756_s23 = int_to_ptr.vmem [resolvable:$false] %s7755_s23 }
  0x81   : > { %s7757_s20 = scalar_lea.vmem %s7756_s23, 32  ;;  %p7758_p9 = scmp.lt.s32.totalorder %s729_s16, %s7756_s23 }
  0x82   : > { %p7753_p13 = pnand %p7751_p8, %p7707_p5  ;;  %p7759_p2 = scmp.lt.s32.totalorder %s7757_s20, %s7750_s4 }
  0x84   : > { %p7754_p0 = pneg %p7753_p13  ;;  %p7760_p4 = por %p7759_p2, %p7758_p9 }
  0x86   : > { %p7761_p6 = pnand %p7760_p4, %p7754_p0 }
  0x88   : > { %7764 = shalt.err (!%p7761_p6)
}
  0x89   : > { %7307 = dma.hbm_to_vmem [thread:$0]  (!%p9137_p1), %s8091_s29, 16, %s729_s16, %s719_s1  }
  0x8a   : > { %p9138_p3 = scmp.ne.s32.totalorder %s9133_s5, 0 }
  0x8b   : > { %p9139_p7 = scmp.eq.s32.totalorder (!%p9138_p3), %s7955_s3, 0 }
  0x8c   : > { %737 = sbr.rel (%p9138_p3) target bundleno = 4214 (0x1076), region = 100 }
  0x93   : > { %7782 = dma.done.wait (%p9139_p7), [#allocation3], 512   ;;  %p9140_p5 = pmov %p9139_p7 }
  0x94   : > { %s743_s14 = sand.u32 1, %s7955_s3   ;;  %s8122_s28 = sand.u32 1, %s7803_s25  }
  0x95   : > { %7784 = vsyncadd (%p9140_p5), [#allocation3], 4294966784  ;;  %s7274_s2 = smul.u32 240, %s8122_s28  ;;  %s744_s24 = scalar_lea.sflag [#allocation5], %s743_s14 }
  0x96   : > { %p9141_p1 = scmp.ne.s32.totalorder %s9132_s30, 0 }
  0x97   : > { %s8125_s15 = scalar_lea.vmem [#allocation4], %s7274_s2 }
  0x98   : > { %7786 = dma.done.wait (%p9141_p1), %s744_s24, 3840  }
  0x99   : > { %7788 = vsyncadd (%p9141_p1), %s744_s24, 4294963456  ;;  %p9142_p10 = pmov %p9140_p5 }
  0x9a   : > { %p9143_p12 = pmov %p9140_p5 }
  0x9b   : > { %7790 = dma.done.wait (%p9142_p10), [#allocation5], 384  }
  0x9c   : > { %7792 = vsyncadd (%p9143_p12), [#allocation5], 4294966912  ;;  %s757_s5 = scalar_lea.sflag [#allocation8], %s8122_s28  ;;  %s759_s29 = scalar_lea.vmem [#allocation7], %s8122_s28 }
  0x9d   : > { %7794 = dma.done.wait (%p9141_p1), %s757_s5, 16  }
  0x9e   : > { %7796 = vsyncadd (%p9141_p1), %s757_s5, 4294967280  ;;  %p866_p11 = scmp.lt.s32.totalorder %s7955_s3, 1  ;;  %s9144_s13 = sld [smem:[#allocation15_spill]]  ;;  %vm926_vm0 = vcmask 392192   ;;  %v916_v8 = vld [vmem:[#allocation2] sm:$0xff]  ;;  %v917_v24 = vld [vmem:[#allocation2 + $0x8] sm:$0xff] }
  0x9f   : > { %6797 = vmatprep.mubr.msk.f32.mxu0 %vm926_vm0, %v916_v8  ;;  %s9145_s17 = sld [smem:[#allocation18_spill]]  ;;  %s9146_s24 = sld [smem:[#allocation19_spill]]  ;;  %v918_v25 = vld [vmem:[#allocation2 + $0x10] sm:$0xff]  ;;  %v919_v29 = vld [vmem:[#allocation2 + $0x18] sm:$0xff]  ;;  %vm1316_vm5 = vcmask 261120   ;;  %vm1311_vm6 = vcmask 130048  }
  0xa0   : > { %s9163_s3 = smov (!%p866_p11, %s7955_s3), 1  ;;  %s7821_s30 = smov 16   ;;  %vm2188_vm7 = vcmask 1040384   ;;  %vm2184_vm8 = vcmask 146432   ;;  %vm2727_vm9 = vcmask 97280   ;;  %vm2734_vm10 = vcmask 1045504  }
  0xa1   : > { %s7275_s16 = smul.u32 48, %s9163_s3  ;;  %s7822_s22 = smov 32   ;;  %vm7825_vm11 = vmmov 0   ;;  %vm3206_vm12 = vcmask 1041408   ;;  %vm3196_vm13 = vcmask 162816   ;;  %vm3477_vm14 = vcmask 654336  }
  0xa2   : > { %s9148_s23 = sld [smem:[#allocation20_spill]]  ;;  %s6555_s20 = sshll.u32 %s9163_s3, 5  ;;  %vm4871_vm15 = vcmask 293888  }
  0xa3   : > { %s914_s5 = scalar_lea.vmem %s9102_s21, %s6555_s20  ;;  %s7276_s4 = smul.u32 216, %s9163_s3 }
  0xa4   : > { %s870_s10 = scalar_lea.vmem %s9144_s13, %s7275_s16  ;;  %s9147_s13 = sld [smem:[#allocation16_spill]] }
  0xa5   : > { %v920_v0 = vld [vmem:[%s870_s10] sm:$0xff]  ;;  %v921_v1 = vld [vmem:[%s870_s10 + $0x8] sm:$0xff]  ;;  %v922_v2 = vld [vmem:[%s870_s10 + $0x10] sm:$0xff]  ;;  %s5972_s14 = sshll.u32 %s9163_s3, 1  ;;  %s7277_s1 = smul.u32 72, %s9163_s3 }
  0xa6   : > { %v7185_v3 = vpack.c.bf16 %v921_v1, %v920_v0  ;;  %v923_v4 = vld [vmem:[%s870_s10 + $0x18] sm:$0xff]  ;;  %v924_v6 = vld [vmem:[%s870_s10 + $0x20] sm:$0xff]  ;;  %v925_v7 = vld [vmem:[%s870_s10 + $0x28] sm:$0xff]  ;;  %s874_s16 = scalar_lea.vmem %s9088_s7, %s5972_s14  ;;  %s9150_s2 = sld [smem:[#allocation24_spill]] }
  0xa7   : > { %v7189_v5 = vpack.c.bf16 %v923_v4, %v922_v2  ;;  %v1024_v9 = vld [vmem:[%s9145_s17] sm:$0xff]  ;;  %v1025_v10 = vld [vmem:[%s9145_s17 + $0x8] sm:$0xff]  ;;  %v1026_v12 = vld [vmem:[%s9145_s17 + $0x10] sm:$0xff]  ;;  %v7193_v13 = vpack.c.bf16 %v925_v7, %v924_v6  ;;  %s9151_s27 = sld [smem:[#allocation22_spill]]  ;;  %s9152_s0 = sld [smem:[#allocation23_spill]] }
  0xa8   : > { %7186 = vmatprep.subr.bf16.mxu0 %v7185_v3  ;;  %v7197_v11 = vpack.c.bf16 %v1025_v10, %v1024_v9  ;;  %v1127_v14 = vld [vmem:[%s9146_s24] sm:$0xff]  ;;  %v1027_v15 = vld [vmem:[%s9145_s17 + $0x18] sm:$0xff]  ;;  %v1128_v16 = vld [vmem:[%s9146_s24 + $0x8] sm:$0xff] }
  0xa9   : > { %7188 = vmatpush3.bf16.msra.mxu0 %v7185_v3  ;;  %v7201_v17 = vpack.c.bf16 %v1027_v15, %v1026_v12  ;;  %v1028_v18 = vld [vmem:[%s9145_s17 + $0x20] sm:$0xff]  ;;  %v1029_v19 = vld [vmem:[%s9145_s17 + $0x28] sm:$0xff]  ;;  %v1129_v20 = vld [vmem:[%s9146_s24 + $0x10] sm:$0xff]  ;;  %v7209_v23 = vpack.c.bf16 %v1128_v16, %v1127_v14 }
  0xaa   : > { %7190 = vmatprep.subr.bf16.mxu0 %v7189_v5  ;;  %7198 = vmatprep.subr.bf16.mxu1 %v7197_v11  ;;  %v1130_v21 = vld [vmem:[%s9146_s24 + $0x18] sm:$0xff]  ;;  %v7205_v22 = vpack.c.bf16 %v1029_v19, %v1028_v18  ;;  %v1131_v26 = vld [vmem:[%s9146_s24 + $0x20] sm:$0xff]  ;;  %v1132_v27 = vld [vmem:[%s9146_s24 + $0x28] sm:$0xff] }
  0xab   : > { %7200 = vmatpush3.bf16.msra.mxu1 %v7197_v11  ;;  %v7213_v28 = vpack.c.bf16 %v1130_v21, %v1129_v20  ;;  %v7217_v30 = vpack.c.bf16 %v1132_v27, %v1131_v26  ;;  %v1222_v31 = vld [vmem:[%s9147_s13] sm:$0xff]  ;;  %v1223_v32 = vld [vmem:[%s9147_s13 + $0x8] sm:$0xff]  ;;  %v1224_v36 = vld [vmem:[%s9147_s13 + $0x10] sm:$0xff] }
  0xac   : > { %7202 = vmatprep.subr.bf16.mxu1 %v7201_v17  ;;  %v5992_v33 = vld [vmem:[%s9147_s13 + $0x20] sm:$0xff]  ;;  %v5993_v34 = vld [vmem:[%s9147_s13 + $0x28] sm:$0xff]  ;;  %v1225_v37 = vld [vmem:[%s9147_s13 + $0x18] sm:$0xff] }
  0xad   : > { %7192 = vmatpush3.bf16.msra.mxu0 %v7189_v5  ;;  %v1231_v35 = vsub.f32 %v1222_v31, %v5992_v33  ;;  %v1232_v38 = vsub.f32 %v1223_v32, %v5993_v34  ;;  %v5994_v39 = vld [vmem:[%s9147_s13 + $0x30] sm:$0xff]  ;;  %v5995_v40 = vld [vmem:[%s9147_s13 + $0x38] sm:$0xff]  ;;  %s890_s10 = scalar_lea.vmem %s9151_s27, %s9163_s3 }
  0xae   : > { %7194 = vmatprep.subr.bf16.mxu0 %v7193_v13  ;;  %v1233_v42 = vsub.f32 %v1224_v36, %v5994_v39  ;;  %v1234_v43 = vsub.f32 %v1225_v37, %v5995_v40 }
  0xaf   : > { %7204 = vmatpush3.bf16.msra.mxu1 %v7201_v17  ;;  %v1235_v41 = vand.u32 2147483647, %v1231_v35  ;;  %v1236_v44 = vand.u32 2147483647, %v1232_v38  ;;  %vm1263_vm1 = vcmp.ge.f32.partialorder %v1231_v35, 0.0  ;;  %vm1264_vm2 = vcmp.ge.f32.partialorder %v1232_v38, 0.0 }
  0xb0   : > { %7206 = vmatprep.subr.bf16.mxu1 %v7205_v22  ;;  %v1237_v46 = vand.u32 2147483647, %v1233_v42  ;;  %v1238_v47 = vand.u32 2147483647, %v1234_v43  ;;  %vm1265_vm3 = vcmp.ge.f32.partialorder %v1233_v42, 0.0  ;;  %vm1266_vm4 = vcmp.ge.f32.partialorder %v1234_v43, 0.0 }
  0xb1   : > { %7196 = vmatpush3.bf16.msra.mxu0 %v7193_v13  ;;  %v1239_v45 = vsub.f32 0.0, %v1235_v41  ;;  %v1240_v48 = vsub.f32 0.0, %v1236_v44 }
  0xb2   : > { %7210 = vmatprep.subr.bf16.mxu0 %v7209_v23  ;;  %v1241_v50 = vsub.f32 0.0, %v1237_v46  ;;  %v1242_v51 = vsub.f32 0.0, %v1238_v47 }
  0xb3   : > { %7208 = vmatpush3.bf16.msra.mxu1 %v7205_v22  ;;  %v1243_v49 = vmul.f32 1.442695, %v1239_v45  ;;  %v1245_v52 = vmul.f32 1.442695, %v1240_v48 }
  0xb4   : > { %6798 = vmatmul.mubr.msk.f32.vlgmr.msra.gmra.mrb[0].mxu0 %vm926_vm0, %v917_v24  ;;  %v1247_v53 = vmul.f32 1.442695, %v1241_v50  ;;  %v1249_v54 = vmul.f32 1.442695, %v1242_v51 }
  0xb5   : > { %6800 = vmatprep.mubr.msk.f32.mxu0 %vm926_vm0, %v918_v25  ;;  %7212 = vmatpush3.bf16.msra.mxu0 %v7209_v23  ;;  %7633 = vpow2.f32 %v1243_v49  ;;  %v7376_v23 = vld [vmem:[%s9148_s23] sm:$0xff]  }
  0xb6   : > { %7214 = vmatprep.subr.bf16.mxu0 %v7213_v28  ;;  %7635 = vpow2.f32 %v1245_v52 }
  0xb7   : > { %7637 = vpow2.f32 %v1247_v53 }
  0xb8   : > { %6801 = vmatmul.mubr.msk.f32.gmra.mrb[2].mxu0 %vm926_vm0, %v919_v29  ;;  %7639 = vpow2.f32 %v1249_v54  ;;  %v7377_v54 = vld [vmem:[%s9148_s23 + $0x8] ss:$0 sps:$4 sm:$0x11]  }
  0xb9   : > { %7216 = vmatpush3.bf16.msra.mxu0 %v7213_v28 }
  0xba   : > { %7218 = vmatprep.subr.bf16.mxu0 %v7217_v30 }
  0xbd   : > { %7220 = vmatpush3.bf16.msra.mxu0 %v7217_v30 }
  0xbf   : > { %v7634_v55 = vpop.eup %7633 }
  0xc0   : > { %v7636_v56 = vpop.eup %7635  ;;  %v1251_v57 = vadd.f32 1.0, %v7634_v55 }
  0xc1   : > { %v7638_v58 = vpop.eup %7637  ;;  %v1252_v59 = vadd.f32 1.0, %v7636_v56 }
  0xc2   : > { %v7640_v60 = vpop.eup %7639  ;;  %7641 = vrcp.f32 %v1251_v57  ;;  %v1253_v61 = vadd.f32 1.0, %v7638_v58  ;;  %v7380_v57 = vld [vmem:[%s9148_s23 + $0x18] sm:$0xff]  }
  0xc3   : > { %7643 = vrcp.f32 %v1252_v59  ;;  %v1254_v62 = vadd.f32 1.0, %v7640_v60  ;;  %v7382_v59 = vld [vmem:[%s9148_s23 + $0x24] sm:$0xff]  }
  0xc4   : > { %7645 = vrcp.f32 %v1253_v61  ;;  %v7384_v61 = vld [vmem:[%s9148_s23 + $0x30] sm:$0xff]  }
  0xc5   : > { %7647 = vrcp.f32 %v1254_v62  ;;  %v7385_v62 = vld [vmem:[%s9148_s23 + $0x38] ss:$0 sps:$4 sm:$0x11]  }
  0xcc   : > { %v7642_v63 = vpop.eup %7641 }
  0xcd   : > { %v7644_v0 = vpop.eup %7643  ;;  %v1267_v1 = vmul.f32 %v7642_v63, %v7634_v55  ;;  %v7378_v55 = vld [vmem:[%s9148_s23 + $0xc] sm:$0xff]  }
  0xce   : > { %v7646_v2 = vpop.eup %7645  ;;  %v1268_v3 = vmul.f32 %v7644_v0, %v7636_v56  ;;  %v7379_v56 = vld [vmem:[%s9148_s23 + $0x14] ss:$0 sps:$4 sm:$0x11]  }
  0xcf   : > { %v7648_v4 = vpop.eup %7647  ;;  %v1271_v5 = vsel %vm1263_vm1, %v7642_v63, %v1267_v1  ;;  %v1269_v6 = vmul.f32 %v7646_v2, %v7638_v58  ;;  %v7381_v58 = vld [vmem:[%s9148_s23 + $0x20] ss:$0 sps:$4 sm:$0x11]   ;;  %v7388_v63 = vld [vmem:[%s8125_s15 + $0x34] ss:$8 sps:$4 sm:$0xff]  }
  0xd0   : > { %v1272_v7 = vsel %vm1264_vm2, %v7644_v0, %v1268_v3  ;;  %v1275_v8 = vsub.f32 1.0, %v1271_v5  ;;  %v1270_v9 = vmul.f32 %v7648_v4, %v7640_v60  ;;  %v7383_v60 = vld [vmem:[%s9148_s23 + $0x2c] ss:$0 sps:$4 sm:$0x11]   ;;  %v7386_v0 = vld [vmem:[%s8125_s15 + $0x30] ss:$8 sps:$4 sm:$0xff]   ;;  %1507 = vmatprep.subr.bf16.mxu0 %v7388_v63 }
  0xd1   : > { %v1276_v10 = vsub.f32 1.0, %v1272_v7  ;;  %v7356_v11 = vpack.i.bf16 %v1272_v7, %v1271_v5  ;;  %v1273_v12 = vsel %vm1265_vm3, %v7646_v2, %v1269_v6  ;;  %v7389_v1 = vld [vmem:[%s8125_s15 + $0x40] ss:$8 sps:$4 sm:$0xff]   ;;  %v7391_v2 = vld [vmem:[%s8125_s15 + $0x44] ss:$8 sps:$4 sm:$0xff]   ;;  %v7823_v5 = vmov 0  }
  0xd2   : > { %v1274_v13 = vsel %vm1266_vm4, %v7648_v4, %v1270_v9  ;;  %v1277_v14 = vsub.f32 1.0, %v1273_v12  ;;  %v7394_v3 = vld [vmem:[%s8125_s15 + $0x54] ss:$8 sps:$4 sm:$0xff]   ;;  %v7392_v4 = vld [vmem:[%s8125_s15 + $0x50] ss:$8 sps:$4 sm:$0xff]  }
  0xd3   : > { %7357 = vrot.lane.b32.xlu0 %v7356_v11, %s7821_s30  ;;  %v1278_v15 = vsub.f32 1.0, %v1274_v13  ;;  %v7366_v16 = vpack.i.bf16 %v1274_v13, %v1273_v12  ;;  %v7361_v17 = vpack.i.bf16 %v1276_v10, %v1275_v8  ;;  %v7397_v6 = vld [vmem:[%s8125_s15 + $0x4] ss:$8 sps:$4 sm:$0xff]  }
  0xd5   : > { %7367 = vrot.lane.b32.xlu1 %v7366_v16, %s7821_s30  ;;  %v7371_v18 = vpack.i.bf16 %v1278_v15, %v1277_v14  ;;  %v7395_v16 = vld [vmem:[%s8125_s15] ss:$8 sps:$4 sm:$0xff]   ;;  %s8427_s30 = scalar_lea.vmem %s9093_s12, %s7277_s1 }
  0xd7   : > { %7362 = vrot.lane.b32.xlu0 %v7361_v17, %s7822_s22 }
  0xd9   : > { %7372 = vrot.lane.b32.xlu1 %v7371_v18, %s7822_s22  ;;  %v7400_v18 = vld [vmem:[%s8125_s15 + $0x14] ss:$8 sps:$4 sm:$0xff]  }
 0x145   : > { %v7358_v24 = vpop.permute.xlu0 %7357 }
 0x146   : > { %v7360_v28 = vunpack.i.h.bf16 %v7358_v24  ;;  %v7359_v31 = vunpack.i.l.bf16 %v7358_v24  ;;  %v7401_v24 = vld [vmem:[%s8125_s15 + $0x20] ss:$8 sps:$4 sm:$0xff]  }
 0x147   : > { %v7368_v25 = vpop.permute.xlu1 %7367 }
 0x148   : > { %v7370_v40 = vunpack.i.h.bf16 %v7368_v25  ;;  %v7369_v43 = vunpack.i.l.bf16 %v7368_v25 }
 0x149   : > { %v7363_v26 = vpop.permute.xlu0 %7362 }
 0x14a   : > { %v7365_v27 = vunpack.i.h.bf16 %v7363_v26  ;;  %v7364_v29 = vunpack.i.l.bf16 %v7363_v26 }
 0x14b   : > { %v7373_v30 = vpop.permute.xlu1 %7372 }
 0x14c   : > { %v7375_v39 = vunpack.i.h.bf16 %v7373_v30  ;;  %v7374_v42 = vunpack.i.l.bf16 %v7373_v30 }
 0x187   : > { %v6799_v19 = vpop.f32.mrb[0].mxu0 }
 0x188   : > { %v1005_v20 = vpop.f32.mrb[1].mxu0 }
 0x189   : > { %6815 = vmatprep.mubr.msk.f32.mxu1 %vm926_vm0, %v1005_v20  ;;  %6833 = vmatprep.mubr.msk.f32.mxu0 %vm926_vm0, %v1005_v20  ;;  %v7403_v20 = vld [vmem:[%s8125_s15 + $0x24] ss:$8 sps:$4 sm:$0xff]  }
 0x18a   : > { %6816 = vmatmul.mubr.msk.f32.vlgmr.msra.gmra.mrb[0].mxu1 %vm926_vm0, %v6799_v19  ;;  %6834 = vmatmul.mubr.msk.f32.vlgmr.msra.gmra.mrb[4].mxu0 %vm926_vm0, %v6799_v19  ;;  %v7398_v19 = vld [vmem:[%s8125_s15 + $0x10] ss:$8 sps:$4 sm:$0xff]  }
 0x18b   : > { %v6802_v21 = vpop.f32.mrb[2].mxu0  ;;  %1508 = vmatpush1.bf16.msra.mxu0 %v7386_v0 }
 0x18c   : > { %v1015_v22 = vpop.f32.mrb[3].mxu0  ;;  %1509 = vmatprep.subr.bf16.mxu0 %v7391_v2 }
 0x18d   : > { %6818 = vmatprep.mubr.msk.f32.mxu1 %vm926_vm0, %v1015_v22  ;;  %6836 = vmatprep.mubr.msk.f32.mxu0 %vm926_vm0, %v1015_v22 }
 0x18e   : > { %6819 = vmatmul.mubr.msk.f32.gmra.mrb[2].mxu1 %vm926_vm0, %v6802_v21  ;;  %6837 = vmatmul.mubr.msk.f32.gmra.mrb[6].mxu0 %vm926_vm0, %v6802_v21 }
 0x18f   : > { %6843 = vmatprep.mubr.msk.bf16.mxu1 %vm1316_vm5, %v7376_v23  ;;  %1510 = vmatpush1.bf16.msra.mxu0 %v7389_v1 }
 0x190   : > { %1511 = vmatprep.subr.bf16.mxu0 %v7394_v3  ;;  %1539 = vmatprep.mubr.bf16.mxu0 %v7823_v5 }
 0x193   : > { %1512 = vmatpush1.bf16.msra.mxu0 %v7392_v4 }
 0x194   : > { %1594 = vmatprep.subr.bf16.mxu0 %v7397_v6 }
 0x25d   : > { %v6817_v32 = vpop.f32.mrb[0].mxu1  ;;  %v6835_v33 = vpop.f32.mrb[4].mxu0 }
 0x25e   : > { %v1313_v34 = vsel %vm1311_vm6, %v6817_v32, %v7360_v28  ;;  %1219 = vst [vmem:[%s914_s5 + $0x8] sm:$0xff] %v6835_v33  ;;  %v1108_v35 = vpop.f32.mrb[1].mxu1  ;;  %v1199_v36 = vpop.f32.mrb[5].mxu0  ;;  %v7404_v32 = vld [vmem:[%s8125_s15 + $0x60] ss:$8 sps:$4 sm:$0xff]  }
 0x25f   : > { %v1318_v37 = vsel %vm1316_vm5, %v1313_v34, %v7365_v27  ;;  %v1312_v38 = vsel %vm1311_vm6, %v1108_v35, %v7359_v31  ;;  %1218 = vst [vmem:[%s914_s5] sm:$0xff] %v1199_v36  ;;  %v7406_v27 = vld [vmem:[%s8125_s15 + $0x64] ss:$8 sps:$4 sm:$0xff]   ;;  %v7409_v34 = vld [vmem:[%s8125_s15 + $0x74] ss:$8 sps:$4 sm:$0xff]   ;;  %v7407_v36 = vld [vmem:[%s8125_s15 + $0x70] ss:$8 sps:$4 sm:$0xff]  }
 0x260   : > { %v1317_v41 = vsel %vm1316_vm5, %v1312_v38, %v7364_v29 }
 0x261   : > { %v1321_v44 = vpack.c.bf16 %v1318_v37, %v1317_v41  ;;  %v6820_v45 = vpop.f32.mrb[2].mxu1  ;;  %v6838_v46 = vpop.f32.mrb[6].mxu0  ;;  %v7412_v37 = vld [vmem:[%s8125_s15 + $0x84] ss:$8 sps:$4 sm:$0xff]   ;;  %v7410_v41 = vld [vmem:[%s8125_s15 + $0x80] ss:$8 sps:$4 sm:$0xff]  }
 0x262   : > { %v1315_v47 = vsel %vm1311_vm6, %v6820_v45, %v7370_v40  ;;  %1221 = vst [vmem:[%s914_s5 + $0x18] sm:$0xff] %v6838_v46  ;;  %v1118_v48 = vpop.f32.mrb[3].mxu1  ;;  %v1209_v49 = vpop.f32.mrb[7].mxu0  ;;  %v7413_v46 = vld [vmem:[%s8125_s15 + $0x90] ss:$8 sps:$4 sm:$0xff]  }
 0x263   : > { %v1320_v50 = vsel %vm1316_vm5, %v1315_v47, %v7375_v39  ;;  %v1314_v51 = vsel %vm1311_vm6, %v1118_v48, %v7369_v43  ;;  %1220 = vst [vmem:[%s914_s5 + $0x10] sm:$0xff] %v1209_v49  ;;  %6839 = vmatprep.subr.bf16.mxu1 %v1321_v44  ;;  %v7418_v47 = vld [vmem:[%s8125_s15 + $0xa4] ss:$8 sps:$4 sm:$0xff]   ;;  %v7416_v48 = vld [vmem:[%s8125_s15 + $0xa0] ss:$8 sps:$4 sm:$0xff]  }
 0x264   : > { %v1319_v52 = vsel %vm1316_vm5, %v1314_v51, %v7374_v42  ;;  %6840 = vmatpush3.bf16.msra.mxu1 %v1321_v44  ;;  %v7421_v49 = vld [vmem:[%s8125_s15 + $0xb4] ss:$8 sps:$4 sm:$0xff]  }
 0x265   : > { %v1322_v53 = vpack.c.bf16 %v1320_v50, %v1319_v52  ;;  %v7419_v50 = vld [vmem:[%s8125_s15 + $0xb0] ss:$8 sps:$4 sm:$0xff]   ;;  %v7424_v52 = vld [vmem:[%s8125_s15 + $0xc4] ss:$8 sps:$4 sm:$0xff]  }
 0x267   : > { %6841 = vmatprep.subr.bf16.mxu1 %v1322_v53 }
 0x268   : > { %6842 = vmatpush3.bf16.msra.mxu1 %v1322_v53 }
 0x269   : > { %6847 = vmatprep.subr.bf16.mxu1 %v1321_v44 }
 0x26b   : > { %6844 = vmatmul.mubr.msk.bf16.vlgmr.msra.gmra.mrb[4].mxu1 %vm1316_vm5, %v7377_v54  ;;  %v7427_v54 = vld [vmem:[%s8125_s15 + $0xd4] ss:$8 sps:$4 sm:$0xff]  }
 0x26c   : > { %6848 = vmatpush3.bf16.msra.mxu1 %v1321_v44  ;;  %6851 = vmatprep.mubr.msk.bf16.mxu1 %vm1316_vm5, %v7378_v55  ;;  %v7425_v55 = vld [vmem:[%s8125_s15 + $0xd0] ss:$8 sps:$4 sm:$0xff]  }
 0x26d   : > { %6849 = vmatprep.subr.bf16.mxu1 %v1322_v53 }
 0x270   : > { %6850 = vmatpush3.bf16.msra.mxu1 %v1322_v53 }
 0x271   : > { %6855 = vmatprep.subr.bf16.mxu1 %v1321_v44 }
 0x273   : > { %6852 = vmatmul.mubr.msk.bf16.vlgmr.msra.gmra.mrb[8].mxu1 %vm1316_vm5, %v7379_v56  ;;  %v7430_v56 = vld [vmem:[%s8125_s15 + $0xe4] ss:$8 sps:$4 sm:$0xff]  }
 0x274   : > { %6856 = vmatpush3.bf16.msra.mxu1 %v1321_v44  ;;  %6859 = vmatprep.mubr.msk.bf16.mxu1 %vm1316_vm5, %v7380_v57  ;;  %v7428_v57 = vld [vmem:[%s8125_s15 + $0xe0] ss:$8 sps:$4 sm:$0xff]  }
 0x275   : > { %6857 = vmatprep.subr.bf16.mxu1 %v1322_v53 }
 0x278   : > { %6858 = vmatpush3.bf16.msra.mxu1 %v1322_v53 }
 0x279   : > { %6863 = vmatprep.subr.bf16.mxu1 %v1321_v44 }
 0x27b   : > { %6860 = vmatmul.mubr.msk.bf16.vlgmr.msra.gmra.mrb[12].mxu1 %vm1316_vm5, %v7381_v58 }
 0x27c   : > { %6864 = vmatpush3.bf16.msra.mxu1 %v1321_v44  ;;  %6867 = vmatprep.mubr.msk.bf16.mxu1 %vm1316_vm5, %v7382_v59 }
 0x27d   : > { %6865 = vmatprep.subr.bf16.mxu1 %v1322_v53 }
 0x280   : > { %6866 = vmatpush3.bf16.msra.mxu1 %v1322_v53 }
 0x281   : > { %6871 = vmatprep.subr.bf16.mxu1 %v1321_v44 }
 0x283   : > { %6868 = vmatmul.mubr.msk.bf16.vlgmr.msra.gmra.mrb[16].mxu1 %vm1316_vm5, %v7383_v60 }
 0x284   : > { %6872 = vmatpush3.bf16.msra.mxu1 %v1321_v44  ;;  %6875 = vmatprep.mubr.msk.bf16.mxu1 %vm1316_vm5, %v7384_v61  ;;  %v7415_v44 = vld [vmem:[%s8125_s15 + $0x94] ss:$8 sps:$4 sm:$0xff]  }
 0x285   : > { %6873 = vmatprep.subr.bf16.mxu1 %v1322_v53 }
 0x288   : > { %6874 = vmatpush3.bf16.msra.mxu1 %v1322_v53  ;;  %v7422_v53 = vld [vmem:[%s8125_s15 + $0xc0] ss:$8 sps:$4 sm:$0xff]   ;;  %s8329_s15 = scalar_lea.vmem %s9090_s9, %s7276_s4  ;;  %s7279_s4 = smul.u32 3, %s9163_s3 }
 0x289   : > { %v7442_v60 = vld [vmem:[%s8329_s15] sm:$0xff]   ;;  %v7443_v61 = vld [vmem:[%s8329_s15 + $0x8] sm:$0xff]   ;;  %v7445_v2 = vld [vmem:[%s8329_s15 + $0x18] sm:$0xff]  }
 0x28a   : > { %v7446_v4 = vld [vmem:[%s8329_s15 + $0x20] sm:$0xff]   ;;  %v7447_v6 = vld [vmem:[%s8329_s15 + $0x28] sm:$0xff]  }
 0x28b   : > { %6876 = vmatmul.mubr.msk.bf16.vlgmr.msra.gmra.mrb[20].mxu1 %vm1316_vm5, %v7385_v62  ;;  %v7444_v62 = vld [vmem:[%s8329_s15 + $0x10] sm:$0xff]  }
 0x28c   : > { %2227 = vmatprep.mubr.bf16.mxu1 %v7823_v5 }
 0x33e   : > { %v6845_v7 = vpop.f32.mrb[4].mxu1 }
 0x33f   : > { %v1374_v8 = vpop.f32.mrb[5].mxu1  ;;  %v1389_v43 = vpack.c.bf16 %v6845_v7, %v6845_v7  ;;  %v7448_v7 = vld [vmem:[%s8329_s15 + $0x30] sm:$0xff]  }
 0x340   : > { %v6846_v9 = vpop.f32.mrb[6].mxu1 }
 0x341   : > { %v1377_v10 = vpop.f32.mrb[7].mxu1 }
 0x342   : > { %v1388_v11 = vpack.c.bf16 %v1377_v10, %v1374_v8 }
 0x346   : > { %v6853_v12 = vpop.f32.mrb[8].mxu1 }
 0x347   : > { %v1448_v13 = vpop.f32.mrb[9].mxu1  ;;  %v1463_v26 = vpack.c.bf16 %v6853_v12, %v6853_v12 }
 0x348   : > { %v6854_v14 = vpop.f32.mrb[10].mxu1 }
 0x349   : > { %v1451_v15 = vpop.f32.mrb[11].mxu1 }
 0x34a   : > { %v1462_v17 = vpack.c.bf16 %v1451_v15, %v1448_v13 }
 0x34c   : > { %6019 = vmatmul.mubr.msk.bf16.vlgmr.msra.gmra.mrb[8].mxu0 %vm926_vm0, %v1462_v17 }
 0x34d   : > { %1595 = vmatpush1.bf16.msra.mxu0 %v7395_v16  ;;  %1549 = vmatprep.mubr.bf16.mxu0 %v7823_v5 }
 0x34e   : > { %1596 = vmatprep.subr.bf16.mxu0 %v7400_v18  ;;  %v6861_v21 = vpop.f32.mrb[12].mxu1 }
 0x34f   : > { %v1697_v22 = vpop.f32.mrb[13].mxu1  ;;  %v1712_v51 = vpack.c.bf16 %v6861_v21, %v6861_v21 }
 0x350   : > { %v6862_v23 = vpop.f32.mrb[14].mxu1 }
 0x351   : > { %1597 = vmatpush1.bf16.msra.mxu0 %v7398_v19  ;;  %v1700_v25 = vpop.f32.mrb[15].mxu1 }
 0x352   : > { %1598 = vmatprep.subr.bf16.mxu0 %v7403_v20  ;;  %v1711_v28 = vpack.c.bf16 %v1700_v25, %v1697_v22  ;;  %v2151_v20 = vlaneseq }
 0x354   : > { %6020 = vmatmul.mubr.msk.bf16.gmra.mrb[12].mxu0 %vm926_vm0, %v1463_v26  ;;  %v8346_v21 = vshrl.u32 %v2151_v20, 7 }
 0x355   : > { %1599 = vmatpush1.bf16.msra.mxu0 %v7401_v24  ;;  %1626 = vmatprep.mubr.bf16.mxu0 %v7823_v5 }
 0x356   : > { %1756 = vmatprep.subr.bf16.mxu0 %v7406_v27  ;;  %v6869_v29 = vpop.f32.mrb[16].mxu1  ;;  %v2153_v25 = vsub.s32 0, %v8346_v21 }
 0x357   : > { %v1865_v30 = vpop.f32.mrb[17].mxu1  ;;  %v1880_v58 = vpack.c.bf16 %v6869_v29, %v6869_v29  ;;  %v2157_v29 = vsub.s32 1, %v8346_v21 }
 0x358   : > { %v6870_v31 = vpop.f32.mrb[18].mxu1 }
 0x359   : > { %v1868_v33 = vpop.f32.mrb[19].mxu1 }
 0x35a   : > { %v1879_v35 = vpack.c.bf16 %v1868_v33, %v1865_v30 }
 0x35c   : > { %6027 = vmatmul.mubr.msk.bf16.vlgmr.msra.gmra.mrb[8].mxu0 %vm926_vm0, %v1388_v11 }
 0x35d   : > { %1757 = vmatpush1.bf16.msra.mxu0 %v7404_v32  ;;  %1636 = vmatprep.mubr.bf16.mxu0 %v7823_v5 }
 0x35e   : > { %1758 = vmatprep.subr.bf16.mxu0 %v7409_v34  ;;  %v6877_v38 = vpop.f32.mrb[20].mxu1 }
 0x35f   : > { %v2033_v39 = vpop.f32.mrb[21].mxu1  ;;  %v2048_v59 = vpack.c.bf16 %v6877_v38, %v6877_v38 }
 0x360   : > { %v6878_v40 = vpop.f32.mrb[22].mxu1 }
 0x361   : > { %1759 = vmatpush1.bf16.msra.mxu0 %v7407_v36  ;;  %v2036_v42 = vpop.f32.mrb[23].mxu1 }
 0x362   : > { %1760 = vmatprep.subr.bf16.mxu0 %v7412_v37  ;;  %v2047_v45 = vpack.c.bf16 %v2036_v42, %v2033_v39 }
 0x364   : > { %6028 = vmatmul.mubr.msk.bf16.gmra.mrb[16].mxu0 %vm926_vm0, %v1389_v43 }
 0x365   : > { %1761 = vmatpush1.bf16.msra.mxu0 %v7410_v41  ;;  %1788 = vmatprep.mubr.bf16.mxu0 %v7823_v5 }
 0x366   : > { %1924 = vmatprep.subr.bf16.mxu0 %v7415_v44 }
 0x36c   : > { %6048 = vmatmul.mubr.msk.bf16.vlgmr.msra.gmra.mrb[8].mxu0 %vm926_vm0, %v1711_v28  ;;  %v2149_v28 = vld [vmem:[%s874_s16] sm:$0x3] }
 0x36d   : > { %1925 = vmatpush1.bf16.msra.mxu0 %v7413_v46  ;;  %1798 = vmatprep.mubr.bf16.mxu0 %v7823_v5  ;;  %v2154_v31 = vrot.slane %v2149_v28, %v2153_v25  ;;  %v2158_v32 = vrot.slane %v2149_v28, %v2157_v29  ;;  %v7455_v28 = vld [vmem:[%s8329_s15 + $0xa8] sm:$0xff]  }
 0x36e   : > { %1926 = vmatprep.subr.bf16.mxu0 %v7418_v47 }
 0x371   : > { %1927 = vmatpush1.bf16.msra.mxu0 %v7416_v48 }
 0x372   : > { %1928 = vmatprep.subr.bf16.mxu0 %v7421_v49 }
 0x374   : > { %6049 = vmatmul.mubr.msk.bf16.gmra.mrb[20].mxu0 %vm926_vm0, %v1712_v51 }
 0x375   : > { %1929 = vmatpush1.bf16.msra.mxu0 %v7419_v50  ;;  %1956 = vmatprep.mubr.bf16.mxu0 %v7823_v5 }
 0x376   : > { %2092 = vmatprep.subr.bf16.mxu0 %v7424_v52 }
 0x37c   : > { %6069 = vmatmul.mubr.msk.bf16.vlgmr.msra.gmra.mrb[8].mxu0 %vm926_vm0, %v1879_v35 }
 0x37d   : > { %2093 = vmatpush1.bf16.msra.mxu0 %v7422_v53  ;;  %1966 = vmatprep.mubr.bf16.mxu0 %v7823_v5 }
 0x37e   : > { %2094 = vmatprep.subr.bf16.mxu0 %v7427_v54 }
 0x381   : > { %2095 = vmatpush1.bf16.msra.mxu0 %v7425_v55 }
 0x382   : > { %2096 = vmatprep.subr.bf16.mxu0 %v7430_v56 }
 0x384   : > { %6070 = vmatmul.mubr.msk.bf16.gmra.mrb[24].mxu0 %vm926_vm0, %v1880_v58 }
 0x385   : > { %2097 = vmatpush1.bf16.msra.mxu0 %v7428_v57  ;;  %2124 = vmatprep.mubr.bf16.mxu0 %v7823_v5 }
 0x386   : > { %2488 = vmatprep.subr.bf16.mxu0 %v7823_v5 }
 0x38c   : > { %6090 = vmatmul.mubr.msk.bf16.vlgmr.msra.gmra.mrb[8].mxu0 %vm926_vm0, %v2047_v45 }
 0x38d   : > { %2134 = vmatprep.mubr.bf16.mxu0 %v7823_v5  ;;  %2489 = vmatpush1.bf16.msra.mxu0 %v7442_v60  ;;  %v7431_v60 = vld [vmem:[#allocation6] sm:$0x3f]  }
 0x38e   : > { %2490 = vmatprep.subr.bf16.mxu0 %v7823_v5 }
 0x391   : > { %2491 = vmatpush1.bf16.msra.mxu0 %v7443_v61  ;;  %v7432_v61 = vld [vmem:[#allocation6 + $0x8] sm:$0x3f]  }
 0x392   : > { %2492 = vmatprep.subr.bf16.mxu0 %v7823_v5 }
 0x394   : > { %6091 = vmatmul.mubr.msk.bf16.gmra.mrb[28].mxu0 %vm926_vm0, %v2048_v59 }
 0x395   : > { %2493 = vmatpush1.bf16.msra.mxu0 %v7444_v62  ;;  %v7433_v62 = vld [vmem:[%s8329_s15 + $0x48] sm:$0xff]  }
 0x396   : > { %2494 = vmatprep.subr.bf16.mxu0 %v7823_v5 }
 0x399   : > { %2495 = vmatpush1.bf16.msra.mxu0 %v7445_v2  ;;  %v7437_v2 = vld [vmem:[%s8329_s15 + $0x68] sm:$0xff]  }
 0x39a   : > { %2496 = vmatprep.subr.bf16.mxu0 %v7823_v5 }
 0x39d   : > { %2497 = vmatpush1.bf16.msra.mxu0 %v7446_v4  ;;  %v7439_v4 = vld [vmem:[%s8329_s15 + $0x78] sm:$0xff]  }
 0x39e   : > { %2498 = vmatprep.subr.bf16.mxu0 %v7823_v5 }
 0x3a1   : > { %2499 = vmatpush1.bf16.msra.mxu0 %v7447_v6  ;;  %v7440_v6 = vld [vmem:[%s8329_s15 + $0x80] sm:$0xff]  }
 0x3a2   : > { %2500 = vmatprep.subr.bf16.mxu0 %v7823_v5 }
 0x3a5   : > { %2501 = vmatpush1.bf16.msra.mxu0 %v7448_v7  ;;  %v7441_v7 = vld [vmem:[%s8329_s15 + $0x88] sm:$0xff]  }
 0x3a6   : > { %2502 = vmatprep.subr.bf16.mxu0 %v7823_v5 }
 0x427   : > { %v1551_v63 = vpop.f32.mrb[12].mxu0 }
 0x428   : > { %v1553_v0 = vpop.f32.mrb[13].mxu0 }
 0x429   : > { %v1555_v1 = vpop.f32.mrb[14].mxu0 }
 0x42a   : > { %v1556_v3 = vpop.f32.mrb[15].mxu0  ;;  %v7436_v1 = vld [vmem:[%s8329_s15 + $0x60] sm:$0xff]  }
 0x42b   : > { %v7438_v3 = vld [vmem:[%s8329_s15 + $0x70] sm:$0xff]  }
 0x437   : > { %v1638_v8 = vpop.f32.mrb[16].mxu0 }
 0x438   : > { %v1639_v9 = vadd.f32 %v1638_v8, %v1551_v63  ;;  %v1640_v10 = vpop.f32.mrb[17].mxu0  ;;  %v7434_v63 = vld [vmem:[%s8329_s15 + $0x50] sm:$0xff]   ;;  %v7449_v8 = vld [vmem:[%s8329_s15 + $0x38] sm:$0xff]  }
 0x439   : > { %v1641_v11 = vadd.f32 %v1640_v10, %v1553_v0  ;;  %v1642_v12 = vpop.f32.mrb[18].mxu0  ;;  %v7435_v0 = vld [vmem:[%s8329_s15 + $0x58] sm:$0xff]   ;;  %2503 = vmatpush1.bf16.msra.mxu0 %v7449_v8  ;;  %v7467_v8 = vld [vmem:[%s9092_s11 + $0x14] ss:$0 sps:$4 sm:$0x33]  }
 0x43a   : > { %v1643_v13 = vpop.f32.mrb[19].mxu0  ;;  %2504 = vmatprep.subr.bf16.mxu0 %v7823_v5 }
 0x447   : > { %v1800_v14 = vpop.f32.mrb[20].mxu0 }
 0x448   : > { %v1811_v15 = vadd.f32 %v1800_v14, %v1639_v9  ;;  %v1802_v16 = vpop.f32.mrb[21].mxu0  ;;  %v7450_v9 = vld [vmem:[%s8329_s15 + $0x40] sm:$0xff]  }
 0x449   : > { %v1812_v17 = vadd.f32 %v1802_v16, %v1641_v11  ;;  %v1804_v18 = vpop.f32.mrb[22].mxu0  ;;  %2505 = vmatpush1.bf16.msra.mxu0 %v7450_v9  ;;  %v7469_v9 = vld [vmem:[%s8427_s30 + $0x8] sm:$0xff]  }
 0x44a   : > { %v1805_v19 = vpop.f32.mrb[23].mxu0 }
 0x457   : > { %v1968_v22 = vpop.f32.mrb[24].mxu0 }
 0x458   : > { %v1979_v23 = vadd.f32 %v1968_v22, %v1811_v15  ;;  %v1970_v24 = vpop.f32.mrb[25].mxu0 }
 0x459   : > { %v1980_v26 = vadd.f32 %v1970_v24, %v1812_v17  ;;  %v1972_v27 = vpop.f32.mrb[26].mxu0  ;;  %v7452_v24 = vld [vmem:[%s8329_s15 + $0x90] sm:$0xff]  }
 0x45a   : > { %v1973_v30 = vpop.f32.mrb[27].mxu0  ;;  %v7454_v27 = vld [vmem:[%s8329_s15 + $0xa0] sm:$0xff]  }
 0x45b   : > { %v7456_v30 = vld [vmem:[%s8329_s15 + $0xb0] sm:$0xff]  }
 0x45f   : > { %v2126_v33 = vpop.f32.mrb[8].mxu0 }
 0x460   : > { %v2161_v34 = vadd.f32 %v2154_v31, %v2126_v33  ;;  %v2128_v35 = vpop.f32.mrb[9].mxu0  ;;  %v7459_v33 = vld [vmem:[%s8329_s15 + $0xc8] sm:$0xff]  }
 0x461   : > { %v2162_v36 = vadd.f32 %v2158_v32, %v2128_v35  ;;  %v2130_v37 = vpop.f32.mrb[10].mxu0 }
 0x462   : > { %v2163_v38 = vadd.f32 %v2154_v31, %v2130_v37  ;;  %v2132_v39 = vpop.f32.mrb[11].mxu0  ;;  %v2167_v41 = vmax.f32 %v2161_v34, 0.0  ;;  %v7460_v34 = vld [vmem:[%s8329_s15 + $0xd0] sm:$0xff]  }
 0x463   : > { %v2164_v40 = vadd.f32 %v2158_v32, %v2132_v39  ;;  %v2168_v43 = vmax.f32 %v2162_v36, 0.0 }
 0x464   : > { %v2169_v42 = vmax.f32 %v2163_v38, 0.0 }
 0x465   : > { %v2170_v44 = vmax.f32 %v2164_v40, 0.0 }
 0x466   : > { %v8357_v45 = vpack.c.bf16 %v2169_v42, %v2167_v41 }
 0x467   : > { %v2174_v46 = vpack.c.bf16 %v2170_v44, %v2168_v43  ;;  %v2136_v47 = vpop.f32.mrb[28].mxu0 }
 0x468   : > { %v2147_v48 = vadd.f32 %v2136_v47, %v1979_v23  ;;  %v2138_v49 = vpop.f32.mrb[29].mxu0  ;;  %v7451_v23 = vld [vmem:[#allocation6 + $0x10] sm:$0x3f]  }
 0x469   : > { %v2148_v50 = vadd.f32 %v2138_v49, %v1980_v26  ;;  %v2140_v51 = vpop.f32.mrb[30].mxu0  ;;  %2195 = vmatprep.subr.bf16.mxu1 %v2174_v46  ;;  %v7453_v26 = vld [vmem:[%s8329_s15 + $0x98] sm:$0xff]  }
 0x46a   : > { %v2165_v52 = vadd.f32 %v2154_v31, %v2147_v48  ;;  %v2141_v53 = vpop.f32.mrb[31].mxu0  ;;  %2196 = vmatpush1.bf16.msra.mxu1 %v8357_v45  ;;  %v7457_v31 = vld [vmem:[%s8329_s15 + $0xb8] sm:$0xff]  }
 0x46b   : > { %v2166_v54 = vadd.f32 %v2158_v32, %v2148_v50  ;;  %v7458_v32 = vld [vmem:[%s8329_s15 + $0xc0] sm:$0xff]   ;;  %v7461_v51 = vld [vmem:[%s8427_s30 + $0x18] sm:$0xff]   ;;  %v7463_v53 = vld [vmem:[%s8427_s30 + $0x28] sm:$0xff]   ;;  %s9149_s15 = sld [smem:[#allocation21_spill]] }
 0x46c   : > { %v2171_v55 = vmax.f32 %v2165_v52, 0.0  ;;  %v7462_v52 = vld [vmem:[%s8427_s30 + $0x20] sm:$0xff]  }
 0x46d   : > { %v2172_v56 = vmax.f32 %v2166_v54, 0.0  ;;  %v7464_v54 = vld [vmem:[%s9092_s11] sm:$0xff]  }
 0x46e   : > { %v2175_v57 = vpack.c.bf16 %v2171_v55, %v2171_v55 }
 0x46f   : > { %v8360_v58 = vpack.c.bf16 %v2172_v56, %v2172_v56 }
 0x470   : > { %v8363_v59 = vsel %vm2188_vm7, %v2175_v57, 0 }
 0x471   : > { %6093 = vmatprep.subr.msk.bf16.mxu1 %vm2188_vm7, %v8360_v58  ;;  %s882_s14 = scalar_lea.vmem %s9149_s15, %s9163_s3  ;;  %s9154_s15 = sld [smem:[#allocation25_spill]] }
 0x472   : > { %2198 = vmatpush1.bf16.msra.mxu1 %v8363_v59  ;;  %v6167_v56 = vld [vmem:[%s882_s14] ss:$0 sm:$0xff] }
 0x473   : > { %2269 = vmatprep.subr.bf16.mxu1 %v2174_v46 }
 0x475   : > { %6094 = vmatmul.mubr.msk.bf16.vlgmr.msra.gmra.mrb[24].mxu1 %vm2184_vm8, %v7431_v60 }
 0x476   : > { %2270 = vmatpush1.bf16.msra.mxu1 %v8357_v45  ;;  %2301 = vmatprep.mubr.bf16.mxu1 %v7823_v5 }
 0x477   : > { %6096 = vmatprep.subr.msk.bf16.mxu1 %vm2188_vm7, %v8360_v58  ;;  %s899_s14 = scalar_lea.vmem %s9154_s15, %s7279_s4 }
 0x47a   : > { %2272 = vmatpush1.bf16.msra.mxu1 %v8363_v59 }
 0x47b   : > { %2390 = vmatprep.subr.bf16.mxu1 %v7823_v5 }
 0x47d   : > { %6097 = vmatmul.mubr.msk.bf16.vlgmr.msra.gmra.mrb[28].mxu1 %vm2184_vm8, %v7432_v61 }
 0x47e   : > { %2391 = vmatpush1.bf16.msra.mxu1 %v7433_v62 }
 0x47f   : > { %2392 = vmatprep.subr.bf16.mxu1 %v7823_v5 }
 0x482   : > { %2393 = vmatpush1.bf16.msra.mxu1 %v7434_v63 }
 0x483   : > { %2394 = vmatprep.subr.bf16.mxu1 %v7823_v5 }
 0x486   : > { %2395 = vmatpush1.bf16.msra.mxu1 %v7435_v0 }
 0x487   : > { %2396 = vmatprep.subr.bf16.mxu1 %v7823_v5 }
 0x48a   : > { %2397 = vmatpush1.bf16.msra.mxu1 %v7436_v1 }
 0x48b   : > { %2398 = vmatprep.subr.bf16.mxu1 %v7823_v5 }
 0x48e   : > { %2399 = vmatpush1.bf16.msra.mxu1 %v7437_v2 }
 0x48f   : > { %2400 = vmatprep.subr.bf16.mxu1 %v7823_v5 }
 0x492   : > { %2401 = vmatpush1.bf16.msra.mxu1 %v7438_v3 }
 0x493   : > { %2402 = vmatprep.subr.bf16.mxu1 %v7823_v5 }
 0x496   : > { %2403 = vmatpush1.bf16.msra.mxu1 %v7439_v4  ;;  %v7465_v4 = vld [vmem:[%s9092_s11 + $0x8] ss:$0 sps:$4 sm:$0x33]  }
 0x497   : > { %2404 = vmatprep.subr.bf16.mxu1 %v7823_v5 }
 0x49a   : > { %2405 = vmatpush1.bf16.msra.mxu1 %v7440_v6  ;;  %v7466_v6 = vld [vmem:[%s9092_s11 + $0xc] sm:$0xff]  }
 0x49b   : > { %2406 = vmatprep.subr.bf16.mxu1 %v7823_v5 }
 0x49e   : > { %2407 = vmatpush1.bf16.msra.mxu1 %v7441_v7  ;;  %v7468_v7 = vld [vmem:[%s8427_s30] sm:$0xff]  }
 0x49f   : > { %2540 = vmatprep.subr.bf16.mxu1 %v2174_v46 }
 0x548   : > { %v2229_v10 = vpop.f32.mrb[24].mxu1 }
 0x549   : > { %v2231_v11 = vpop.f32.mrb[25].mxu1 }
 0x54a   : > { %v2233_v12 = vpop.f32.mrb[26].mxu1 }
 0x54b   : > { %v2238_v13 = vpack.c.bf16 %v2233_v12, %v2229_v10  ;;  %v2235_v14 = vpop.f32.mrb[27].mxu1  ;;  %v7470_v10 = vld [vmem:[%s8427_s30 + $0x10] sm:$0xff]  }
 0x54c   : > { %v2239_v15 = vpack.c.bf16 %v2235_v14, %v2231_v11 }
 0x54e   : > { %6135 = vmatprep.mubr.msk.bf16.mxu0 %vm1311_vm6, %v2239_v15 }
 0x54f   : > { %2521 = vmatmul.mubr.bf16.vlgmr.msra.gmra.mrb[32].mxu0 %v2238_v13 }
 0x550   : > { %v2303_v16 = vpop.f32.mrb[28].mxu1  ;;  %6881 = vmatprep.mubr.msk.bf16.mxu0 %vm2727_vm9, %v7464_v54 }
 0x551   : > { %v2305_v17 = vpop.f32.mrb[29].mxu1 }
 0x552   : > { %v2307_v18 = vpop.f32.mrb[30].mxu1 }
 0x553   : > { %v2312_v19 = vpack.c.bf16 %v2307_v18, %v2303_v16  ;;  %v2309_v20 = vpop.f32.mrb[31].mxu1 }
 0x554   : > { %v2313_v22 = vpack.c.bf16 %v2309_v20, %v2305_v17 }
 0x556   : > { %6125 = vmatprep.mubr.msk.bf16.mxu1 %vm1311_vm6, %v2313_v22 }
 0x557   : > { %2423 = vmatmul.mubr.bf16.vlgmr.msra.gmra.mrb[32].mxu1 %v2312_v19 }
 0x558   : > { %2541 = vmatpush1.bf16.msra.mxu1 %v8357_v45  ;;  %2572 = vmatprep.mubr.bf16.mxu1 %v7823_v5 }
 0x559   : > { %6137 = vmatprep.subr.msk.bf16.mxu1 %vm2188_vm7, %v8360_v58 }
 0x55c   : > { %2543 = vmatpush1.bf16.msra.mxu1 %v8363_v59 }
 0x55d   : > { %2661 = vmatprep.subr.bf16.mxu1 %v7823_v5 }
 0x55f   : > { %6138 = vmatmul.mubr.msk.bf16.vlgmr.msra.gmra.mrb[36].mxu1 %vm2184_vm8, %v7451_v23  ;;  %v7471_v23 = vld [vmem:[%s9092_s11 + $0x18] sm:$0xff]  }
 0x560   : > { %2662 = vmatpush1.bf16.msra.mxu1 %v7452_v24 }
 0x561   : > { %2663 = vmatprep.subr.bf16.mxu1 %v7823_v5 }
 0x564   : > { %2664 = vmatpush1.bf16.msra.mxu1 %v7453_v26  ;;  %v7472_v26 = vld [vmem:[%s9092_s11 + $0x20] ss:$0 sps:$4 sm:$0x33]  }
 0x565   : > { %2665 = vmatprep.subr.bf16.mxu1 %v7823_v5 }
 0x568   : > { %2666 = vmatpush1.bf16.msra.mxu1 %v7454_v27  ;;  %v7473_v27 = vld [vmem:[%s8427_s30 + $0x30] sm:$0xff]  }
 0x569   : > { %2667 = vmatprep.subr.bf16.mxu1 %v7823_v5 }
 0x56c   : > { %2668 = vmatpush1.bf16.msra.mxu1 %v7455_v28  ;;  %v7474_v28 = vld [vmem:[%s8427_s30 + $0x38] sm:$0xff]  }
 0x56d   : > { %2669 = vmatprep.subr.bf16.mxu1 %v7823_v5 }
 0x570   : > { %2670 = vmatpush1.bf16.msra.mxu1 %v7456_v30  ;;  %v7475_v30 = vld [vmem:[%s8427_s30 + $0x40] sm:$0xff]   ;;  %s7278_s30 = smul.u32 600, %s9163_s3 }
 0x571   : > { %2671 = vmatprep.subr.bf16.mxu1 %v7823_v5 }
 0x572   : > { %s8482_s5 = scalar_lea.vmem %s9150_s2, %s7278_s30 }
 0x574   : > { %2672 = vmatpush1.bf16.msra.mxu1 %v7457_v31 }
 0x575   : > { %2673 = vmatprep.subr.bf16.mxu1 %v7823_v5 }
 0x578   : > { %2674 = vmatpush1.bf16.msra.mxu1 %v7458_v32 }
 0x579   : > { %2675 = vmatprep.subr.bf16.mxu1 %v7823_v5 }
 0x57c   : > { %2676 = vmatpush1.bf16.msra.mxu1 %v7459_v33 }
 0x57d   : > { %2677 = vmatprep.subr.bf16.mxu1 %v7823_v5 }
 0x580   : > { %2678 = vmatpush1.bf16.msra.mxu1 %v7460_v34 }
 0x581   : > { %6891 = vmatprep.subr.bf16.mxu1 %v7461_v51 }
 0x622   : > { %v2522_v35 = vpop.f32.mrb[32].mxu0 }
 0x623   : > { %v2524_v36 = vpop.f32.mrb[33].mxu0 }
 0x624   : > { %v2525_v37 = vpop.f32.mrb[34].mxu0 }
 0x625   : > { %v2527_v38 = vpop.f32.mrb[35].mxu0 }
 0x62a   : > { %v2424_v39 = vpop.f32.mrb[32].mxu1 }
 0x62b   : > { %v2523_v40 = vadd.f32 %v2522_v35, %v2424_v39  ;;  %v2426_v41 = vpop.f32.mrb[33].mxu1 }
 0x62c   : > { %v2427_v42 = vpop.f32.mrb[34].mxu1 }
 0x62d   : > { %v2526_v43 = vadd.f32 %v2525_v37, %v2427_v42  ;;  %v2429_v44 = vpop.f32.mrb[35].mxu1 }
 0x632   : > { %v2574_v45 = vpop.f32.mrb[36].mxu1 }
 0x633   : > { %v2576_v46 = vpop.f32.mrb[37].mxu1 }
 0x634   : > { %v2578_v47 = vpop.f32.mrb[38].mxu1 }
 0x635   : > { %v2583_v48 = vpack.c.bf16 %v2578_v47, %v2574_v45  ;;  %v2580_v49 = vpop.f32.mrb[39].mxu1 }
 0x636   : > { %v2584_v50 = vpack.c.bf16 %v2580_v49, %v2576_v46 }
 0x638   : > { %6166 = vmatprep.mubr.msk.bf16.mxu1 %vm1311_vm6, %v2584_v50  ;;  %v6213_v50 = vld [vmem:[%s890_s10] ss:$0 sm:$0xff]  ;;  %s9153_s10 = sld [smem:[#allocation27_spill]] }
 0x639   : > { %2694 = vmatmul.mubr.bf16.vlgmr.msra.gmra.mrb[40].mxu1 %v2583_v48  ;;  %v7824_v48 = vmov 0.0  }
 0x63a   : > { %6892 = vmatpush3.bf16.msra.mxu1 %v7461_v51 }
 0x63b   : > { %6893 = vmatprep.subr.bf16.mxu1 %v7462_v52 }
 0x63e   : > { %6894 = vmatpush3.bf16.msra.mxu1 %v7462_v52 }
 0x63f   : > { %6895 = vmatprep.subr.bf16.mxu1 %v7463_v53 }
 0x642   : > { %6896 = vmatpush3.bf16.msra.mxu1 %v7463_v53 }
 0x70c   : > { %v2695_v55 = vpop.f32.mrb[40].mxu1 }
 0x70d   : > { %v2702_v57 = vadd.f32 %v2695_v55, %v2523_v40  ;;  %v2697_v58 = vpop.f32.mrb[41].mxu1 }
 0x70e   : > { %v2698_v59 = vpop.f32.mrb[42].mxu1 }
 0x70f   : > { %v2711_v60 = vadd.f32 %v6167_v56, %v2702_v57  ;;  %v2703_v61 = vadd.f32 %v2698_v59, %v2526_v43  ;;  %v2700_v62 = vpop.f32.mrb[43].mxu1 }
 0x711   : > { %v2712_v63 = vadd.f32 %v6167_v56, %v2703_v61  ;;  %v2713_v0 = vmax.f32 %v2711_v60, 0.0 }
 0x713   : > { %v2714_v1 = vmax.f32 %v2712_v63, 0.0 }
 0x715   : > { %v2715_v2 = vpack.c.bf16 %v2714_v1, %v2713_v0  ;;  %v7484_v1 = vld [vmem:[%s8482_s5 + $0x7c] ss:$12 sps:$4 sm:$0xff]  }
 0x717   : > { %7269 = vmatprep.subr.msk.bf16.mxu0 %vm2734_vm10, %v2715_v2  ;;  %7271 = vmatprep.subr.msk.bf16.mxu1 %vm2734_vm10, %v2715_v2  ;;  %v2736_v3 = vsel %vm2734_vm10, %v2715_v2, 0 }
 0x718   : > { %6880 = vmatpush3.bf16.msra.mxu0 %v2736_v3 }
 0x719   : > { %7270 = vmatprep.subr.msk.bf16.mxu0 %vm2734_vm10, %v2715_v2 }
 0x71b   : > { %6882 = vmatmul.mubr.msk.bf16.vlgmr.msra.gmra.mrb[36].mxu0 %vm2727_vm9, %v7465_v4  ;;  %v7479_v4 = vld [vmem:[%s9152_s0] sm:$0xff]  }
 0x71c   : > { %6886 = vmatpush3.bf16.msra.mxu0 %v2736_v3  ;;  %6887 = vmatprep.mubr.msk.bf16.mxu0 %vm2727_vm9, %v7466_v6  ;;  %v7482_v6 = vld [vmem:[%s8482_s5 + $0x78] ss:$12 sps:$4 sm:$0xff]  }
 0x71d   : > { %6901 = vmatprep.subr.bf16.mxu0 %v7468_v7 }
 0x723   : > { %6888 = vmatmul.mubr.msk.bf16.vlgmr.msra.gmra.mrb[40].mxu0 %vm2727_vm9, %v7467_v8  ;;  %v7488_v8 = vld [vmem:[%s8482_s5 + $0x94] ss:$12 sps:$4 sm:$0xff]  }
 0x724   : > { %6902 = vmatpush3.bf16.msra.mxu0 %v7468_v7  ;;  %v7485_v7 = vld [vmem:[%s8482_s5 + $0x80] ss:$12 sps:$4 sm:$0xff]  }
 0x725   : > { %6903 = vmatprep.subr.bf16.mxu0 %v7469_v9 }
 0x728   : > { %6904 = vmatpush3.bf16.msra.mxu0 %v7469_v9  ;;  %v7486_v9 = vld [vmem:[%s8482_s5 + $0x90] ss:$12 sps:$4 sm:$0xff]  }
 0x729   : > { %6905 = vmatprep.subr.bf16.mxu0 %v7470_v10 }
 0x72c   : > { %6906 = vmatpush3.bf16.msra.mxu0 %v7470_v10  ;;  %v7489_v10 = vld [vmem:[%s8482_s5 + $0x98] ss:$12 sps:$4 sm:$0xff]  }
 0x72d   : > { %6917 = vmatprep.subr.bf16.mxu0 %v7473_v27 }
 0x7ee   : > { %v6883_v11 = vpop.f32.mrb[36].mxu0 }
 0x7ef   : > { %v2772_v12 = vpop.f32.mrb[37].mxu0  ;;  %v2787_v16 = vpack.c.bf16 %v6883_v11, %v6883_v11  ;;  %v7492_v11 = vld [vmem:[%s8482_s5 + $0xac] ss:$12 sps:$4 sm:$0xff]  }
 0x7f0   : > { %v6884_v13 = vpop.f32.mrb[38].mxu0 }
 0x7f1   : > { %v2775_v14 = vpop.f32.mrb[39].mxu0  ;;  %v7480_v13 = vld [vmem:[%s9152_s0 + $0x8] sm:$0xff]  }
 0x7f2   : > { %v2786_v15 = vpack.c.bf16 %v2775_v14, %v2772_v12  ;;  %v7477_v12 = vld [vmem:[%s9152_s0 + $0x1c] sm:$0xff]   ;;  %v7490_v14 = vld [vmem:[%s8482_s5 + $0xa8] ss:$12 sps:$4 sm:$0xff]  }
 0x7f4   : > { %6907 = vmatprep.mubr.msk.bf16.mxu0 %vm926_vm0, %v2786_v15  ;;  %v7493_v15 = vld [vmem:[%s8482_s5 + $0xb0] ss:$12 sps:$4 sm:$0xff]  }
 0x7f5   : > { %6908 = vmatmul.mubr.msk.bf16.vlgmr.msra.gmra.mrb[44].mxu0 %vm926_vm0, %v2787_v16  ;;  %v7496_v16 = vld [vmem:[%s8482_s5 + $0xc4] ss:$12 sps:$4 sm:$0xff]  }
 0x7f6   : > { %v6889_v17 = vpop.f32.mrb[40].mxu0  ;;  %6918 = vmatpush3.bf16.msra.mxu0 %v7473_v27 }
 0x7f7   : > { %v2846_v18 = vpop.f32.mrb[41].mxu0  ;;  %v2861_v24 = vpack.c.bf16 %v6889_v17, %v6889_v17  ;;  %6919 = vmatprep.subr.bf16.mxu0 %v7474_v28  ;;  %v7494_v17 = vld [vmem:[%s8482_s5 + $0xc0] ss:$12 sps:$4 sm:$0xff]  }
 0x7f8   : > { %v6890_v19 = vpop.f32.mrb[42].mxu0 }
 0x7f9   : > { %v2849_v20 = vpop.f32.mrb[43].mxu0  ;;  %v7478_v19 = vld [vmem:[%s9152_s0 + $0x24] ss:$0 sps:$4 sm:$0x33]  }
 0x7fa   : > { %v2860_v22 = vpack.c.bf16 %v2849_v20, %v2846_v18  ;;  %6920 = vmatpush3.bf16.msra.mxu0 %v7474_v28  ;;  %v7497_v18 = vld [vmem:[%s8482_s5 + $0xc8] ss:$12 sps:$4 sm:$0xff]   ;;  %v7481_v20 = vld [vmem:[%s9152_s0 + $0x10] ss:$0 sps:$4 sm:$0x33]  }
 0x7fb   : > { %6921 = vmatprep.subr.bf16.mxu0 %v7475_v30 }
 0x7fc   : > { %6897 = vmatprep.mubr.msk.bf16.mxu1 %vm926_vm0, %v2860_v22  ;;  %v7500_v22 = vld [vmem:[%s8482_s5 + $0xdc] ss:$12 sps:$4 sm:$0xff]  }
 0x7fd   : > { %6898 = vmatmul.mubr.msk.bf16.vlgmr.msra.gmra.mrb[44].mxu1 %vm926_vm0, %v2861_v24  ;;  %v7501_v24 = vld [vmem:[%s8482_s5 + $0xe0] ss:$12 sps:$4 sm:$0xff]  }
 0x7fe   : > { %6912 = vmatpush3.bf16.msra.mxu1 %v2736_v3  ;;  %6913 = vmatprep.mubr.msk.bf16.mxu1 %vm2727_vm9, %v7471_v23  ;;  %v7476_v3 = vld [vmem:[%s9152_s0 + $0x14] sm:$0xff]  }
 0x7ff   : > { %6922 = vmatpush3.bf16.msra.mxu0 %v7475_v30  ;;  %6927 = vmatprep.subr.bf16.mxu1 %v7824_v48  ;;  %v7498_v23 = vld [vmem:[%s8482_s5 + $0xd8] ss:$12 sps:$4 sm:$0xff]  }
 0x800   : > { %6943 = vmatprep.subr.bf16.mxu0 %v7824_v48 }
 0x805   : > { %6914 = vmatmul.mubr.msk.bf16.vlgmr.msra.gmra.mrb[48].mxu1 %vm2727_vm9, %v7472_v26  ;;  %v7504_v26 = vld [vmem:[%s8482_s5 + $0x4] ss:$12 sps:$4 sm:$0xff]  }
 0x806   : > { %6931 = vmatprep.mubr.msk.bf16.mxu1 %vm7825_vm11, %v7824_v48 }
 0x8c8   : > { %v6909_v31 = vpop.f32.mrb[44].mxu0 }
 0x8c9   : > { %v2999_v32 = vpop.f32.mrb[45].mxu0 }
 0x8ca   : > { %v6910_v33 = vpop.f32.mrb[46].mxu0 }
 0x8cb   : > { %v3002_v34 = vpop.f32.mrb[47].mxu0  ;;  %v7502_v33 = vld [vmem:[%s8482_s5] ss:$12 sps:$4 sm:$0xff]  }
 0x8d0   : > { %v6899_v35 = vpop.f32.mrb[44].mxu1 }
 0x8d1   : > { %v3008_v36 = vadd.f32 %v6909_v31, %v6899_v35  ;;  %v2927_v37 = vpop.f32.mrb[45].mxu1 }
 0x8d2   : > { %v3000_v38 = vadd.f32 %v2999_v32, %v2927_v37  ;;  %v6900_v39 = vpop.f32.mrb[46].mxu1 }
 0x8d3   : > { %v2930_v40 = vpop.f32.mrb[47].mxu1 }
 0x8d4   : > { %v3003_v41 = vadd.f32 %v3002_v34, %v2930_v40  ;;  %v7505_v34 = vld [vmem:[%s8482_s5 + $0x8] ss:$12 sps:$4 sm:$0xff]  }
 0x8d5   : > { %v7508_v40 = vld [vmem:[%s8482_s5 + $0x1c] ss:$12 sps:$4 sm:$0xff]  }
 0x8d8   : > { %v6915_v42 = vpop.f32.mrb[48].mxu1 }
 0x8d9   : > { %v3065_v43 = vpop.f32.mrb[49].mxu1  ;;  %v3080_v47 = vpack.c.bf16 %v6915_v42, %v6915_v42  ;;  %v7509_v42 = vld [vmem:[%s8482_s5 + $0x20] ss:$12 sps:$4 sm:$0xff]  }
 0x8da   : > { %v6916_v44 = vpop.f32.mrb[50].mxu1 }
 0x8db   : > { %v3068_v45 = vpop.f32.mrb[51].mxu1 }
 0x8dc   : > { %v3079_v46 = vpack.c.bf16 %v3068_v45, %v3065_v43  ;;  %v7512_v43 = vld [vmem:[%s8482_s5 + $0x34] ss:$12 sps:$4 sm:$0xff]  }
 0x8de   : > { %6923 = vmatprep.mubr.msk.bf16.mxu0 %vm926_vm0, %v3079_v46 }
 0x8df   : > { %6924 = vmatmul.mubr.msk.bf16.vlgmr.msra.gmra.mrb[48].mxu0 %vm926_vm0, %v3080_v47 }
 0x8e0   : > { %6947 = vmatprep.mubr.msk.bf16.mxu0 %vm7825_vm11, %v7824_v48 }
 0x9b2   : > { %v6925_v49 = vpop.f32.mrb[48].mxu0 }
 0x9b3   : > { %v3162_v51 = vadd.f32 %v6925_v49, %v3008_v36  ;;  %v3146_v52 = vpop.f32.mrb[49].mxu0 }
 0x9b4   : > { %v3160_v53 = vadd.f32 %v3146_v52, %v3000_v38  ;;  %v6926_v54 = vpop.f32.mrb[50].mxu0 }
 0x9b5   : > { %v3172_v55 = vadd.f32 %v6213_v50, %v3162_v51  ;;  %v3149_v56 = vpop.f32.mrb[51].mxu0  ;;  %v7513_v51 = vld [vmem:[%s8482_s5 + $0x38] ss:$12 sps:$4 sm:$0xff]  }
 0x9b6   : > { %v3170_v57 = vadd.f32 %v6213_v50, %v3160_v53  ;;  %v3161_v58 = vadd.f32 %v3149_v56, %v3003_v41  ;;  %v7506_v41 = vld [vmem:[%s8482_s5 + $0x18] ss:$12 sps:$4 sm:$0xff]  }
 0x9b7   : > { %v3175_v60 = vmax.f32 %v3172_v55, 0.0 }
 0x9b8   : > { %v3171_v59 = vadd.f32 %v6213_v50, %v3161_v58  ;;  %v3173_v61 = vmax.f32 %v3170_v57, 0.0  ;;  %v7510_v50 = vld [vmem:[%s8482_s5 + $0x30] ss:$12 sps:$4 sm:$0xff]   ;;  %v7516_v57 = vld [vmem:[%s8482_s5 + $0x4c] ss:$12 sps:$4 sm:$0xff]  }
 0x9b9   : > { %v3177_v0 = vpack.c.bf16 %v3175_v60, %v3175_v60  ;;  %v7514_v58 = vld [vmem:[%s8482_s5 + $0x48] ss:$12 sps:$4 sm:$0xff]   ;;  %v7520_v60 = vld [vmem:[%s8482_s5 + $0x64] ss:$12 sps:$4 sm:$0xff]  }
 0x9ba   : > { %v3174_v62 = vmax.f32 %v3171_v59, 0.0  ;;  %v7517_v59 = vld [vmem:[%s8482_s5 + $0x50] ss:$12 sps:$4 sm:$0xff]  }
 0x9bb   : > { %v8496_v2 = vsel %vm3206_vm12, %v3177_v0, 0 }
 0x9bc   : > { %v8488_v63 = vpack.c.bf16 %v3174_v62, %v3173_v61 }
 0x9be   : > { %6928 = vmatpush3.bf16.msra.mxu1 %v8488_v63  ;;  %6944 = vmatpush3.bf16.msra.mxu0 %v8488_v63 }
 0x9bf   : > { %6929 = vmatprep.subr.bf16.mxu1 %v7824_v48  ;;  %6945 = vmatprep.subr.bf16.mxu0 %v7824_v48 }
 0x9c2   : > { %6930 = vmatpush3.bf16.msra.mxu1 %v8496_v2  ;;  %6946 = vmatpush3.bf16.msra.mxu0 %v8496_v2 }
 0x9c3   : > { %3487 = vmatprep.subr.bf16.mxu1 %v7484_v1  ;;  %6959 = vmatprep.subr.bf16.mxu0 %v7824_v48 }
 0x9c5   : > { %6948 = vmatmul.mubr.msk.bf16.vlgmr.msra.gmra.mrb[52].mxu0 %vm3196_vm13, %v7476_v3  ;;  %6932 = vmatmul.mubr.msk.bf16.vlgmr.msra.gmra.mrb[52].mxu1 %vm3196_vm13, %v7479_v4 }
 0x9c6   : > { %6951 = vmatprep.mubr.msk.bf16.mxu0 %vm7825_vm11, %v7824_v48  ;;  %6935 = vmatprep.mubr.msk.bf16.mxu1 %vm7825_vm11, %v7824_v48 }
 0x9c7   : > { %3488 = vmatpush1.bf16.msra.mxu1 %v7482_v6  ;;  %6960 = vmatpush3.bf16.msra.mxu0 %v7485_v7  ;;  %v7518_v6 = vld [vmem:[%s8482_s5 + $0x60] ss:$12 sps:$4 sm:$0xff]   ;;  %v7521_v7 = vld [vmem:[%s8482_s5 + $0x68] ss:$12 sps:$4 sm:$0xff]  }
 0x9c8   : > { %3489 = vmatprep.subr.bf16.mxu1 %v7488_v8  ;;  %6961 = vmatprep.subr.bf16.mxu0 %v7824_v48 }
 0x9cb   : > { %3490 = vmatpush1.bf16.msra.mxu1 %v7486_v9  ;;  %6962 = vmatpush3.bf16.msra.mxu0 %v7489_v10 }
 0x9cc   : > { %3491 = vmatprep.subr.bf16.mxu1 %v7492_v11  ;;  %6963 = vmatprep.subr.bf16.mxu0 %v7824_v48 }
 0x9cd   : > { %6952 = vmatmul.mubr.msk.bf16.gmra.mrb[56].mxu0 %vm3196_vm13, %v7477_v12  ;;  %6936 = vmatmul.mubr.msk.bf16.gmra.mrb[56].mxu1 %vm3196_vm13, %v7480_v13  ;;  %v7522_v12 = vld [vmem:[%s9152_s0 + $0x28] sm:$0xff]   ;;  %v7523_v13 = vld [vmem:[%s9152_s0 + $0x30] sm:$0xff]  }
 0x9ce   : > { %6955 = vmatprep.mubr.msk.bf16.mxu0 %vm7825_vm11, %v7824_v48  ;;  %6939 = vmatprep.mubr.msk.bf16.mxu1 %vm7825_vm11, %v7824_v48 }
 0x9cf   : > { %3492 = vmatpush1.bf16.msra.mxu1 %v7490_v14  ;;  %6964 = vmatpush3.bf16.msra.mxu0 %v7493_v15  ;;  %v7524_v14 = vld [vmem:[%s9152_s0 + $0x38] ss:$0 sps:$4 sm:$0x33]   ;;  %v7527_v15 = vld [vmem:[%s8482_s5 + $0xf4] ss:$12 sps:$4 sm:$0xff]  }
 0x9d0   : > { %3493 = vmatprep.subr.bf16.mxu1 %v7496_v16  ;;  %6965 = vmatprep.subr.bf16.mxu0 %v7824_v48  ;;  %v7528_v16 = vld [vmem:[%s8482_s5 + $0xf8] ss:$12 sps:$4 sm:$0xff]  }
 0x9d3   : > { %3494 = vmatpush1.bf16.msra.mxu1 %v7494_v17  ;;  %6966 = vmatpush3.bf16.msra.mxu0 %v7497_v18  ;;  %v7525_v17 = vld [vmem:[%s8482_s5 + $0xf0] ss:$12 sps:$4 sm:$0xff]   ;;  %v7529_v18 = vld [vmem:[%s8482_s5 + $0x108] ss:$12 sps:$4 sm:$0xff]  }
 0x9d4   : > { %6967 = vmatprep.subr.bf16.mxu0 %v7824_v48  ;;  %3495 = vmatprep.subr.bf16.mxu1 %v7500_v22  ;;  %v7535_v22 = vld [vmem:[%s8482_s5 + $0x124] ss:$12 sps:$4 sm:$0xff]  }
 0x9d5   : > { %6956 = vmatmul.mubr.msk.bf16.gmra.mrb[60].mxu0 %vm3196_vm13, %v7478_v19  ;;  %6940 = vmatmul.mubr.msk.bf16.gmra.mrb[60].mxu1 %vm3196_vm13, %v7481_v20  ;;  %v7531_v19 = vld [vmem:[%s8482_s5 + $0x10c] ss:$12 sps:$4 sm:$0xff]   ;;  %v7532_v20 = vld [vmem:[%s8482_s5 + $0x110] ss:$12 sps:$4 sm:$0xff]  }
 0x9d6   : > { %3519 = vmatprep.mubr.bf16.mxu1 %v7823_v5  ;;  %6969 = vmatprep.mubr.msk.bf16.mxu0 %vm7825_vm11, %v7824_v48 }
 0x9d7   : > { %3496 = vmatpush1.bf16.msra.mxu1 %v7498_v23  ;;  %6968 = vmatpush3.bf16.msra.mxu0 %v7501_v24  ;;  %v7536_v23 = vld [vmem:[%s8482_s5 + $0x128] ss:$12 sps:$4 sm:$0xff]   ;;  %v7533_v24 = vld [vmem:[%s8482_s5 + $0x120] ss:$12 sps:$4 sm:$0xff]  }
 0x9d8   : > { %6981 = vmatprep.subr.bf16.mxu0 %v7824_v48  ;;  %3693 = vmatprep.subr.bf16.mxu1 %v7504_v26  ;;  %v7537_v26 = vld [vmem:[%s8482_s5 + $0x138] ss:$12 sps:$4 sm:$0xff]  }
 0xa98   : > { %v3351_v27 = vpop.f32.mrb[52].mxu0  ;;  %v3244_v28 = vpop.f32.mrb[52].mxu1 }
 0xa99   : > { %v6949_v30 = vpop.f32.mrb[53].mxu0  ;;  %v6933_v31 = vpop.f32.mrb[53].mxu1 }
 0xa9a   : > { %v3354_v32 = vpop.f32.mrb[54].mxu0  ;;  %v3247_v35 = vpop.f32.mrb[54].mxu1  ;;  %v7543_v30 = vld [vmem:[%s8482_s5 + $0x154] ss:$12 sps:$4 sm:$0xff]   ;;  %v7544_v31 = vld [vmem:[%s8482_s5 + $0x158] ss:$12 sps:$4 sm:$0xff]  }
 0xa9b   : > { %v3373_v36 = vpack.c.bf16 %v3354_v32, %v3351_v27  ;;  %v6950_v37 = vpop.f32.mrb[55].mxu0  ;;  %v8558_v38 = vpack.c.bf16 %v3247_v35, %v3244_v28  ;;  %v6934_v39 = vpop.f32.mrb[55].mxu1  ;;  %v7539_v27 = vld [vmem:[%s8482_s5 + $0x13c] ss:$12 sps:$4 sm:$0xff]   ;;  %v7540_v28 = vld [vmem:[%s8482_s5 + $0x140] ss:$12 sps:$4 sm:$0xff]  }
 0xa9c   : > { %v7541_v32 = vld [vmem:[%s8482_s5 + $0x150] ss:$12 sps:$4 sm:$0xff]  }
 0xa9d   : > { %6266 = vmatmul.mubr.msk.bf16.vlgmr.msra.gmra.mrb[64].mxu1 %vm3477_vm14, %v3373_v36  ;;  %6970 = vmatmul.mubr.msk.bf16.vlgmr.msra.gmra.mrb[64].mxu0 %vm3477_vm14, %v3373_v36 }
 0xa9e   : > { %3694 = vmatpush1.bf16.msra.mxu1 %v7502_v33  ;;  %6982 = vmatpush3.bf16.msra.mxu0 %v7505_v34 }
 0xa9f   : > { %3529 = vmatprep.mubr.bf16.mxu1 %v7823_v5  ;;  %6973 = vmatprep.mubr.msk.bf16.mxu0 %vm7825_vm11, %v7824_v48 }
 0xaa0   : > { %v3359_v44 = vpop.f32.mrb[56].mxu0  ;;  %3695 = vmatprep.subr.bf16.mxu1 %v7508_v40  ;;  %6983 = vmatprep.subr.bf16.mxu0 %v7824_v48  ;;  %v3252_v45 = vpop.f32.mrb[56].mxu1 }
 0xaa1   : > { %v6953_v46 = vpop.f32.mrb[57].mxu0  ;;  %v6937_v47 = vpop.f32.mrb[57].mxu1 }
 0xaa2   : > { %v3362_v49 = vpop.f32.mrb[58].mxu0  ;;  %3696 = vmatpush1.bf16.msra.mxu1 %v7506_v41  ;;  %6984 = vmatpush3.bf16.msra.mxu0 %v7509_v42  ;;  %v3255_v52 = vpop.f32.mrb[58].mxu1 }
 0xaa3   : > { %v3374_v53 = vpack.c.bf16 %v3362_v49, %v3359_v44  ;;  %v6954_v54 = vpop.f32.mrb[59].mxu0  ;;  %3697 = vmatprep.subr.bf16.mxu1 %v7512_v43  ;;  %6985 = vmatprep.subr.bf16.mxu0 %v7824_v48  ;;  %v3267_v55 = vpack.c.bf16 %v3255_v52, %v3252_v45  ;;  %v6938_v56 = vpop.f32.mrb[59].mxu1 }
 0xaa5   : > { %6267 = vmatmul.mubr.msk.bf16.gmra.mrb[68].mxu1 %vm3477_vm14, %v3374_v53  ;;  %6974 = vmatmul.mubr.msk.bf16.gmra.mrb[68].mxu0 %vm3477_vm14, %v3374_v53 }
 0xaa6   : > { %3698 = vmatpush1.bf16.msra.mxu1 %v7510_v50  ;;  %6986 = vmatpush3.bf16.msra.mxu0 %v7513_v51 }
 0xaa7   : > { %3539 = vmatprep.mubr.bf16.mxu1 %v7823_v5  ;;  %6977 = vmatprep.mubr.msk.bf16.mxu0 %vm7825_vm11, %v7824_v48 }
 0xaa8   : > { %v3367_v61 = vpop.f32.mrb[60].mxu0  ;;  %3699 = vmatprep.subr.bf16.mxu1 %v7516_v57  ;;  %6987 = vmatprep.subr.bf16.mxu0 %v7824_v48  ;;  %v3260_v62 = vpop.f32.mrb[60].mxu1 }
 0xaa9   : > { %v3375_v0 = vpack.c.bf16 %v3367_v61, %v3367_v61  ;;  %v6957_v1 = vpop.f32.mrb[61].mxu0  ;;  %v6941_v3 = vpop.f32.mrb[61].mxu1  ;;  %v3268_v11 = vpack.c.bf16 %v3260_v62, %v3260_v62 }
 0xaaa   : > { %v3370_v4 = vpop.f32.mrb[62].mxu0  ;;  %3700 = vmatpush1.bf16.msra.mxu1 %v7514_v58  ;;  %6988 = vmatpush3.bf16.msra.mxu0 %v7517_v59  ;;  %v3263_v8 = vpop.f32.mrb[62].mxu1 }
 0xaab   : > { %v6958_v9 = vpop.f32.mrb[63].mxu0  ;;  %3701 = vmatprep.subr.bf16.mxu1 %v7520_v60  ;;  %6989 = vmatprep.subr.bf16.mxu0 %v7824_v48  ;;  %v6942_v10 = vpop.f32.mrb[63].mxu1 }
 0xaad   : > { %6268 = vmatmul.mubr.msk.bf16.gmra.mrb[72].mxu1 %vm3477_vm14, %v3375_v0  ;;  %6978 = vmatmul.mubr.msk.bf16.gmra.mrb[72].mxu0 %vm3477_vm14, %v3375_v0 }
 0xaae   : > { %3702 = vmatpush1.bf16.msra.mxu1 %v7518_v6  ;;  %6990 = vmatpush3.bf16.msra.mxu0 %v7521_v7 }
 0xaaf   : > { %3725 = vmatprep.mubr.bf16.mxu1 %v7823_v5  ;;  %6991 = vmatprep.mubr.msk.bf16.mxu0 %vm7825_vm11, %v7824_v48 }
 0xab0   : > { %7003 = vmatprep.subr.bf16.mxu1 %v7824_v48  ;;  %7019 = vmatprep.subr.bf16.mxu0 %v7824_v48 }
 0xab5   : > { %6287 = vmatmul.mubr.msk.bf16.vlgmr.msra.gmra.mrb[64].mxu1 %vm3477_vm14, %v8558_v38  ;;  %6992 = vmatmul.mubr.msk.bf16.vlgmr.msra.gmra.mrb[76].mxu0 %vm3477_vm14, %v8558_v38 }
 0xab6   : > { %7004 = vmatpush3.bf16.msra.mxu1 %v8488_v63  ;;  %3735 = vmatprep.mubr.bf16.mxu1 %v7823_v5 }
 0xab7   : > { %7005 = vmatprep.subr.bf16.mxu1 %v7824_v48  ;;  %6995 = vmatprep.mubr.msk.bf16.mxu0 %vm7825_vm11, %v7824_v48 }
 0xab8   : > { %7020 = vmatpush3.bf16.msra.mxu0 %v7528_v16 }
 0xab9   : > { %7021 = vmatprep.subr.bf16.mxu0 %v7824_v48 }
 0xaba   : > { %7006 = vmatpush3.bf16.msra.mxu1 %v8496_v2 }
 0xabb   : > { %4007 = vmatprep.subr.bf16.mxu1 %v7527_v15 }
 0xabc   : > { %7022 = vmatpush3.bf16.msra.mxu0 %v7532_v20 }
 0xabd   : > { %6288 = vmatmul.mubr.msk.bf16.gmra.mrb[68].mxu1 %vm3477_vm14, %v3267_v55  ;;  %6996 = vmatmul.mubr.msk.bf16.gmra.mrb[80].mxu0 %vm3477_vm14, %v3267_v55 }
 0xabe   : > { %3745 = vmatprep.mubr.bf16.mxu1 %v7823_v5  ;;  %6999 = vmatprep.mubr.msk.bf16.mxu0 %vm7825_vm11, %v7824_v48 }
 0xabf   : > { %7023 = vmatprep.subr.bf16.mxu0 %v7824_v48 }
 0xac0   : > { %7024 = vmatpush3.bf16.msra.mxu0 %v7536_v23 }
 0xac1   : > { %7025 = vmatprep.subr.bf16.mxu0 %v7824_v48 }
 0xac4   : > { %7026 = vmatpush3.bf16.msra.mxu0 %v7540_v28 }
 0xac5   : > { %6289 = vmatmul.mubr.msk.bf16.gmra.mrb[76].mxu1 %vm3477_vm14, %v3268_v11  ;;  %7000 = vmatmul.mubr.msk.bf16.gmra.mrb[84].mxu0 %vm3477_vm14, %v3268_v11 }
 0xac6   : > { %7007 = vmatprep.mubr.msk.bf16.mxu1 %vm7825_vm11, %v7824_v48  ;;  %7029 = vmatprep.mubr.msk.bf16.mxu0 %vm7825_vm11, %v7824_v48 }
 0xac7   : > { %7027 = vmatprep.subr.bf16.mxu0 %v7824_v48 }
 0xac8   : > { %7028 = vmatpush3.bf16.msra.mxu0 %v7544_v31  ;;  %v7546_v31 = vld [vmem:[%s9152_s0 + $0x44] sm:$0xff]  }
 0xac9   : > { %7041 = vmatprep.subr.bf16.mxu0 %v7824_v48 }
 0xacd   : > { %7008 = vmatmul.mubr.msk.bf16.vlgmr.msra.gmra.mrb[80].mxu1 %vm3196_vm13, %v7522_v12 }
 0xace   : > { %7011 = vmatprep.mubr.msk.bf16.mxu1 %vm7825_vm11, %v7824_v48  ;;  %4008 = vmatpush1.bf16.msra.mxu1 %v7525_v17 }
 0xacf   : > { %4009 = vmatprep.subr.bf16.mxu1 %v7531_v19 }
 0xad2   : > { %4010 = vmatpush1.bf16.msra.mxu1 %v7529_v18 }
 0xad3   : > { %4011 = vmatprep.subr.bf16.mxu1 %v7535_v22 }
 0xad5   : > { %7012 = vmatmul.mubr.msk.bf16.gmra.mrb[84].mxu1 %vm3196_vm13, %v7523_v13 }
 0xad6   : > { %7015 = vmatprep.mubr.msk.bf16.mxu1 %vm7825_vm11, %v7824_v48  ;;  %4012 = vmatpush1.bf16.msra.mxu1 %v7533_v24 }
 0xad7   : > { %4013 = vmatprep.subr.bf16.mxu1 %v7539_v27 }
 0xada   : > { %4014 = vmatpush1.bf16.msra.mxu1 %v7537_v26 }
 0xadb   : > { %4015 = vmatprep.subr.bf16.mxu1 %v7543_v30  ;;  %v7545_v30 = vld [vmem:[%s9152_s0 + $0x3c] sm:$0xff]  }
 0xadd   : > { %7016 = vmatmul.mubr.msk.bf16.gmra.mrb[88].mxu1 %vm3196_vm13, %v7524_v14 }
 0xade   : > { %4039 = vmatprep.mubr.bf16.mxu1 %v7823_v5  ;;  %4016 = vmatpush1.bf16.msra.mxu1 %v7541_v32  ;;  %v7547_v32 = vld [vmem:[%s9152_s0 + $0x4c] ss:$0 sps:$4 sm:$0x33]  }
 0xb70   : > { %v3582_v33 = vpop.f32.mrb[64].mxu0 }
 0xb71   : > { %v6971_v34 = vpop.f32.mrb[65].mxu0 }
 0xb72   : > { %v3585_v35 = vpop.f32.mrb[66].mxu0  ;;  %v7548_v34 = vld [vmem:[%s8482_s5 + $0x168] ss:$12 sps:$4 sm:$0xff]  }
 0xb73   : > { %v6972_v36 = vpop.f32.mrb[67].mxu0 }
 0xb74   : > { %v7552_v36 = vld [vmem:[%s8482_s5 + $0x180] ss:$12 sps:$4 sm:$0xff]  }
 0xb78   : > { %v3590_v37 = vpop.f32.mrb[68].mxu0 }
 0xb79   : > { %v6975_v38 = vpop.f32.mrb[69].mxu0 }
 0xb7a   : > { %v3593_v39 = vpop.f32.mrb[70].mxu0  ;;  %v7555_v38 = vld [vmem:[%s8482_s5 + $0x188] ss:$12 sps:$4 sm:$0xff]  }
 0xb7b   : > { %v6976_v40 = vpop.f32.mrb[71].mxu0 }
 0xb7c   : > { %v7556_v40 = vld [vmem:[%s8482_s5 + $0x198] ss:$12 sps:$4 sm:$0xff]  }
 0xb80   : > { %v3541_v41 = vpop.f32.mrb[72].mxu1  ;;  %v3598_v42 = vpop.f32.mrb[72].mxu0 }
 0xb81   : > { %v3543_v43 = vpop.f32.mrb[73].mxu1  ;;  %v6979_v44 = vpop.f32.mrb[73].mxu0 }
 0xb82   : > { %v3545_v45 = vpop.f32.mrb[74].mxu1  ;;  %v3601_v46 = vpop.f32.mrb[74].mxu0  ;;  %v7563_v44 = vld [vmem:[%s8482_s5 + $0x1b8] ss:$12 sps:$4 sm:$0xff]  }
 0xb83   : > { %v3546_v47 = vpop.f32.mrb[75].mxu1  ;;  %v6980_v49 = vpop.f32.mrb[75].mxu0  ;;  %v7566_v45 = vld [vmem:[%s8482_s5 + $0x1cc] ss:$12 sps:$4 sm:$0xff]   ;;  %v7564_v46 = vld [vmem:[%s8482_s5 + $0x1c8] ss:$12 sps:$4 sm:$0xff]  }
 0xb84   : > { %v7567_v47 = vld [vmem:[%s8482_s5 + $0x1d0] ss:$12 sps:$4 sm:$0xff]  }
 0xb88   : > { %v3788_v50 = vpop.f32.mrb[76].mxu0 }
 0xb89   : > { %v8651_v51 = vadd.f32 %v3788_v50, %v3582_v33  ;;  %v6993_v52 = vpop.f32.mrb[77].mxu0  ;;  %v7550_v33 = vld [vmem:[%s8482_s5 + $0x16c] ss:$12 sps:$4 sm:$0xff]  }
 0xb8a   : > { %v3791_v53 = vpop.f32.mrb[78].mxu0  ;;  %4336 = vmatprep.subr.bf16.mxu1 %v7550_v33  ;;  %v7575_v33 = vld [vmem:[%s8482_s5 + $0x1f8] ss:$12 sps:$4 sm:$0xff]  }
 0xb8b   : > { %v8653_v54 = vadd.f32 %v3791_v53, %v3585_v35  ;;  %v6994_v55 = vpop.f32.mrb[79].mxu0  ;;  %v7551_v35 = vld [vmem:[%s8482_s5 + $0x170] ss:$12 sps:$4 sm:$0xff]  }
 0xb90   : > { %v3796_v56 = vpop.f32.mrb[80].mxu0 }
 0xb91   : > { %v8655_v57 = vadd.f32 %v3796_v56, %v3590_v37  ;;  %v6997_v58 = vpop.f32.mrb[81].mxu0  ;;  %v7554_v37 = vld [vmem:[%s8482_s5 + $0x184] ss:$12 sps:$4 sm:$0xff]  }
 0xb92   : > { %v3799_v59 = vpop.f32.mrb[82].mxu0 }
 0xb93   : > { %v8657_v60 = vadd.f32 %v3799_v59, %v3593_v39  ;;  %v6998_v61 = vpop.f32.mrb[83].mxu0  ;;  %v7558_v39 = vld [vmem:[%s8482_s5 + $0x19c] ss:$12 sps:$4 sm:$0xff]  }
 0xb98   : > { %v3747_v62 = vpop.f32.mrb[76].mxu1  ;;  %v3804_v0 = vpop.f32.mrb[84].mxu0 }
 0xb99   : > { %v8659_v1 = vadd.f32 %v3747_v62, %v3541_v41  ;;  %v8661_v3 = vadd.f32 %v3804_v0, %v3598_v42  ;;  %v3749_v4 = vpop.f32.mrb[77].mxu1  ;;  %v7001_v6 = vpop.f32.mrb[85].mxu0  ;;  %v7559_v41 = vld [vmem:[%s8482_s5 + $0x1a0] ss:$12 sps:$4 sm:$0xff]   ;;  %v7560_v42 = vld [vmem:[%s8482_s5 + $0x1b0] ss:$12 sps:$4 sm:$0xff]  }
 0xb9a   : > { %v8663_v7 = vadd.f32 %v3749_v4, %v3543_v43  ;;  %v3751_v8 = vpop.f32.mrb[78].mxu1  ;;  %v3807_v9 = vpop.f32.mrb[86].mxu0  ;;  %v7562_v43 = vld [vmem:[%s8482_s5 + $0x1b4] ss:$12 sps:$4 sm:$0xff]  }
 0xb9b   : > { %v3752_v10 = vpop.f32.mrb[79].mxu1  ;;  %v7002_v11 = vpop.f32.mrb[87].mxu0 }
 0xba0   : > { %v3872_v12 = vpop.f32.mrb[80].mxu1 }
 0xba1   : > { %v7009_v13 = vpop.f32.mrb[81].mxu1 }
 0xba2   : > { %v3875_v14 = vpop.f32.mrb[82].mxu1 }
 0xba3   : > { %v3894_v15 = vpack.c.bf16 %v3875_v14, %v3872_v12  ;;  %v7010_v16 = vpop.f32.mrb[83].mxu1 }
 0xba5   : > { %6339 = vmatmul.mubr.msk.bf16.vlgmr.msra.gmra.mrb[64].mxu1 %vm3477_vm14, %v3894_v15  ;;  %7030 = vmatmul.mubr.msk.bf16.vlgmr.msra.gmra.mrb[88].mxu0 %vm3477_vm14, %v3894_v15 }
 0xba6   : > { %7042 = vmatpush3.bf16.msra.mxu0 %v8488_v63  ;;  %4049 = vmatprep.mubr.bf16.mxu1 %v7823_v5 }
 0xba7   : > { %7043 = vmatprep.subr.bf16.mxu0 %v7824_v48  ;;  %7033 = vmatprep.mubr.msk.bf16.mxu0 %vm7825_vm11, %v7824_v48 }
 0xba8   : > { %v3880_v17 = vpop.f32.mrb[84].mxu1  ;;  %4337 = vmatpush1.bf16.msra.mxu1 %v7548_v34  ;;  %v7577_v34 = vld [vmem:[%s8482_s5 + $0x1fc] ss:$12 sps:$4 sm:$0xff]  }
 0xba9   : > { %v7013_v18 = vpop.f32.mrb[85].mxu1  ;;  %4338 = vmatprep.subr.bf16.mxu1 %v7554_v37  ;;  %v7579_v37 = vld [vmem:[%s8482_s5 + $0x210] ss:$12 sps:$4 sm:$0xff]  }
 0xbaa   : > { %7044 = vmatpush3.bf16.msra.mxu0 %v8496_v2  ;;  %v3883_v19 = vpop.f32.mrb[86].mxu1 }
 0xbab   : > { %v3895_v20 = vpack.c.bf16 %v3883_v19, %v3880_v17  ;;  %v7014_v22 = vpop.f32.mrb[87].mxu1  ;;  %7057 = vmatprep.subr.bf16.mxu0 %v7824_v48 }
 0xbac   : > { %4339 = vmatpush1.bf16.msra.mxu1 %v7552_v36  ;;  %v7581_v36 = vld [vmem:[%s8482_s5 + $0x214] ss:$12 sps:$4 sm:$0xff]  }
 0xbad   : > { %6340 = vmatmul.mubr.msk.bf16.gmra.mrb[68].mxu1 %vm3477_vm14, %v3895_v20  ;;  %7034 = vmatmul.mubr.msk.bf16.gmra.mrb[92].mxu0 %vm3477_vm14, %v3895_v20 }
 0xbae   : > { %4059 = vmatprep.mubr.bf16.mxu1 %v7823_v5  ;;  %7037 = vmatprep.mubr.msk.bf16.mxu0 %vm7825_vm11, %v7824_v48 }
 0xbaf   : > { %4340 = vmatprep.subr.bf16.mxu1 %v7558_v39  ;;  %v7583_v39 = vld [vmem:[%s8482_s5 + $0x228] ss:$12 sps:$4 sm:$0xff]  }
 0xbb0   : > { %v3888_v23 = vpop.f32.mrb[88].mxu1  ;;  %4341 = vmatpush1.bf16.msra.mxu1 %v7556_v40  ;;  %v7585_v40 = vld [vmem:[%s8482_s5 + $0x22c] ss:$12 sps:$4 sm:$0xff]  }
 0xbb1   : > { %v3896_v24 = vpack.c.bf16 %v3888_v23, %v3888_v23  ;;  %v7017_v26 = vpop.f32.mrb[89].mxu1  ;;  %4342 = vmatprep.subr.bf16.mxu1 %v7562_v43  ;;  %v7587_v43 = vld [vmem:[%s8482_s5 + $0x240] ss:$12 sps:$4 sm:$0xff]  }
 0xbb2   : > { %v3891_v27 = vpop.f32.mrb[90].mxu1 }
 0xbb3   : > { %v7018_v28 = vpop.f32.mrb[91].mxu1  ;;  %v7569_v27 = vld [vmem:[%s9152_s0 + $0x58] sm:$0xff]  }
 0xbb4   : > { %4343 = vmatpush1.bf16.msra.mxu1 %v7560_v42  ;;  %v7570_v28 = vld [vmem:[%s9152_s0 + $0x60] ss:$0 sps:$4 sm:$0x33]   ;;  %v7589_v42 = vld [vmem:[%s8482_s5 + $0x244] ss:$12 sps:$4 sm:$0xff]  }
 0xbb5   : > { %6341 = vmatmul.mubr.msk.bf16.gmra.mrb[92].mxu1 %vm3477_vm14, %v3896_v24  ;;  %7038 = vmatmul.mubr.msk.bf16.gmra.mrb[96].mxu0 %vm3477_vm14, %v3896_v24 }
 0xbb6   : > { %7045 = vmatprep.mubr.msk.bf16.mxu0 %vm7825_vm11, %v7824_v48  ;;  %4368 = vmatprep.mubr.bf16.mxu1 %v7823_v5 }
 0xbb7   : > { %4344 = vmatprep.subr.bf16.mxu1 %v7566_v45 }
 0xbb8   : > { %4345 = vmatpush1.bf16.msra.mxu1 %v7564_v46 }
 0xbb9   : > { %7079 = vmatprep.subr.bf16.mxu1 %v7824_v48 }
 0xbbd   : > { %7046 = vmatmul.mubr.msk.bf16.vlgmr.msra.gmra.mrb[100].mxu0 %vm3196_vm13, %v7545_v30  ;;  %v7573_v30 = vld [vmem:[%s8482_s5 + $0x1e4] ss:$12 sps:$4 sm:$0xff]  }
 0xbbe   : > { %7049 = vmatprep.mubr.msk.bf16.mxu0 %vm7825_vm11, %v7824_v48  ;;  %7058 = vmatpush3.bf16.msra.mxu0 %v7551_v35  ;;  %v7578_v35 = vld [vmem:[%s8482_s5 + $0x200] ss:$12 sps:$4 sm:$0xff]  }
 0xbbf   : > { %7059 = vmatprep.subr.bf16.mxu0 %v7824_v48 }
 0xbc2   : > { %7060 = vmatpush3.bf16.msra.mxu0 %v7555_v38  ;;  %v7582_v38 = vld [vmem:[%s8482_s5 + $0x218] ss:$12 sps:$4 sm:$0xff]  }
 0xbc3   : > { %7061 = vmatprep.subr.bf16.mxu0 %v7824_v48 }
 0xbc5   : > { %7050 = vmatmul.mubr.msk.bf16.gmra.mrb[104].mxu0 %vm3196_vm13, %v7546_v31  ;;  %v7571_v31 = vld [vmem:[%s8482_s5 + $0x1e0] ss:$12 sps:$4 sm:$0xff]  }
 0xbc6   : > { %7053 = vmatprep.mubr.msk.bf16.mxu0 %vm7825_vm11, %v7824_v48  ;;  %7062 = vmatpush3.bf16.msra.mxu0 %v7559_v41  ;;  %v7586_v41 = vld [vmem:[%s8482_s5 + $0x230] ss:$12 sps:$4 sm:$0xff]  }
 0xbc7   : > { %7063 = vmatprep.subr.bf16.mxu0 %v7824_v48 }
 0xbca   : > { %7064 = vmatpush3.bf16.msra.mxu0 %v7563_v44  ;;  %v7590_v44 = vld [vmem:[%s8482_s5 + $0x248] ss:$12 sps:$4 sm:$0xff]  }
 0xbcb   : > { %7065 = vmatprep.subr.bf16.mxu0 %v7824_v48 }
 0xbcd   : > { %7054 = vmatmul.mubr.msk.bf16.gmra.mrb[108].mxu0 %vm3196_vm13, %v7547_v32  ;;  %v7574_v32 = vld [vmem:[%s8482_s5 + $0x1e8] ss:$12 sps:$4 sm:$0xff]   ;;  %s7280_s5 = smul.u32 288, %s9163_s3 }
 0xbce   : > { %7067 = vmatprep.mubr.msk.bf16.mxu0 %vm7825_vm11, %v7824_v48  ;;  %7066 = vmatpush3.bf16.msra.mxu0 %v7567_v47 }
 0xbcf   : > { %7095 = vmatprep.subr.bf16.mxu0 %v7824_v48  ;;  %s8838_s22 = scalar_lea.vmem %s9153_s10, %s7280_s5  ;;  %s9155_s5 = sld [smem:[#allocation26_spill]] }
 0xbd0   : > { %s9156_s10 = sld [smem:[#allocation28_spill]] }
 0xc78   : > { %v4102_v49 = vpop.f32.mrb[88].mxu0 }
 0xc79   : > { %v8724_v50 = vadd.f32 %v4102_v49, %v8651_v51  ;;  %v7031_v52 = vpop.f32.mrb[89].mxu0 }
 0xc7a   : > { %v4105_v53 = vpop.f32.mrb[90].mxu0 }
 0xc7b   : > { %v8727_v55 = vadd.f32 %v4105_v53, %v8653_v54  ;;  %v7032_v56 = vpop.f32.mrb[91].mxu0 }
 0xc80   : > { %v4110_v58 = vpop.f32.mrb[92].mxu0 }
 0xc81   : > { %v8730_v59 = vadd.f32 %v4110_v58, %v8655_v57  ;;  %v7035_v61 = vpop.f32.mrb[93].mxu0 }
 0xc82   : > { %v4113_v62 = vpop.f32.mrb[94].mxu0 }
 0xc83   : > { %v8733_v0 = vadd.f32 %v4113_v62, %v8657_v60  ;;  %v7036_v4 = vpop.f32.mrb[95].mxu0 }
 0xc88   : > { %v4061_v6 = vpop.f32.mrb[92].mxu1  ;;  %v4118_v8 = vpop.f32.mrb[96].mxu0 }
 0xc89   : > { %v8736_v51 = vadd.f32 %v4061_v6, %v8659_v1  ;;  %v8739_v9 = vadd.f32 %v4118_v8, %v8661_v3  ;;  %v4063_v54 = vpop.f32.mrb[93].mxu1  ;;  %v7039_v10 = vpop.f32.mrb[97].mxu0 }
 0xc8a   : > { %v8742_v11 = vadd.f32 %v4063_v54, %v8663_v7  ;;  %v4065_v57 = vpop.f32.mrb[94].mxu1  ;;  %v4121_v12 = vpop.f32.mrb[98].mxu0 }
 0xc8b   : > { %v4066_v13 = vpop.f32.mrb[95].mxu1  ;;  %v7040_v14 = vpop.f32.mrb[99].mxu0 }
 0xc90   : > { %v4201_v60 = vpop.f32.mrb[100].mxu0 }
 0xc91   : > { %v7047_v15 = vpop.f32.mrb[101].mxu0 }
 0xc92   : > { %v4204_v16 = vpop.f32.mrb[102].mxu0 }
 0xc93   : > { %v4223_v17 = vpack.c.bf16 %v4204_v16, %v4201_v60  ;;  %v7048_v18 = vpop.f32.mrb[103].mxu0 }
 0xc95   : > { %6391 = vmatmul.mubr.msk.bf16.vlgmr.msra.gmra.mrb[64].mxu1 %vm3477_vm14, %v4223_v17  ;;  %7068 = vmatmul.mubr.msk.bf16.vlgmr.msra.gmra.mrb[112].mxu0 %vm3477_vm14, %v4223_v17 }
 0xc96   : > { %7080 = vmatpush3.bf16.msra.mxu1 %v8488_v63  ;;  %4378 = vmatprep.mubr.bf16.mxu1 %v7823_v5 }
 0xc97   : > { %7081 = vmatprep.subr.bf16.mxu1 %v7824_v48  ;;  %7071 = vmatprep.mubr.msk.bf16.mxu0 %vm7825_vm11, %v7824_v48 }
 0xc98   : > { %v4209_v1 = vpop.f32.mrb[104].mxu0  ;;  %7096 = vmatpush3.bf16.msra.mxu0 %v7574_v32 }
 0xc99   : > { %v7051_v3 = vpop.f32.mrb[105].mxu0  ;;  %7097 = vmatprep.subr.bf16.mxu0 %v7824_v48 }
 0xc9a   : > { %7082 = vmatpush3.bf16.msra.mxu1 %v8496_v2  ;;  %v4212_v7 = vpop.f32.mrb[106].mxu0  ;;  %v7568_v2 = vld [vmem:[%s9152_s0 + $0x50] sm:$0xff]  }
 0xc9b   : > { %v4224_v19 = vpack.c.bf16 %v4212_v7, %v4209_v1  ;;  %v7052_v20 = vpop.f32.mrb[107].mxu0  ;;  %4665 = vmatprep.subr.bf16.mxu1 %v7573_v30 }
 0xc9c   : > { %7098 = vmatpush3.bf16.msra.mxu0 %v7578_v35 }
 0xc9d   : > { %6392 = vmatmul.mubr.msk.bf16.gmra.mrb[68].mxu1 %vm3477_vm14, %v4224_v19  ;;  %7072 = vmatmul.mubr.msk.bf16.gmra.mrb[116].mxu0 %vm3477_vm14, %v4224_v19 }
 0xc9e   : > { %4388 = vmatprep.mubr.bf16.mxu1 %v7823_v5  ;;  %7075 = vmatprep.mubr.msk.bf16.mxu0 %vm7825_vm11, %v7824_v48 }
 0xc9f   : > { %7099 = vmatprep.subr.bf16.mxu0 %v7824_v48 }
 0xca0   : > { %v4217_v63 = vpop.f32.mrb[108].mxu0  ;;  %7100 = vmatpush3.bf16.msra.mxu0 %v7582_v38 }
 0xca1   : > { %v4225_v22 = vpack.c.bf16 %v4217_v63, %v4217_v63  ;;  %v7055_v23 = vpop.f32.mrb[109].mxu0  ;;  %7101 = vmatprep.subr.bf16.mxu0 %v7824_v48 }
 0xca2   : > { %v4220_v24 = vpop.f32.mrb[110].mxu0  ;;  %v4797_v23 = vld [vmem:[%s899_s14] sm:$0x7] }
 0xca3   : > { %v7056_v26 = vpop.f32.mrb[111].mxu0  ;;  %v4809_v24 = vsub.s32 2, %v8346_v21 }
 0xca4   : > { %7102 = vmatpush3.bf16.msra.mxu0 %v7586_v41  ;;  %v8847_v26 = vrot.slane %v4797_v23, %v2153_v25 }
 0xca5   : > { %6393 = vmatmul.mubr.msk.bf16.gmra.mrb[96].mxu1 %vm3477_vm14, %v4225_v22  ;;  %7076 = vmatmul.mubr.msk.bf16.gmra.mrb[120].mxu0 %vm3477_vm14, %v4225_v22 }
 0xca6   : > { %7083 = vmatprep.mubr.msk.bf16.mxu1 %vm7825_vm11, %v7824_v48  ;;  %7105 = vmatprep.mubr.msk.bf16.mxu0 %vm7825_vm11, %v7824_v48 }
 0xca7   : > { %7103 = vmatprep.subr.bf16.mxu0 %v7824_v48 }
 0xca8   : > { %7104 = vmatpush3.bf16.msra.mxu0 %v7590_v44 }
 0xcad   : > { %7084 = vmatmul.mubr.msk.bf16.vlgmr.msra.gmra.mrb[100].mxu1 %vm3196_vm13, %v7568_v2  ;;  %v8851_v2 = vrot.slane %v4797_v23, %v2157_v29 }
 0xcae   : > { %7087 = vmatprep.mubr.msk.bf16.mxu1 %vm7825_vm11, %v7824_v48  ;;  %4666 = vmatpush1.bf16.msra.mxu1 %v7571_v31 }
 0xcaf   : > { %4667 = vmatprep.subr.bf16.mxu1 %v7577_v34 }
 0xcb2   : > { %4668 = vmatpush1.bf16.msra.mxu1 %v7575_v33 }
 0xcb3   : > { %4669 = vmatprep.subr.bf16.mxu1 %v7581_v36 }
 0xcb5   : > { %7088 = vmatmul.mubr.msk.bf16.gmra.mrb[104].mxu1 %vm3196_vm13, %v7569_v27  ;;  %v8853_v27 = vrot.slane %v4797_v23, %v4809_v24 }
 0xcb6   : > { %7091 = vmatprep.mubr.msk.bf16.mxu1 %vm7825_vm11, %v7824_v48  ;;  %4670 = vmatpush1.bf16.msra.mxu1 %v7579_v37 }
 0xcb7   : > { %4671 = vmatprep.subr.bf16.mxu1 %v7585_v40 }
 0xcba   : > { %4672 = vmatpush1.bf16.msra.mxu1 %v7583_v39 }
 0xcbb   : > { %4673 = vmatprep.subr.bf16.mxu1 %v7589_v42 }
 0xcbd   : > { %7092 = vmatmul.mubr.msk.bf16.gmra.mrb[108].mxu1 %vm3196_vm13, %v7570_v28 }
 0xcbe   : > { %4697 = vmatprep.mubr.bf16.mxu1 %v7823_v5  ;;  %4674 = vmatpush1.bf16.msra.mxu1 %v7587_v43 }
 0xcbf   : > { %7117 = vmatprep.subr.bf16.mxu1 %v7824_v48 }
 0xd68   : > { %v4431_v45 = vpop.f32.mrb[112].mxu0 }
 0xd69   : > { %v4455_v46 = vadd.f32 %v4431_v45, %v8724_v50  ;;  %v7069_v47 = vpop.f32.mrb[113].mxu0 }
 0xd6a   : > { %v4434_v49 = vpop.f32.mrb[114].mxu0 }
 0xd6b   : > { %v8802_v52 = vadd.f32 %v4434_v49, %v8727_v55  ;;  %v7070_v53 = vpop.f32.mrb[115].mxu0 }
 0xd70   : > { %v4439_v56 = vpop.f32.mrb[116].mxu0 }
 0xd71   : > { %v8805_v58 = vadd.f32 %v4439_v56, %v8730_v59  ;;  %v7073_v61 = vpop.f32.mrb[117].mxu0 }
 0xd72   : > { %v4442_v62 = vpop.f32.mrb[118].mxu0 }
 0xd73   : > { %v8808_v4 = vadd.f32 %v4442_v62, %v8733_v0  ;;  %v7074_v6 = vpop.f32.mrb[119].mxu0 }
 0xd78   : > { %v4390_v8 = vpop.f32.mrb[96].mxu1  ;;  %v4447_v54 = vpop.f32.mrb[120].mxu0 }
 0xd79   : > { %v8811_v50 = vadd.f32 %v4390_v8, %v8736_v51  ;;  %v8814_v10 = vadd.f32 %v4447_v54, %v8739_v9  ;;  %v4392_v55 = vpop.f32.mrb[97].mxu1  ;;  %v7077_v57 = vpop.f32.mrb[121].mxu0 }
 0xd7a   : > { %v8817_v12 = vadd.f32 %v4392_v55, %v8742_v11  ;;  %v4394_v59 = vpop.f32.mrb[98].mxu1  ;;  %v4450_v13 = vpop.f32.mrb[122].mxu0 }
 0xd7b   : > { %v4395_v14 = vpop.f32.mrb[99].mxu1  ;;  %v7078_v60 = vpop.f32.mrb[123].mxu0 }
 0xd80   : > { %v4530_v0 = vpop.f32.mrb[100].mxu1 }
 0xd81   : > { %v7085_v15 = vpop.f32.mrb[101].mxu1 }
 0xd82   : > { %v4533_v16 = vpop.f32.mrb[102].mxu1 }
 0xd83   : > { %v4552_v17 = vpack.c.bf16 %v4533_v16, %v4530_v0  ;;  %v7086_v18 = vpop.f32.mrb[103].mxu1 }
 0xd85   : > { %6443 = vmatmul.mubr.msk.bf16.vlgmr.msra.gmra.mrb[64].mxu1 %vm3477_vm14, %v4552_v17  ;;  %7106 = vmatmul.mubr.msk.bf16.vlgmr.msra.gmra.mrb[124].mxu0 %vm3477_vm14, %v4552_v17 }
 0xd86   : > { %4707 = vmatprep.mubr.bf16.mxu1 %v7823_v5  ;;  %7109 = vmatprep.mubr.msk.bf16.mxu0 %vm7825_vm11, %v7824_v48 }
 0xd88   : > { %v4538_v51 = vpop.f32.mrb[104].mxu1 }
 0xd89   : > { %v7089_v9 = vpop.f32.mrb[105].mxu1 }
 0xd8a   : > { %v4541_v11 = vpop.f32.mrb[106].mxu1 }
 0xd8b   : > { %v4553_v1 = vpack.c.bf16 %v4541_v11, %v4538_v51  ;;  %v7090_v3 = vpop.f32.mrb[107].mxu1 }
 0xd8d   : > { %6444 = vmatmul.mubr.msk.bf16.gmra.mrb[68].mxu1 %vm3477_vm14, %v4553_v1  ;;  %7110 = vmatmul.mubr.msk.bf16.gmra.mrb[128].mxu0 %vm3477_vm14, %v4553_v1 }
 0xd8e   : > { %4717 = vmatprep.mubr.bf16.mxu1 %v7823_v5  ;;  %7113 = vmatprep.mubr.msk.bf16.mxu0 %vm7825_vm11, %v7824_v48 }
 0xd90   : > { %v4546_v7 = vpop.f32.mrb[108].mxu1 }
 0xd91   : > { %v4554_v19 = vpack.c.bf16 %v4546_v7, %v4546_v7  ;;  %v7093_v20 = vpop.f32.mrb[109].mxu1 }
 0xd92   : > { %v4549_v63 = vpop.f32.mrb[110].mxu1 }
 0xd93   : > { %v7094_v22 = vpop.f32.mrb[111].mxu1 }
 0xd95   : > { %6445 = vmatmul.mubr.msk.bf16.gmra.mrb[112].mxu1 %vm3477_vm14, %v4554_v19  ;;  %7114 = vmatmul.mubr.msk.bf16.gmra.mrb[132].mxu0 %vm3477_vm14, %v4554_v19 }
 0xd96   : > { %7123 = vmatprep.mubr.msk.bf16.mxu1 %vm7825_vm11, %v7824_v48  ;;  %4922 = vmatprep.mubr.bf16.mxu0 %v7823_v5 }
 0xe58   : > { %v4699_v28 = vpop.f32.mrb[64].mxu1  ;;  %v4760_v30 = vpop.f32.mrb[124].mxu0 }
 0xe59   : > { %v4814_v31 = vadd.f32 %v8847_v26, %v4699_v28  ;;  %v4784_v32 = vadd.f32 %v4760_v30, %v4455_v46  ;;  %v4701_v33 = vpop.f32.mrb[65].mxu1  ;;  %v7107_v34 = vpop.f32.mrb[125].mxu0 }
 0xe5a   : > { %v4815_v35 = vadd.f32 %v8851_v2, %v4701_v33  ;;  %v4703_v36 = vpop.f32.mrb[66].mxu1  ;;  %v4763_v37 = vpop.f32.mrb[126].mxu0 }
 0xe5b   : > { %v4816_v25 = vadd.f32 %v8853_v27, %v4784_v32  ;;  %v4817_v38 = vadd.f32 %v8847_v26, %v4703_v36  ;;  %v4787_v21 = vadd.f32 %v4763_v37, %v8802_v52  ;;  %v4705_v29 = vpop.f32.mrb[67].mxu1  ;;  %v7108_v39 = vpop.f32.mrb[127].mxu0  ;;  %v4829_v41 = vmax.f32 %v4814_v31, 0.0 }
 0xe5c   : > { %v4818_v40 = vadd.f32 %v8851_v2, %v4705_v29  ;;  %v4830_v44 = vmax.f32 %v4815_v35, 0.0  ;;  %v7597_v29 = vld [vmem:[%s8838_s22 + $0xd0] sm:$0xff]  }
 0xe5d   : > { %v4832_v42 = vmax.f32 %v4817_v38, 0.0  ;;  %v4819_v43 = vadd.f32 %v8853_v27, %v4787_v21  ;;  %v4831_v46 = vmax.f32 %v4816_v25, 0.0  ;;  %v7593_v39 = vld [vmem:[%s9155_s5 + $0x10] ss:$0 sps:$4 sm:$0xff]  }
 0xe5e   : > { %v4833_v45 = vmax.f32 %v4818_v40, 0.0  ;;  %v7594_v40 = vld [vmem:[%s9155_s5 + $0x14] sm:$0xff]  }
 0xe5f   : > { %v8862_v47 = vpack.c.bf16 %v4832_v42, %v4829_v41  ;;  %v4834_v49 = vmax.f32 %v4819_v43, 0.0  ;;  %v7598_v41 = vld [vmem:[%s8838_s22 + $0x90] sm:$0xff]   ;;  %v7595_v42 = vld [vmem:[%s9155_s5 + $0x1c] sm:$0xff]   ;;  %v7596_v43 = vld [vmem:[%s9155_s5 + $0x24] ss:$0 sps:$4 sm:$0xff]  }
 0xe60   : > { %v4845_v53 = vpack.c.bf16 %v4833_v45, %v4830_v44  ;;  %v4709_v56 = vpop.f32.mrb[68].mxu1  ;;  %v4768_v61 = vpop.f32.mrb[128].mxu0  ;;  %v7599_v44 = vld [vmem:[%s8838_s22 + $0xd8] sm:$0xff]  }
 0xe61   : > { %v8864_v62 = vpack.c.bf16 %v4834_v49, %v4831_v46  ;;  %v4820_v52 = vadd.f32 %v8847_v26, %v4709_v56  ;;  %v4790_v6 = vadd.f32 %v4768_v61, %v8805_v58  ;;  %v4711_v8 = vpop.f32.mrb[69].mxu1  ;;  %v7111_v54 = vpop.f32.mrb[129].mxu0  ;;  %v7600_v45 = vld [vmem:[%s8838_s22 + $0x98] sm:$0xff]   ;;  %v7602_v46 = vld [vmem:[%s8838_s22 + $0xa0] sm:$0xff]   ;;  %v7604_v49 = vld [vmem:[%s8838_s22 + $0xa8] sm:$0xff]  }
 0xe62   : > { %v4821_v55 = vadd.f32 %v8851_v2, %v4711_v8  ;;  %v4713_v57 = vpop.f32.mrb[70].mxu1  ;;  %v4771_v59 = vpop.f32.mrb[130].mxu0  ;;  %4890 = vmatprep.subr.bf16.mxu0 %v4845_v53  ;;  %v7606_v56 = vld [vmem:[%s8838_s22 + $0xb0] sm:$0xff]   ;;  %v7607_v61 = vld [vmem:[%s8838_s22 + $0xf8] sm:$0xff]   ;;  %v7611_v8 = vld [vmem:[%s8838_s22 + $0xc0] sm:$0xff]  }
 0xe63   : > { %v4822_v13 = vadd.f32 %v8853_v27, %v4790_v6  ;;  %v4823_v14 = vadd.f32 %v8847_v26, %v4713_v57  ;;  %v4793_v60 = vadd.f32 %v4771_v59, %v8808_v4  ;;  %v4715_v0 = vpop.f32.mrb[71].mxu1  ;;  %v7112_v15 = vpop.f32.mrb[131].mxu0  ;;  %4891 = vmatpush1.bf16.msra.mxu0 %v8862_v47  ;;  %7118 = vmatpush3.bf16.msra.mxu1 %v8864_v62  ;;  %v4835_v16 = vmax.f32 %v4820_v52, 0.0  ;;  %v7609_v52 = vld [vmem:[%s8838_s22 + $0x110] sm:$0xff]   ;;  %v7610_v6 = vld [vmem:[%s8838_s22 + $0x100] sm:$0xff]   ;;  %v7612_v54 = vld [vmem:[%s8838_s22 + $0x118] sm:$0xff]  }
 0xe64   : > { %v4824_v58 = vadd.f32 %v8851_v2, %v4715_v0  ;;  %7119 = vmatprep.subr.bf16.mxu1 %v7824_v48  ;;  %v4836_v51 = vmax.f32 %v4821_v55, 0.0  ;;  %v7613_v55 = vld [vmem:[%s8838_s22 + $0x108] sm:$0xff]   ;;  %v7615_v59 = vld [vmem:[%s8838_s22 + $0x40] sm:$0xff]  }
 0xe65   : > { %v4838_v17 = vmax.f32 %v4823_v14, 0.0  ;;  %v4825_v18 = vadd.f32 %v8853_v27, %v4793_v60  ;;  %v4837_v11 = vmax.f32 %v4822_v13, 0.0  ;;  %v7614_v57 = vld [vmem:[%s8838_s22 + $0xc8] sm:$0xff]  }
 0xe66   : > { %v4839_v9 = vmax.f32 %v4824_v58, 0.0 }
 0xe67   : > { %v4847_v1 = vpack.c.bf16 %v4838_v17, %v4835_v16  ;;  %v4840_v3 = vmax.f32 %v4825_v18, 0.0 }
 0xe68   : > { %v4848_v4 = vpack.c.bf16 %v4839_v9, %v4836_v51  ;;  %v4719_v7 = vpop.f32.mrb[112].mxu1  ;;  %v4776_v19 = vpop.f32.mrb[132].mxu0 }
 0xe69   : > { %v4849_v20 = vpack.c.bf16 %v4840_v3, %v4837_v11  ;;  %v4794_v63 = vadd.f32 %v4719_v7, %v8811_v50  ;;  %v4796_v22 = vadd.f32 %v4776_v19, %v8814_v10  ;;  %v4721_v23 = vpop.f32.mrb[113].mxu1  ;;  %v7115_v24 = vpop.f32.mrb[133].mxu0 }
 0xe6a   : > { %v4795_v28 = vadd.f32 %v4721_v23, %v8817_v12  ;;  %v4723_v30 = vpop.f32.mrb[114].mxu1  ;;  %v4779_v31 = vpop.f32.mrb[134].mxu0  ;;  %4892 = vmatprep.subr.bf16.mxu0 %v4848_v4 }
 0xe6b   : > { %v4826_v32 = vadd.f32 %v8847_v26, %v4794_v63  ;;  %v4828_v33 = vadd.f32 %v8853_v27, %v4796_v22  ;;  %v4724_v34 = vpop.f32.mrb[115].mxu1  ;;  %v7116_v35 = vpop.f32.mrb[135].mxu0  ;;  %4893 = vmatpush1.bf16.msra.mxu0 %v4847_v1  ;;  %7120 = vmatpush3.bf16.msra.mxu1 %v4849_v20  ;;  %v7591_v27 = vld [vmem:[%s9155_s5] sm:$0xff]  }
 0xe6c   : > { %v4827_v36 = vadd.f32 %v8851_v2, %v4795_v28  ;;  %7121 = vmatprep.subr.bf16.mxu1 %v7824_v48  ;;  %v7592_v2 = vld [vmem:[%s9155_s5 + $0x8] sm:$0xff]  }
 0xe6d   : > { %v4841_v50 = vmax.f32 %v4826_v32, 0.0  ;;  %v4843_v10 = vmax.f32 %v4828_v33, 0.0 }
 0xe6e   : > { %v4842_v37 = vmax.f32 %v4827_v36, 0.0 }
 0xe6f   : > { %v4850_v25 = vpack.c.bf16 %v4841_v50, %v4841_v50  ;;  %v4852_v12 = vpack.c.bf16 %v4843_v10, %v4843_v10 }
 0xe70   : > { %v4851_v38 = vpack.c.bf16 %v4842_v37, %v4842_v37 }
 0xe71   : > { %v4888_v21 = vsel %vm3206_vm12, %v4852_v12, 0  ;;  %v4882_v26 = vsel %vm3206_vm12, %v4850_v25, 0 }
 0xe72   : > { %6452 = vmatprep.subr.msk.bf16.mxu0 %vm3206_vm12, %v4851_v38  ;;  %7122 = vmatpush3.bf16.msra.mxu1 %v4888_v21 }
 0xe73   : > { %4895 = vmatpush1.bf16.msra.mxu0 %v4882_v26  ;;  %7135 = vmatprep.subr.bf16.mxu1 %v7824_v48 }
 0xe74   : > { %5080 = vmatprep.subr.bf16.mxu0 %v4845_v53  ;;  %v7605_v53 = vld [vmem:[%s8838_s22 + $0xf0] sm:$0xff]  }
 0xe75   : > { %7124 = vmatmul.mubr.msk.bf16.vlgmr.msra.gmra.mrb[116].mxu1 %vm4871_vm15, %v7591_v27 }
 0xe76   : > { %6453 = vmatmul.mubr.msk.bf16.vlgmr.msra.gmra.mrb[136].mxu0 %vm4871_vm15, %v7591_v27  ;;  %7136 = vmatpush3.bf16.msra.mxu1 %v8864_v62  ;;  %v7608_v62 = vld [vmem:[%s8838_s22 + $0xb8] sm:$0xff]  }
 0xe77   : > { %5081 = vmatpush1.bf16.msra.mxu0 %v8862_v47  ;;  %7137 = vmatprep.subr.bf16.mxu1 %v7824_v48  ;;  %v7603_v47 = vld [vmem:[%s8838_s22 + $0xe8] sm:$0xff]  }
 0xe78   : > { %5082 = vmatprep.subr.bf16.mxu0 %v4848_v4  ;;  %7127 = vmatprep.mubr.msk.bf16.mxu1 %vm7825_vm11, %v7824_v48 }
 0xe79   : > { %4932 = vmatprep.mubr.bf16.mxu0 %v7823_v5 }
 0xe7a   : > { %7138 = vmatpush3.bf16.msra.mxu1 %v4849_v20 }
 0xe7b   : > { %5083 = vmatpush1.bf16.msra.mxu0 %v4847_v1  ;;  %7139 = vmatprep.subr.bf16.mxu1 %v7824_v48 }
 0xe7c   : > { %6467 = vmatprep.subr.msk.bf16.mxu0 %vm3206_vm12, %v4851_v38  ;;  %v7623_v38 = vld [vmem:[%s8838_s22 + $0x80] sm:$0xff]  }
 0xe7d   : > { %7128 = vmatmul.mubr.msk.bf16.gmra.mrb[120].mxu1 %vm4871_vm15, %v7592_v2 }
 0xe7e   : > { %6454 = vmatmul.mubr.msk.bf16.gmra.mrb[140].mxu0 %vm4871_vm15, %v7592_v2  ;;  %7140 = vmatpush3.bf16.msra.mxu1 %v4888_v21 }
 0xe7f   : > { %5085 = vmatpush1.bf16.msra.mxu0 %v4882_v26  ;;  %7131 = vmatprep.mubr.msk.bf16.mxu1 %vm7825_vm11, %v7824_v48 }
 0xe80   : > { %4942 = vmatprep.mubr.bf16.mxu0 %v7823_v5  ;;  %6707 = vmatprep.subr.bf16.mxu0 %v7597_v29 }
 0xe81   : > { %7153 = vmatprep.subr.bf16.mxu1 %v7824_v48 }
 0xe85   : > { %7132 = vmatmul.mubr.msk.bf16.gmra.mrb[124].mxu1 %vm4871_vm15, %v7593_v39 }
 0xe86   : > { %6455 = vmatmul.mubr.msk.bf16.gmra.mrb[144].mxu0 %vm4871_vm15, %v7593_v39  ;;  %7141 = vmatprep.mubr.msk.bf16.mxu1 %vm7825_vm11, %v7824_v48 }
 0xe87   : > { %5112 = vmatprep.mubr.bf16.mxu0 %v7823_v5 }
 0xe8d   : > { %7142 = vmatmul.mubr.msk.bf16.vlgmr.msra.gmra.mrb[128].mxu1 %vm4871_vm15, %v7594_v40 }
 0xe8e   : > { %6468 = vmatmul.mubr.msk.bf16.vlgmr.msra.gmra.mrb[148].mxu0 %vm4871_vm15, %v7594_v40  ;;  %7145 = vmatprep.mubr.msk.bf16.mxu1 %vm7825_vm11, %v7824_v48  ;;  %v7616_v40 = vld [vmem:[%s8838_s22] sm:$0xff]  }
 0xe8f   : > { %5122 = vmatprep.mubr.bf16.mxu0 %v7823_v5  ;;  %6708 = vmatpush3.bf16.msra.mxu0 %v7598_v41  ;;  %v7617_v41 = vld [vmem:[%s8838_s22 + $0x48] sm:$0xff]  }
 0xe90   : > { %6709 = vmatprep.subr.bf16.mxu0 %v7599_v44  ;;  %7154 = vmatpush3.bf16.msra.mxu1 %v7609_v52 }
 0xe91   : > { %7155 = vmatprep.subr.bf16.mxu1 %v7824_v48 }
 0xe93   : > { %6710 = vmatpush3.bf16.msra.mxu0 %v7600_v45 }
 0xe94   : > { %7156 = vmatpush3.bf16.msra.mxu1 %v7612_v54  ;;  %v7621_v54 = vld [vmem:[%s8838_s22 + $0x58] sm:$0xff]  }
 0xe95   : > { %7146 = vmatmul.mubr.msk.bf16.gmra.mrb[132].mxu1 %vm4871_vm15, %v7595_v42  ;;  %7169 = vmatprep.subr.bf16.mxu1 %v7824_v48 }
 0xe96   : > { %6469 = vmatmul.mubr.msk.bf16.gmra.mrb[152].mxu0 %vm4871_vm15, %v7595_v42  ;;  %7149 = vmatprep.mubr.msk.bf16.mxu1 %vm7825_vm11, %v7824_v48  ;;  %v7626_v42 = vld [vmem:[%s8838_s22 + $0x88] sm:$0xff]  }
 0xe97   : > { %5132 = vmatprep.mubr.bf16.mxu0 %v7823_v5  ;;  %v7601_v5 = vld [vmem:[%s8838_s22 + $0xe0] sm:$0xff]  }
 0xe98   : > { %6711 = vmatprep.subr.bf16.mxu0 %v7601_v5  ;;  %v7618_v5 = vld [vmem:[%s8838_s22 + $0x8] sm:$0xff]  }
 0xe99   : > { %6712 = vmatpush3.bf16.msra.mxu0 %v7602_v46 }
 0xe9a   : > { %6713 = vmatprep.subr.bf16.mxu0 %v7603_v47 }
 0xe9d   : > { %7150 = vmatmul.mubr.msk.bf16.gmra.mrb[136].mxu1 %vm4871_vm15, %v7596_v43  ;;  %6714 = vmatpush3.bf16.msra.mxu0 %v7604_v49  ;;  %v7619_v49 = vld [vmem:[%s8838_s22 + $0x50] sm:$0xff]  }
 0xe9e   : > { %6470 = vmatmul.mubr.msk.bf16.gmra.mrb[156].mxu0 %vm4871_vm15, %v7596_v43  ;;  %7157 = vmatprep.mubr.msk.bf16.mxu1 %vm7825_vm11, %v7824_v48 }
 0xe9f   : > { %6715 = vmatprep.subr.bf16.mxu0 %v7605_v53 }
 0xea1   : > { %6716 = vmatpush3.bf16.msra.mxu0 %v7606_v56 }
 0xea2   : > { %6717 = vmatprep.subr.bf16.mxu0 %v7607_v61 }
 0xea5   : > { %6718 = vmatpush3.bf16.msra.mxu0 %v7608_v62 }
 0xea6   : > { %6719 = vmatprep.subr.bf16.mxu0 %v7610_v6 }
 0xea9   : > { %6720 = vmatpush3.bf16.msra.mxu0 %v7611_v8  ;;  %v7620_v8 = vld [vmem:[%s8838_s22 + $0x10] sm:$0xff]  }
 0xeaa   : > { %6721 = vmatprep.subr.bf16.mxu0 %v7613_v55 }
 0xead   : > { %6722 = vmatpush3.bf16.msra.mxu0 %v7614_v57 }
 0xeae   : > { %6746 = vmatprep.subr.bf16.mxu0 %v7615_v59 }
 0xf48   : > { %v8962_v13 = vpop.f32.mrb[116].mxu1 }
 0xf49   : > { %v8964_v14 = vpop.f32.mrb[136].mxu0  ;;  %v7125_v60 = vpop.f32.mrb[117].mxu1 }
 0xf4a   : > { %v8966_v0 = vpop.f32.mrb[137].mxu0  ;;  %v8968_v15 = vpop.f32.mrb[118].mxu1  ;;  %v7622_v60 = vld [vmem:[%s8838_s22 + $0x18] sm:$0xff]  }
 0xf4b   : > { %v8970_v58 = vpop.f32.mrb[138].mxu0  ;;  %v5009_v16 = vpack.c.bf16 %v8968_v15, %v8962_v13  ;;  %v7126_v17 = vpop.f32.mrb[119].mxu1 }
 0xf4c   : > { %v5007_v18 = vpack.c.bf16 %v8970_v58, %v8964_v14  ;;  %v8976_v51 = vpop.f32.mrb[139].mxu0 }
 0xf4d   : > { %v5008_v9 = vpack.c.bf16 %v8976_v51, %v8966_v0 }
 0xf50   : > { %v8980_v11 = vpop.f32.mrb[120].mxu1 }
 0xf51   : > { %v8982_v1 = vpop.f32.mrb[140].mxu0  ;;  %v7129_v3 = vpop.f32.mrb[121].mxu1 }
 0xf52   : > { %v8984_v4 = vpop.f32.mrb[141].mxu0  ;;  %v8986_v7 = vpop.f32.mrb[122].mxu1 }
 0xf53   : > { %v8988_v19 = vpop.f32.mrb[142].mxu0  ;;  %v5012_v20 = vpack.c.bf16 %v8986_v7, %v8980_v11  ;;  %v7130_v63 = vpop.f32.mrb[123].mxu1 }
 0xf54   : > { %v5010_v22 = vpack.c.bf16 %v8988_v19, %v8982_v1  ;;  %v8994_v23 = vpop.f32.mrb[143].mxu0  ;;  %v7624_v63 = vld [vmem:[%s8838_s22 + $0x60] sm:$0xff]  }
 0xf55   : > { %v5011_v24 = vpack.c.bf16 %v8994_v23, %v8984_v4 }
 0xf58   : > { %v8998_v28 = vpop.f32.mrb[124].mxu1 }
 0xf59   : > { %v9000_v30 = vpop.f32.mrb[144].mxu0  ;;  %v7133_v31 = vpop.f32.mrb[125].mxu1  ;;  %v5015_v13 = vpack.c.bf16 %v8998_v28, %v8998_v28 }
 0xf5a   : > { %v9002_v32 = vpop.f32.mrb[145].mxu0  ;;  %v5004_v33 = vpop.f32.mrb[126].mxu1 }
 0xf5b   : > { %v4948_v34 = vpop.f32.mrb[146].mxu0  ;;  %v7134_v35 = vpop.f32.mrb[127].mxu1  ;;  %v5014_v0 = vpack.c.bf16 %v9002_v32, %v9002_v32 }
 0xf5c   : > { %v4949_v36 = vpop.f32.mrb[147].mxu0 }
 0xf60   : > { %v5175_v50 = vpop.f32.mrb[128].mxu1 }
 0xf61   : > { %v5114_v10 = vpop.f32.mrb[148].mxu0  ;;  %v7143_v37 = vpop.f32.mrb[129].mxu1 }
 0xf62   : > { %v5116_v25 = vpop.f32.mrb[149].mxu0  ;;  %v5178_v12 = vpop.f32.mrb[130].mxu1  ;;  %v7627_v37 = vld [vmem:[%s8838_s22 + $0x68] sm:$0xff]  }
 0xf63   : > { %v5199_v21 = vpack.c.bf16 %v5178_v12, %v5175_v50  ;;  %v5118_v26 = vpop.f32.mrb[150].mxu0  ;;  %v7144_v27 = vpop.f32.mrb[131].mxu1  ;;  %v7629_v12 = vld [vmem:[%s8838_s22 + $0x70] sm:$0xff]  }
 0xf64   : > { %v5197_v2 = vpack.c.bf16 %v5118_v26, %v5114_v10  ;;  %v5120_v29 = vpop.f32.mrb[151].mxu0  ;;  %v7625_v10 = vld [vmem:[%s8838_s22 + $0x20] sm:$0xff]   ;;  %v7632_v26 = vld [vmem:[%s8838_s22 + $0x38] sm:$0xff]  }
 0xf65   : > { %v5198_v39 = vpack.c.bf16 %v5120_v29, %v5116_v25  ;;  %7158 = vmatmul.mubr.msk.bf16.vlgmr.msra.gmra.mrb[140].mxu1 %vm1316_vm5, %v5199_v21  ;;  %v7628_v25 = vld [vmem:[%s8838_s22 + $0x28] sm:$0xff]   ;;  %v7631_v21 = vld [vmem:[%s8838_s22 + $0x78] sm:$0xff]  }
 0xf66   : > { %7161 = vmatprep.mubr.msk.bf16.mxu1 %vm7825_vm11, %v7824_v48  ;;  %7170 = vmatpush3.bf16.msra.mxu1 %v7623_v38  ;;  %v7630_v38 = vld [vmem:[%s8838_s22 + $0x30] sm:$0xff]   ;;  %s7281_s22 = smul.u32 40, %s9163_s3 }
 0xf67   : > { %5392 = vmatprep.mubr.bf16.mxu0 %v5198_v39  ;;  %7171 = vmatprep.subr.bf16.mxu1 %v7824_v48 }
 0xf68   : > { %v5183_v43 = vpop.f32.mrb[132].mxu1  ;;  %5393 = vmatmul.mubr.bf16.vlgmr.msra.gmra.mrb[160].mxu0 %v5197_v2  ;;  %s909_s4 = scalar_lea.vmem %s9156_s10, %s7281_s22 }
 0xf69   : > { %6747 = vmatpush3.bf16.msra.mxu0 %v7616_v40  ;;  %v5124_v44 = vpop.f32.mrb[152].mxu0  ;;  %v7147_v45 = vpop.f32.mrb[133].mxu1 }
 0xf6a   : > { %v5126_v46 = vpop.f32.mrb[153].mxu0  ;;  %v5186_v47 = vpop.f32.mrb[134].mxu1  ;;  %6748 = vmatprep.subr.bf16.mxu0 %v7617_v41  ;;  %7172 = vmatpush3.bf16.msra.mxu1 %v7626_v42 }
 0xf6b   : > { %v5202_v53 = vpack.c.bf16 %v5186_v47, %v5183_v43  ;;  %v5128_v56 = vpop.f32.mrb[154].mxu0  ;;  %v7148_v61 = vpop.f32.mrb[135].mxu1 }
 0xf6c   : > { %v5200_v62 = vpack.c.bf16 %v5128_v56, %v5124_v44  ;;  %v5130_v52 = vpop.f32.mrb[155].mxu0 }
 0xf6d   : > { %v5201_v6 = vpack.c.bf16 %v5130_v52, %v5126_v46  ;;  %6749 = vmatpush3.bf16.msra.mxu0 %v7618_v5  ;;  %7162 = vmatmul.mubr.msk.bf16.gmra.mrb[144].mxu1 %vm1316_vm5, %v5202_v53 }
 0xf6e   : > { %6750 = vmatprep.subr.bf16.mxu0 %v7619_v49  ;;  %7165 = vmatprep.mubr.msk.bf16.mxu1 %vm7825_vm11, %v7824_v48 }
 0xf6f   : > { %5400 = vmatprep.mubr.bf16.mxu0 %v5201_v6 }
 0xf70   : > { %5401 = vmatmul.mubr.bf16.gmra.mrb[164].mxu0 %v5200_v62  ;;  %v5191_v55 = vpop.f32.mrb[136].mxu1 }
 0xf71   : > { %6751 = vmatpush3.bf16.msra.mxu0 %v7620_v8  ;;  %v5205_v57 = vpack.c.bf16 %v5191_v55, %v5191_v55  ;;  %v5134_v59 = vpop.f32.mrb[156].mxu0  ;;  %v7151_v17 = vpop.f32.mrb[137].mxu1 }
 0xf72   : > { %6752 = vmatprep.subr.bf16.mxu0 %v7621_v54  ;;  %v5136_v3 = vpop.f32.mrb[157].mxu0  ;;  %v5194_v31 = vpop.f32.mrb[138].mxu1  ;;  %v5203_v36 = vpack.c.bf16 %v5134_v59, %v5134_v59 }
 0xf73   : > { %v5204_v33 = vpack.c.bf16 %v5136_v3, %v5136_v3  ;;  %v5138_v34 = vpop.f32.mrb[158].mxu0  ;;  %v7152_v35 = vpop.f32.mrb[139].mxu1 }
 0xf74   : > { %v5139_v50 = vpop.f32.mrb[159].mxu0 }
 0xf75   : > { %6753 = vmatpush3.bf16.msra.mxu0 %v7622_v60  ;;  %7166 = vmatmul.mubr.msk.bf16.gmra.mrb[148].mxu1 %vm1316_vm5, %v5205_v57 }
 0xf76   : > { %5408 = vmatprep.mubr.bf16.mxu0 %v5204_v33  ;;  %6754 = vmatprep.subr.bf16.mxu0 %v7624_v63  ;;  %v6552_v33 = vld [vmem:[%s759_s29] ss:$0 sm:$0xff] }
 0xf77   : > { %7173 = vmatprep.mubr.msk.bf16.mxu1 %vm7825_vm11, %v7824_v48 }
 0xf78   : > { %5409 = vmatmul.mubr.bf16.gmra.mrb[168].mxu0 %v5203_v36 }
 0xf79   : > { %6755 = vmatpush3.bf16.msra.mxu0 %v7625_v10  ;;  %5621 = vmatprep.mubr.bf16.mxu0 %v5008_v9 }
 0xf7a   : > { %6756 = vmatprep.subr.bf16.mxu0 %v7627_v37 }
 0xf7d   : > { %6757 = vmatpush3.bf16.msra.mxu0 %v7628_v25  ;;  %7174 = vmatmul.mubr.msk.bf16.vlgmr.msra.gmra.mrb[152].mxu1 %vm1316_vm5, %v5009_v16 }
 0xf7e   : > { %6758 = vmatprep.subr.bf16.mxu0 %v7629_v12  ;;  %7177 = vmatprep.mubr.msk.bf16.mxu1 %vm7825_vm11, %v7824_v48 }
 0xf81   : > { %6759 = vmatpush3.bf16.msra.mxu0 %v7630_v38 }
 0xf82   : > { %6760 = vmatprep.subr.bf16.mxu0 %v7631_v21 }
 0xf85   : > { %6761 = vmatpush3.bf16.msra.mxu0 %v7632_v26  ;;  %7178 = vmatmul.mubr.msk.bf16.gmra.mrb[156].mxu1 %vm1316_vm5, %v5012_v20 }
 0xf86   : > { %7181 = vmatprep.mubr.msk.bf16.mxu1 %vm7825_vm11, %v7824_v48  ;;  %v5013_v48 = vpack.c.bf16 %v9000_v30, %v9000_v30 }
 0xf88   : > { %5622 = vmatmul.mubr.bf16.vlgmr.msra.gmra.mrb[172].mxu0 %v5007_v18 }
 0xf89   : > { %5629 = vmatprep.mubr.bf16.mxu0 %v5011_v24 }
 0xf8d   : > { %7182 = vmatmul.mubr.msk.bf16.gmra.mrb[160].mxu1 %vm1316_vm5, %v5015_v13 }
 0xf90   : > { %5630 = vmatmul.mubr.bf16.gmra.mrb[176].mxu0 %v5010_v22 }
 0xf91   : > { %5637 = vmatprep.mubr.bf16.mxu0 %v5014_v0 }
 0xf98   : > { %5638 = vmatmul.mubr.bf16.gmra.mrb[180].mxu0 %v5013_v48 }
0x1038   : > { %v5450_v14 = vpop.f32.mrb[140].mxu1 }
0x1039   : > { %v7159_v15 = vpop.f32.mrb[141].mxu1 }
0x103a   : > { %v5453_v58 = vpop.f32.mrb[142].mxu1 }
0x103b   : > { %v6723_v16 = vpop.f32.mrb[160].mxu0  ;;  %v7160_v18 = vpop.f32.mrb[143].mxu1 }
0x103c   : > { %v6724_v51 = vpop.f32.mrb[161].mxu0 }
0x103d   : > { %v6725_v9 = vadd.f32 %v6724_v51, %v6723_v16  ;;  %v6726_v11 = vpop.f32.mrb[162].mxu0 }
0x103e   : > { %v6727_v4 = vpop.f32.mrb[163].mxu0 }
0x103f   : > { %v6728_v7 = vadd.f32 %v6727_v4, %v6726_v11  ;;  %v5451_v20 = vadd.f32 %v6725_v9, %v5450_v14 }
0x1040   : > { %v5458_v23 = vpop.f32.mrb[144].mxu1 }
0x1041   : > { %v5454_v24 = vadd.f32 %v6728_v7, %v5453_v58  ;;  %v7163_v1 = vpop.f32.mrb[145].mxu1 }
0x1042   : > { %v5461_v19 = vpop.f32.mrb[146].mxu1 }
0x1043   : > { %v6729_v22 = vpop.f32.mrb[164].mxu0  ;;  %v7164_v28 = vpop.f32.mrb[147].mxu1 }
0x1044   : > { %v6730_v32 = vpop.f32.mrb[165].mxu0 }
0x1045   : > { %v6731_v30 = vadd.f32 %v6730_v32, %v6729_v22  ;;  %v6732_v27 = vpop.f32.mrb[166].mxu0 }
0x1046   : > { %v6733_v2 = vpop.f32.mrb[167].mxu0 }
0x1047   : > { %v5459_v29 = vadd.f32 %v6731_v30, %v5458_v23  ;;  %v6734_v39 = vadd.f32 %v6733_v2, %v6732_v27 }
0x1048   : > { %v5466_v40 = vpop.f32.mrb[148].mxu1 }
0x1049   : > { %v5462_v41 = vadd.f32 %v6734_v39, %v5461_v19  ;;  %v7167_v42 = vpop.f32.mrb[149].mxu1 }
0x104a   : > { %v5469_v43 = vpop.f32.mrb[150].mxu1 }
0x104b   : > { %v7168_v44 = vpop.f32.mrb[151].mxu1  ;;  %v6735_v45 = vpop.f32.mrb[168].mxu0 }
0x104c   : > { %v6736_v5 = vpop.f32.mrb[169].mxu0 }
0x104d   : > { %v6737_v46 = vadd.f32 %v6736_v5, %v6735_v45  ;;  %v6738_v47 = vpop.f32.mrb[170].mxu0 }
0x104e   : > { %v6739_v49 = vpop.f32.mrb[171].mxu0 }
0x104f   : > { %v5467_v53 = vadd.f32 %v6737_v46, %v5466_v40 }
0x1050   : > { %v5679_v56 = vpop.f32.mrb[152].mxu1 }
0x1051   : > { %v7175_v61 = vpop.f32.mrb[153].mxu1 }
0x1052   : > { %v5682_v62 = vpop.f32.mrb[154].mxu1 }
0x1053   : > { %v7176_v52 = vpop.f32.mrb[155].mxu1 }
0x1058   : > { %v5687_v6 = vpop.f32.mrb[156].mxu1 }
0x1059   : > { %v7179_v8 = vpop.f32.mrb[157].mxu1 }
0x105a   : > { %v5690_v54 = vpop.f32.mrb[158].mxu1 }
0x105b   : > { %v6762_v55 = vpop.f32.mrb[172].mxu0  ;;  %v7180_v57 = vpop.f32.mrb[159].mxu1 }
0x105c   : > { %v6763_v59 = vpop.f32.mrb[173].mxu0 }
0x105d   : > { %v6764_v60 = vadd.f32 %v6763_v59, %v6762_v55  ;;  %v6765_v17 = vpop.f32.mrb[174].mxu0 }
0x105e   : > { %v6766_v3 = vpop.f32.mrb[175].mxu0 }
0x105f   : > { %v5624_v63 = vadd.f32 %v6764_v60, %v5451_v20  ;;  %v6767_v31 = vadd.f32 %v6766_v3, %v6765_v17 }
0x1060   : > { %v5695_v34 = vpop.f32.mrb[160].mxu1 }
0x1061   : > { %v5680_v35 = vadd.f32 %v5679_v56, %v5624_v63  ;;  %v5627_v36 = vadd.f32 %v6767_v31, %v5454_v24  ;;  %v7183_v50 = vpop.f32.mrb[161].mxu1 }
0x1062   : > { %v5698_v10 = vpop.f32.mrb[162].mxu1 }
0x1063   : > { %v5708_v37 = vadd.f32 %v6552_v33, %v5680_v35  ;;  %v5683_v25 = vadd.f32 %v5682_v62, %v5627_v36  ;;  %v6768_v12 = vpop.f32.mrb[176].mxu0  ;;  %v7184_v38 = vpop.f32.mrb[163].mxu1 }
0x1064   : > { %v6769_v21 = vpop.f32.mrb[177].mxu0 }
0x1065   : > { %5713 = vst [vmem:[%s909_s4] sm:$0xff] %v5708_v37  ;;  %v5709_v26 = vadd.f32 %v6552_v33, %v5683_v25  ;;  %v6770_v13 = vadd.f32 %v6769_v21, %v6768_v12  ;;  %v6771_v0 = vpop.f32.mrb[178].mxu0 }
0x1066   : > { %v6772_v48 = vpop.f32.mrb[179].mxu0 }
0x1067   : > { %5714 = vst [vmem:[%s909_s4 + $0x8] sm:$0xff] %v5709_v26  ;;  %v5632_v14 = vadd.f32 %v6770_v13, %v5459_v29  ;;  %v6773_v15 = vadd.f32 %v6772_v48, %v6771_v0 }
0x1069   : > { %v5688_v58 = vadd.f32 %v5687_v6, %v5632_v14  ;;  %v5635_v16 = vadd.f32 %v6773_v15, %v5462_v41 }
0x106b   : > { %v5710_v18 = vadd.f32 %v6552_v33, %v5688_v58  ;;  %v5691_v51 = vadd.f32 %v5690_v54, %v5635_v16  ;;  %v6774_v9 = vpop.f32.mrb[180].mxu0 }
0x106c   : > { %v6775_v11 = vpop.f32.mrb[181].mxu0 }
0x106d   : > { %5715 = vst [vmem:[%s909_s4 + $0x10] sm:$0xff] %v5710_v18  ;;  %v5711_v4 = vadd.f32 %v6552_v33, %v5691_v51  ;;  %v6776_v7 = vadd.f32 %v6775_v11, %v6774_v9  ;;  %v6777_v20 = vpop.f32.mrb[182].mxu0 }
0x106e   : > { %v6778_v23 = vpop.f32.mrb[183].mxu0 }
0x106f   : > { %5716 = vst [vmem:[%s909_s4 + $0x18] sm:$0xff] %v5711_v4  ;;  %v5640_v24 = vadd.f32 %v6776_v7, %v5467_v53 }
0x1071   : > { %v5696_v1 = vadd.f32 %v5695_v34, %v5640_v24 }
0x1073   : > { %v5712_v19 = vadd.f32 %v6552_v33, %v5696_v1 }
0x1075   : > { %5717 = vst [vmem:[%s909_s4 + $0x20] sm:$0xff] %v5712_v19 }
0x1076 PF: > { %s9157_s27 = sld [smem:[#allocation13_spill]]  ;;  %s9158_s3 = sld [smem:[#allocation14_spill]] }
0x1077   : > { %s9159_s2 = smov %s7803_s25  ;;  %s9160_s25 = smov %s7807_s26 }
0x107c   : > { %p36_p8 = scmp.ge.s32.totalorder %s9157_s27, 4   ;;  %s9161_s26 = smov %s9158_s3 }
0x107e   :  { %38 = sbr.rel (!%p36_p8) target bundleno = 21 (0x15), region = 228 }
0x1085   :  { %5755 = vsyncpa [#allocation3], 1 }
0x1086   :  { %5757 = vsyncpa [#allocation3 + $0x1], 1 }
0x1087   :  { %5758 = vsyncpa [#allocation5], 1 }
0x1088   :  { %5760 = vsyncpa [#allocation5 + $0x1], 1 }
0x1089   :  { %5761 = vsyncpa [#allocation8], 1 }
0x108a   :  { %5763 = vsyncpa [#allocation8 + $0x1], 1 }

</bundles_post_ra>
